<compile_context>
chip_gen: v7x
topology: tpu7x:2x2x1
jax: 0.10.0
libtpu: 0.0.40
codegen_flags: <defaults>
</compile_context>

<pallas_src>
import functools
import math

import jax
import jax.numpy as jnp
from jax import lax
from jax.experimental import pallas as pl
from jax.experimental.pallas import tpu as pltpu

_BN_EPS = 1e-5


# --------------------------------------------------------------------------
# Kernel 1: 1x1 conv (channel matmul) + bias, with fused per-row-tile channel
# statistics (sum, sum of squares) for the training-mode BatchNorm that follows.
# --------------------------------------------------------------------------
def _conv1x1_stats_kernel(x_ref, w_ref, b_ref, y_ref, psum_ref, psumsq_ref,
                          acc_ref):
    ki = pl.program_id(1)
    nk = pl.num_programs(1)

    @pl.when(ki == 0)
    def _():
        acc_ref[...] = jnp.zeros_like(acc_ref)

    acc_ref[...] += jnp.dot(x_ref[...], w_ref[...],
                            preferred_element_type=jnp.float32)

    @pl.when(ki == nk - 1)
    def _():
        y = acc_ref[...] + b_ref[...]              # (tm, Cout) + (1, Cout)
        y_ref[...] = y
        # Partial BN statistics for this row tile — avoids a second full pass
        # over y just to compute batch statistics.
        psum_ref[...] = jnp.sum(y, axis=0, keepdims=True).reshape(1, 1, -1)
        psumsq_ref[...] = jnp.sum(y * y, axis=0, keepdims=True).reshape(1, 1, -1)


# --------------------------------------------------------------------------
# Kernel 2: BatchNorm (training batch statistics) + affine + optional ReLU.
# --------------------------------------------------------------------------
def _bn_act_kernel(y_ref, psum_ref, psumsq_ref, gamma_ref, beta_ref, o_ref,
                   *, inv_n, eps, relu):
    s = jnp.sum(psum_ref[...], axis=0)             # (1, C)
    sq = jnp.sum(psumsq_ref[...], axis=0)          # (1, C)
    mean = s * inv_n
    var = sq * inv_n - mean * mean                 # biased variance (BN training)
    scale = gamma_ref[...] * lax.rsqrt(var + eps)
    shift = beta_ref[...] - mean * scale
    y = y_ref[...] * scale + shift
    if relu:
        y = jnp.maximum(y, 0.0)
    o_ref[...] = y


def conv1x1_bn_act(x, w, b, gamma, beta, *, relu, eps=_BN_EPS, tm=128, tk=128):
    """act(BN(x @ w + b)) with x:(N, Cin) in lane-dense channel-last layout."""
    M, K = x.shape
    Cout = w.shape[1]
    tm = min(tm, M)
    tk = min(tk, K)
    assert M % tm == 0 and tm % 8 == 0, (M, tm)
    assert K % tk == 0 and tk % 128 == 0, (K, tk)
    assert Cout % 128 == 0, Cout
    mt, kt = M // tm, K // tk

    y, psum, psumsq = pl.pallas_call(
        _conv1x1_stats_kernel,
        out_shape=(
            jax.ShapeDtypeStruct((M, Cout), jnp.float32),
            jax.ShapeDtypeStruct((mt, 1, Cout), jnp.float32),
            jax.ShapeDtypeStruct((mt, 1, Cout), jnp.float32),
        ),
        grid=(mt, kt),
        in_specs=[
            pl.BlockSpec((tm, tk), lambda mi, ki: (mi, ki)),
            pl.BlockSpec((tk, Cout), lambda mi, ki: (ki, 0)),
            pl.BlockSpec((1, Cout), lambda mi, ki: (0, 0)),
        ],
        out_specs=[
            pl.BlockSpec((tm, Cout), lambda mi, ki: (mi, 0)),
            pl.BlockSpec((1, 1, Cout), lambda mi, ki: (mi, 0, 0)),
            pl.BlockSpec((1, 1, Cout), lambda mi, ki: (mi, 0, 0)),
        ],
        scratch_shapes=[pltpu.VMEM((tm, Cout), jnp.float32)],
        compiler_params=pltpu.CompilerParams(
            dimension_semantics=("parallel", "arbitrary")),
    )(x, w, b.reshape(1, Cout))

    out = pl.pallas_call(
        functools.partial(_bn_act_kernel, inv_n=1.0 / M, eps=eps, relu=relu),
        out_shape=jax.ShapeDtypeStruct((M, Cout), jnp.float32),
        grid=(mt,),
        in_specs=[
            pl.BlockSpec((tm, Cout), lambda mi: (mi, 0)),
            pl.BlockSpec((mt, 1, Cout), lambda mi: (0, 0, 0)),
            pl.BlockSpec((mt, 1, Cout), lambda mi: (0, 0, 0)),
            pl.BlockSpec((1, Cout), lambda mi: (0, 0)),
            pl.BlockSpec((1, Cout), lambda mi: (0, 0)),
        ],
        out_specs=pl.BlockSpec((tm, Cout), lambda mi: (mi, 0)),
        compiler_params=pltpu.CompilerParams(
            dimension_semantics=("parallel",)),
    )(y, psum, psumsq, gamma.reshape(1, Cout), beta.reshape(1, Cout))
    return out


# --------------------------------------------------------------------------
# Kernel 3: feat_var = softplus(var); features = mean / clamp(feat_var);
#           g_var = spatial mean of feat_var; pool_feat = global avg pool.
# One grid step per batch element (row tile = H*W positions).  The normalized
# per-position feature map is consumed on-chip only (never written to HBM).
# --------------------------------------------------------------------------
def _combine_kernel(mean_ref, var_ref, gvar_ref, pool_ref, *, inv_hw):
    v = jnp.log(1.0 + jnp.exp(var_ref[...]))       # softplus, as in the module
    f = mean_ref[...] / jnp.maximum(v, 1e-10)      # feat_mean / feat_var.clamp
    gvar_ref[...] = (jnp.sum(v, axis=0, keepdims=True) * inv_hw).reshape(1, 1, -1)
    pool_ref[...] = (jnp.sum(f, axis=0, keepdims=True) * inv_hw).reshape(1, 1, -1)


def combine_softplus_pool(feat_mean, var_raw, *, batch, hw):
    N, C = feat_mean.shape
    assert N == batch * hw and hw % 8 == 0 and C % 128 == 0
    g_var, pool = pl.pallas_call(
        functools.partial(_combine_kernel, inv_hw=1.0 / hw),
        out_shape=(
            jax.ShapeDtypeStruct((batch, 1, C), jnp.float32),
            jax.ShapeDtypeStruct((batch, 1, C), jnp.float32),
        ),
        grid=(batch,),
        in_specs=[
            pl.BlockSpec((hw, C), lambda b: (b, 0)),
            pl.BlockSpec((hw, C), lambda b: (b, 0)),
        ],
        out_specs=[
            pl.BlockSpec((1, 1, C), lambda b: (b, 0, 0)),
            pl.BlockSpec((1, 1, C), lambda b: (b, 0, 0)),
        ],
        compiler_params=pltpu.CompilerParams(
            dimension_semantics=("parallel",)),
    )(feat_mean, var_raw)
    return g_var.reshape(batch, C), pool.reshape(batch, C)


# --------------------------------------------------------------------------
# Kernel 4: bottleneck BatchNorm (frozen bias) + logit_layer (1x1 conv, no bias)
# on the pooled features.  Batch rows are zero-padded to a full sublane tile;
# the zero rows contribute nothing to sum / sum-of-squares, so dividing by the
# true batch size keeps the BN statistics exact.
# --------------------------------------------------------------------------
def _pooled_head_kernel(pool_ref, gamma_ref, beta_ref, wlog_ref,
                        neck_ref, logit_ref, *, inv_b, eps):
    x = pool_ref[...]                              # (Bp, C), rows >= batch are 0
    s = jnp.sum(x, axis=0, keepdims=True)
    sq = jnp.sum(x * x, axis=0, keepdims=True)
    mean = s * inv_b
    var = sq * inv_b - mean * mean
    neck = (x - mean) * lax.rsqrt(var + eps) * gamma_ref[...] + beta_ref[...]
    neck_ref[...] = neck
    logit_ref[...] = jnp.dot(neck, wlog_ref[...],
                             preferred_element_type=jnp.float32)


def pooled_bottleneck_logits(pool, gamma, beta, w_logit, *, eps=_BN_EPS):
    batch, C = pool.shape
    NC = w_logit.shape[1]
    Bp = max(8, ((batch + 7) // 8) * 8)            # pad rows to a sublane tile
    pool_p = jnp.pad(pool, ((0, Bp - batch), (0, 0)))

    neck_p, logits_p = pl.pallas_call(
        functools.partial(_pooled_head_kernel, inv_b=1.0 / batch, eps=eps),
        out_shape=(
            jax.ShapeDtypeStruct((Bp, C), jnp.float32),
            jax.ShapeDtypeStruct((Bp, NC), jnp.float32),
        ),
        grid=(1,),
        in_specs=[
            pl.BlockSpec((Bp, C), lambda i: (0, 0)),
            pl.BlockSpec((1, C), lambda i: (0, 0)),
            pl.BlockSpec((1, C), lambda i: (0, 0)),
            pl.BlockSpec((C, NC), lambda i: (0, 0)),
        ],
        out_specs=[
            pl.BlockSpec((Bp, C), lambda i: (0, 0)),
            pl.BlockSpec((Bp, NC), lambda i: (0, 0)),
        ],
        compiler_params=pltpu.CompilerParams(
            dimension_semantics=("arbitrary",)),
    )(pool_p, gamma.reshape(1, C), beta.reshape(1, C), w_logit)
    return neck_p[:batch], logits_p[:batch]


# --------------------------------------------------------------------------
# BayesHead.forward (training path)
# --------------------------------------------------------------------------
def bayes_head_forward(features, params, *, neck_feat="before"):
    """features: (B, C, H, W) float32 -> dict of training-path outputs."""
    B, C, H, W = features.shape
    HW = H * W
    # unsqueeze(2)/squeeze(2)/[...,0,0] are metadata-only -> folded into the
    # lane-dense (B*H*W, C) channel-last layout (wrapper-side layout plumbing).
    x = jnp.transpose(features, (0, 2, 3, 1)).reshape(B * HW, C)

    # bayes_head: [Conv1x1(masked weights)+BN+ReLU] x2, then [Conv1x1+BN]
    h = x
    nb = len(params["bayes"])
    for i, (w, b, g, bt) in enumerate(params["bayes"]):
        h = conv1x1_bn_act(h, w, b, g, bt, relu=i < nb - 1)

    # mean_head (FCN): Conv1x1+BN(+ReLU) chain
    m = h
    nm = len(params["mean"])
    for i, (w, b, g, bt) in enumerate(params["mean"]):
        m = conv1x1_bn_act(m, w, b, g, bt, relu=i < nm - 1)

    # var_head (FCN): Conv1x1+BN(+ReLU) chain
    v = h
    nv = len(params["var"])
    for i, (w, b, g, bt) in enumerate(params["var"]):
        v = conv1x1_bn_act(v, w, b, g, bt, relu=i < nv - 1)

    # softplus / division / g_var / global average pool — one fused kernel.
    g_var, pool_feat = combine_softplus_pool(m, v, batch=B, hw=HW)

    # bottleneck BN (bias frozen at 0) + logit_layer.
    neck, logits = pooled_bottleneck_logits(
        pool_feat, params["neck_gamma"], params["neck_beta"], params["w_logit"])

    feat = pool_feat if neck_feat == "before" else neck
    return {
        "cls_outputs": logits,        # logits.clone() in torch — same values
        "pred_class_logits": logits,
        "features": feat,             # (B, C)  (torch keeps trailing size-1 dims)
        "g_var": g_var,               # (B, C)  (torch g_var is (B, C, 1))
    }


# --------------------------------------------------------------------------
# Pure-JAX reference (same math, XLA ops) for correctness checking.
# --------------------------------------------------------------------------
def _reference_forward(features, params, *, neck_feat="before", eps=_BN_EPS):
    B, C, H, W = features.shape
    HW = H * W
    x = jnp.transpose(features, (0, 2, 3, 1)).reshape(B * HW, C)

    def layer(h, p, relu):
        w, b, g, bt = p
        y = jnp.dot(h, w, precision=lax.Precision.HIGHEST) + b[None, :]
        mean = jnp.mean(y, axis=0, keepdims=True)
        var = jnp.mean(y * y, axis=0, keepdims=True) - mean * mean
        o = (y - mean) * lax.rsqrt(var + eps) * g[None, :] + bt[None, :]
        return jnp.maximum(o, 0.0) if relu else o

    h = x
    for i, p in enumerate(params["bayes"]):
        h = layer(h, p, relu=i < len(params["bayes"]) - 1)
    m = h
    for i, p in enumerate(params["mean"]):
        m = layer(m, p, relu=i < len(params["mean"]) - 1)
    v = h
    for i, p in enumerate(params["var"]):
        v = layer(v, p, relu=i < len(params["var"]) - 1)

    fv = jnp.log(1.0 + jnp.exp(v))
    f = m / jnp.maximum(fv, 1e-10)
    g_var = jnp.mean(fv.reshape(B, HW, -1), axis=1)
    pool = jnp.mean(f.reshape(B, HW, -1), axis=1)

    mean = jnp.mean(pool, axis=0, keepdims=True)
    var = jnp.mean(pool * pool, axis=0, keepdims=True) - mean * mean
    neck = ((pool - mean) * lax.rsqrt(var + eps) * params["neck_gamma"][None, :]
            + params["neck_beta"][None, :])
    logits = jnp.dot(neck, params["w_logit"], precision=lax.Precision.HIGHEST)
    feat = pool if neck_feat == "before" else neck
    return {"cls_outputs": logits, "pred_class_logits": logits,
            "features": feat, "g_var": g_var}


# --------------------------------------------------------------------------
# Parameter construction helpers (parameter prep, outside the kernels).
# --------------------------------------------------------------------------
def _layer_params(key, cin, cout):
    kw, kb, kg, kbt = jax.random.split(key, 4)
    w = jax.random.normal(kw, (cin, cout), jnp.float32) * (1.0 / math.sqrt(cin))
    b = jax.random.normal(kb, (cout,), jnp.float32) * 0.01
    gamma = 1.0 + 0.1 * jax.random.normal(kg, (cout,), jnp.float32)
    beta = 0.1 * jax.random.normal(kbt, (cout,), jnp.float32)
    return w, b, gamma, beta


def _masked_layer_params(key, cin, cout, p_keep):
    # BayesDropoutConv2_5d: weight/bias multiplied by Bernoulli(p) masks.
    kp, kmw, kmb = jax.random.split(key, 3)
    w, b, gamma, beta = _layer_params(kp, cin, cout)
    w = w * jax.random.bernoulli(kmw, p_keep, w.shape).astype(jnp.float32)
    b = b * jax.random.bernoulli(kmb, p_keep, b.shape).astype(jnp.float32)
    return w, b, gamma, beta


if __name__ == "__main__":
    key = jax.random.PRNGKey(0)

    # Scaled-down config consistent with the module structure
    # (real head uses feat_dim 1024/2048; dims kept multiples of 128).
    B, C, H, W = 2, 256, 8, 16
    num_classes = 128
    bayes_dims = [C, 128, 128, C]      # in_dim -> [bayes_dim0, bayes_dim1] -> in_dim
    var_dims = [C, 128, C]             # in_dim -> [fcn_dim] -> in_dim
    p_keep = 0.7                       # UAL dropout keep probability

    keys = jax.random.split(key, 12)
    params = {"bayes": [], "mean": [], "var": []}
    kidx = 0
    for i in range(len(bayes_dims) - 1):
        params["bayes"].append(
            _masked_layer_params(keys[kidx], bayes_dims[i], bayes_dims[i + 1],
                                 p_keep))
        kidx += 1
    for i in range(len(bayes_dims) - 1):
        params["mean"].append(
            _layer_params(keys[kidx], bayes_dims[i], bayes_dims[i + 1]))
        kidx += 1
    for i in range(len(var_dims) - 1):
        params["var"].append(
            _layer_params(keys[kidx], var_dims[i], var_dims[i + 1]))
        kidx += 1
    params["neck_gamma"] = jnp.ones((C,), jnp.float32)
    params["neck_beta"] = jnp.zeros((C,), jnp.float32)  # bias_freeze=True
    params["w_logit"] = (jax.random.normal(keys[kidx], (C, num_classes),
                                           jnp.float32) * 0.01)
    kidx += 1

    x = jax.random.normal(keys[kidx], (B, C, H, W), jnp.float32)

    fwd = jax.jit(bayes_head_forward)
    out = jax.block_until_ready(fwd(x, params))

    ref = _reference_forward(x, params)
    for k in ("cls_outputs", "pred_class_logits", "features", "g_var"):
        assert out[k].shape == ref[k].shape, (k, out[k].shape, ref[k].shape)
        # tolerance is loose enough to absorb MXU multi-pass f32 differences
        assert jnp.allclose(out[k], ref[k], rtol=1e-2, atol=1e-2), k

    print("KERNEL_OK")
</pallas_src>

<mosaic_0001>
module attributes {stable_mosaic.version = 11 : i64} {
  func.func @_conv1x1_stats_kernel(%arg0: i32, %arg1: i32, %arg2: memref<128x128xf32, #tpu.memory_space<vmem>>, %arg3: memref<128x256xf32, #tpu.memory_space<vmem>>, %arg4: memref<1x256xf32, #tpu.memory_space<vmem>>, %arg5: memref<128x256xf32, #tpu.memory_space<vmem>>, %arg6: memref<1x1x256xf32, #tpu.memory_space<vmem>>, %arg7: memref<1x1x256xf32, #tpu.memory_space<vmem>>, %arg8: memref<128x256xf32, #tpu.memory_space<vmem>>) attributes {dimension_semantics = [#tpu.dimension_semantics<parallel>, #tpu.dimension_semantics<arbitrary>], iteration_bounds = array<i64: 2, 1>, scalar_prefetch = 0 : i64, scratch_operands = 1 : i64, tpu.core_type = #tpu.core_type<tc>, window_params = [{transform_indices = @transform_0, window_bounds = array<i64: 128, 128>}, {transform_indices = @transform_1, window_bounds = array<i64: 128, 256>}, {pipeline_mode = #tpu.pipeline_mode<synchronous>, transform_indices = @transform_2, window_bounds = array<i64: 1, 256>}, {transform_indices = @transform_3, window_bounds = array<i64: 128, 256>}, {transform_indices = @transform_4, window_bounds = array<i64: 1, 1, 256>}, {transform_indices = @transform_5, window_bounds = array<i64: 1, 1, 256>}]} {
    %c0_i32 = arith.constant 0 : i32
    %0 = arith.cmpi eq, %arg1, %c0_i32 : i32
    %1 = arith.extui %0 : i1 to i32
    %c0_i32_0 = arith.constant 0 : i32
    %2 = arith.cmpi ne, %1, %c0_i32_0 : i32
    scf.if %2 {
      %cst_10 = arith.constant 0.000000e+00 : f32
      %12 = vector.broadcast %cst_10 : f32 to vector<128x256xf32>
      %c0_11 = arith.constant 0 : index
      %c0_12 = arith.constant 0 : index
      %13 = vector.load %arg8[%c0_11, %c0_12] : memref<128x256xf32, #tpu.memory_space<vmem>>, vector<128x256xf32>
      tpu.vector_store %arg8[%c0_11, %c0_12], %12 {strides = array<i32>} : memref<128x256xf32, #tpu.memory_space<vmem>>, vector<128x256xf32>,
    } else {
    }
    %c0 = arith.constant 0 : index
    %c0_1 = arith.constant 0 : index
    %3 = vector.load %arg8[%c0, %c0_1] : memref<128x256xf32, #tpu.memory_space<vmem>>, vector<128x256xf32>
    %c0_2 = arith.constant 0 : index
    %c0_3 = arith.constant 0 : index
    %4 = vector.load %arg2[%c0_2, %c0_3] : memref<128x128xf32, #tpu.memory_space<vmem>>, vector<128x128xf32>
    %c0_4 = arith.constant 0 : index
    %c0_5 = arith.constant 0 : index
    %5 = vector.load %arg3[%c0_4, %c0_5] : memref<128x256xf32, #tpu.memory_space<vmem>>, vector<128x256xf32>
    %cst = arith.constant dense<0.000000e+00> : vector<128x256xf32>
    %6 = tpu.matmul %4, %5, %cst {dimension_numbers = #tpu.dot_dimension_numbers<[1], [0], [0], [1], [0, 0, 1, 1], [], []>} : vector<128x128xf32>, vector<128x256xf32>, vector<128x256xf32> -> vector<128x256xf32>
    %7 = arith.addf %3, %6 : vector<128x256xf32>
    %c0_6 = arith.constant 0 : index
    %c0_7 = arith.constant 0 : index
    %8 = vector.load %arg8[%c0_6, %c0_7] : memref<128x256xf32, #tpu.memory_space<vmem>>, vector<128x256xf32>
    tpu.vector_store %arg8[%c0_6, %c0_7], %7 {strides = array<i32>} : memref<128x256xf32, #tpu.memory_space<vmem>>, vector<128x256xf32>,
    %c0_i32_8 = arith.constant 0 : i32
    %9 = arith.cmpi eq, %arg1, %c0_i32_8 : i32
    %10 = arith.extui %9 : i1 to i32
    %c0_i32_9 = arith.constant 0 : i32
    %11 = arith.cmpi ne, %10, %c0_i32_9 : i32
    scf.if %11 {
      %c0_10 = arith.constant 0 : index
      %c0_11 = arith.constant 0 : index
      %12 = vector.load %arg8[%c0_10, %c0_11] : memref<128x256xf32, #tpu.memory_space<vmem>>, vector<128x256xf32>
      %c0_12 = arith.constant 0 : index
      %c0_13 = arith.constant 0 : index
      %13 = vector.load %arg4[%c0_12, %c0_13] : memref<1x256xf32, #tpu.memory_space<vmem>>, vector<1x256xf32>
      %14 = vector.broadcast %13 : vector<1x256xf32> to vector<128x256xf32>
      %15 = arith.addf %12, %14 : vector<128x256xf32>
      %c0_14 = arith.constant 0 : index
      %c0_15 = arith.constant 0 : index
      %16 = vector.load %arg5[%c0_14, %c0_15] : memref<128x256xf32, #tpu.memory_space<vmem>>, vector<128x256xf32>
      tpu.vector_store %arg5[%c0_14, %c0_15], %15 {strides = array<i32>} : memref<128x256xf32, #tpu.memory_space<vmem>>, vector<128x256xf32>,
      %cst_16 = arith.constant dense<0.000000e+00> : vector<256xf32>
      %17 = vector.multi_reduction <add>, %15, %cst_16 [0] : vector<128x256xf32> to vector<256xf32>
      %18 = vector.shape_cast %17 : vector<256xf32> to vector<1x256xf32>
      %19 = vector.shape_cast %18 : vector<1x256xf32> to vector<1x1x256xf32>
      %c0_17 = arith.constant 0 : index
      %c0_18 = arith.constant 0 : index
      %c0_19 = arith.constant 0 : index
      %20 = vector.load %arg6[%c0_17, %c0_18, %c0_19] : memref<1x1x256xf32, #tpu.memory_space<vmem>>, vector<1x1x256xf32>
      tpu.vector_store %arg6[%c0_17, %c0_18, %c0_19], %19 {strides = array<i32>} : memref<1x1x256xf32, #tpu.memory_space<vmem>>, vector<1x1x256xf32>,
      %21 = arith.mulf %15, %15 : vector<128x256xf32>
      %cst_20 = arith.constant dense<0.000000e+00> : vector<256xf32>
      %22 = vector.multi_reduction <add>, %21, %cst_20 [0] : vector<128x256xf32> to vector<256xf32>
      %23 = vector.shape_cast %22 : vector<256xf32> to vector<1x256xf32>
      %24 = vector.shape_cast %23 : vector<1x256xf32> to vector<1x1x256xf32>
      %c0_21 = arith.constant 0 : index
      %c0_22 = arith.constant 0 : index
      %c0_23 = arith.constant 0 : index
      %25 = vector.load %arg7[%c0_21, %c0_22, %c0_23] : memref<1x1x256xf32, #tpu.memory_space<vmem>>, vector<1x1x256xf32>
      tpu.vector_store %arg7[%c0_21, %c0_22, %c0_23], %24 {strides = array<i32>} : memref<1x1x256xf32, #tpu.memory_space<vmem>>, vector<1x1x256xf32>,
    } else {
    }
    return
  }
  func.func @transform_0(%arg0: i32, %arg1: i32) -> (i32, i32) {
    %c0_i32 = arith.constant 0 : i32
    return %arg0, %arg1 : i32, i32
  }
  func.func @transform_1(%arg0: i32, %arg1: i32) -> (i32, i32) {
    %c0_i32 = arith.constant 0 : i32
    %c0_i32_0 = arith.constant 0 : i32
    return %arg1, %c0_i32 : i32, i32
  }
  func.func @transform_2(%arg0: i32, %arg1: i32) -> (i32, i32) {
    %c0_i32 = arith.constant 0 : i32
    %c0_i32_0 = arith.constant 0 : i32
    %c0_i32_1 = arith.constant 0 : i32
    return %c0_i32, %c0_i32_0 : i32, i32
  }
  func.func @transform_3(%arg0: i32, %arg1: i32) -> (i32, i32) {
    %c0_i32 = arith.constant 0 : i32
    %c0_i32_0 = arith.constant 0 : i32
    return %arg0, %c0_i32 : i32, i32
  }
  func.func @transform_4(%arg0: i32, %arg1: i32) -> (i32, i32, i32) {
    %c0_i32 = arith.constant 0 : i32
    %c0_i32_0 = arith.constant 0 : i32
    %c0_i32_1 = arith.constant 0 : i32
    return %arg0, %c0_i32, %c0_i32_0 : i32, i32, i32
  }
  func.func @transform_5(%arg0: i32, %arg1: i32) -> (i32, i32, i32) {
    %c0_i32 = arith.constant 0 : i32
    %c0_i32_0 = arith.constant 0 : i32
    %c0_i32_1 = arith.constant 0 : i32
    return %arg0, %c0_i32, %c0_i32_0 : i32, i32, i32
  }
}

module attributes {stable_mosaic.version = 11 : i64} {
  func.func @_bn_act_kernel(%arg0: i32, %arg1: memref<128x128xf32, #tpu.memory_space<vmem>>, %arg2: memref<2x1x128xf32, #tpu.memory_space<vmem>>, %arg3: memref<2x1x128xf32, #tpu.memory_space<vmem>>, %arg4: memref<1x128xf32, #tpu.memory_space<vmem>>, %arg5: memref<1x128xf32, #tpu.memory_space<vmem>>, %arg6: memref<128x128xf32, #tpu.memory_space<vmem>>) attributes {dimension_semantics = [#tpu.dimension_semantics<parallel>], iteration_bounds = array<i64: 2>, scalar_prefetch = 0 : i64, scratch_operands = 0 : i64, tpu.core_type = #tpu.core_type<tc>, window_params = [{transform_indices = @transform_0, window_bounds = array<i64: 128, 128>}, {pipeline_mode = #tpu.pipeline_mode<synchronous>, transform_indices = @transform_1, window_bounds = array<i64: 2, 1, 128>}, {pipeline_mode = #tpu.pipeline_mode<synchronous>, transform_indices = @transform_2, window_bounds = array<i64: 2, 1, 128>}, {pipeline_mode = #tpu.pipeline_mode<synchronous>, transform_indices = @transform_3, window_bounds = array<i64: 1, 128>}, {pipeline_mode = #tpu.pipeline_mode<synchronous>, transform_indices = @transform_4, window_bounds = array<i64: 1, 128>}, {transform_indices = @transform_5, window_bounds = array<i64: 128, 128>}]} {
    %c0 = arith.constant 0 : index
    %c0_0 = arith.constant 0 : index
    %c0_1 = arith.constant 0 : index
    %0 = vector.load %arg2[%c0, %c0_0, %c0_1] : memref<2x1x128xf32, #tpu.memory_space<vmem>>, vector<2x1x128xf32>
    %cst = arith.constant dense<0.000000e+00> : vector<1x128xf32>
    %1 = vector.multi_reduction <add>, %0, %cst [0] : vector<2x1x128xf32> to vector<1x128xf32>
    %c0_2 = arith.constant 0 : index
    %c0_3 = arith.constant 0 : index
    %c0_4 = arith.constant 0 : index
    %2 = vector.load %arg3[%c0_2, %c0_3, %c0_4] : memref<2x1x128xf32, #tpu.memory_space<vmem>>, vector<2x1x128xf32>
    %cst_5 = arith.constant dense<0.000000e+00> : vector<1x128xf32>
    %3 = vector.multi_reduction <add>, %2, %cst_5 [0] : vector<2x1x128xf32> to vector<1x128xf32>
    %cst_6 = arith.constant 3.906250e-03 : f32
    %4 = vector.broadcast %cst_6 : f32 to vector<1x128xf32>
    %5 = arith.mulf %1, %4 : vector<1x128xf32>
    %cst_7 = arith.constant 3.906250e-03 : f32
    %6 = vector.broadcast %cst_7 : f32 to vector<1x128xf32>
    %7 = arith.mulf %3, %6 : vector<1x128xf32>
    %8 = arith.mulf %5, %5 : vector<1x128xf32>
    %9 = arith.subf %7, %8 : vector<1x128xf32>
    %c0_8 = arith.constant 0 : index
    %c0_9 = arith.constant 0 : index
    %10 = vector.load %arg4[%c0_8, %c0_9] : memref<1x128xf32, #tpu.memory_space<vmem>>, vector<1x128xf32>
    %cst_10 = arith.constant 9.99999974E-6 : f32
    %11 = vector.broadcast %cst_10 : f32 to vector<1x128xf32>
    %12 = arith.addf %9, %11 : vector<1x128xf32>
    %13 = math.rsqrt %12 : vector<1x128xf32>
    %14 = arith.mulf %10, %13 : vector<1x128xf32>
    %c0_11 = arith.constant 0 : index
    %c0_12 = arith.constant 0 : index
    %15 = vector.load %arg5[%c0_11, %c0_12] : memref<1x128xf32, #tpu.memory_space<vmem>>, vector<1x128xf32>
    %16 = arith.mulf %5, %14 : vector<1x128xf32>
    %17 = arith.subf %15, %16 : vector<1x128xf32>
    %c0_13 = arith.constant 0 : index
    %c0_14 = arith.constant 0 : index
    %18 = vector.load %arg1[%c0_13, %c0_14] : memref<128x128xf32, #tpu.memory_space<vmem>>, vector<128x128xf32>
    %19 = vector.broadcast %14 : vector<1x128xf32> to vector<128x128xf32>
    %20 = arith.mulf %18, %19 : vector<128x128xf32>
    %21 = vector.broadcast %17 : vector<1x128xf32> to vector<128x128xf32>
    %22 = arith.addf %20, %21 : vector<128x128xf32>
    %cst_15 = arith.constant 0.000000e+00 : f32
    %23 = vector.broadcast %cst_15 : f32 to vector<128x128xf32>
    %24 = arith.maximumf %22, %23 : vector<128x128xf32>
    %c0_16 = arith.constant 0 : index
    %c0_17 = arith.constant 0 : index
    %25 = vector.load %arg6[%c0_16, %c0_17] : memref<128x128xf32, #tpu.memory_space<vmem>>, vector<128x128xf32>
    tpu.vector_store %arg6[%c0_16, %c0_17], %24 {strides = array<i32>} : memref<128x128xf32, #tpu.memory_space<vmem>>, vector<128x128xf32>,
    return
  }
  func.func @transform_0(%arg0: i32) -> (i32, i32) {
    %c0_i32 = arith.constant 0 : i32
    %c0_i32_0 = arith.constant 0 : i32
    return %arg0, %c0_i32 : i32, i32
  }
  func.func @transform_1(%arg0: i32) -> (i32, i32, i32) {
    %c0_i32 = arith.constant 0 : i32
    %c0_i32_0 = arith.constant 0 : i32
    %c0_i32_1 = arith.constant 0 : i32
    %c0_i32_2 = arith.constant 0 : i32
    return %c0_i32, %c0_i32_0, %c0_i32_1 : i32, i32, i32
  }
  func.func @transform_2(%arg0: i32) -> (i32, i32, i32) {
    %c0_i32 = arith.constant 0 : i32
    %c0_i32_0 = arith.constant 0 : i32
    %c0_i32_1 = arith.constant 0 : i32
    %c0_i32_2 = arith.constant 0 : i32
    return %c0_i32, %c0_i32_0, %c0_i32_1 : i32, i32, i32
  }
  func.func @transform_3(%arg0: i32) -> (i32, i32) {
    %c0_i32 = arith.constant 0 : i32
    %c0_i32_0 = arith.constant 0 : i32
    %c0_i32_1 = arith.constant 0 : i32
    return %c0_i32, %c0_i32_0 : i32, i32
  }
  func.func @transform_4(%arg0: i32) -> (i32, i32) {
    %c0_i32 = arith.constant 0 : i32
    %c0_i32_0 = arith.constant 0 : i32
    %c0_i32_1 = arith.constant 0 : i32
    return %c0_i32, %c0_i32_0 : i32, i32
  }
  func.func @transform_5(%arg0: i32) -> (i32, i32) {
    %c0_i32 = arith.constant 0 : i32
    %c0_i32_0 = arith.constant 0 : i32
    return %arg0, %c0_i32 : i32, i32
  }
}

module attributes {stable_mosaic.version = 11 : i64} {
  func.func @_conv1x1_stats_kernel(%arg0: i32, %arg1: i32, %arg2: memref<128x128xf32, #tpu.memory_space<vmem>>, %arg3: memref<128x128xf32, #tpu.memory_space<vmem>>, %arg4: memref<1x128xf32, #tpu.memory_space<vmem>>, %arg5: memref<128x128xf32, #tpu.memory_space<vmem>>, %arg6: memref<1x1x128xf32, #tpu.memory_space<vmem>>, %arg7: memref<1x1x128xf32, #tpu.memory_space<vmem>>, %arg8: memref<128x128xf32, #tpu.memory_space<vmem>>) attributes {dimension_semantics = [#tpu.dimension_semantics<parallel>, #tpu.dimension_semantics<arbitrary>], iteration_bounds = array<i64: 2, 1>, scalar_prefetch = 0 : i64, scratch_operands = 1 : i64, tpu.core_type = #tpu.core_type<tc>, window_params = [{transform_indices = @transform_0, window_bounds = array<i64: 128, 128>}, {transform_indices = @transform_1, window_bounds = array<i64: 128, 128>}, {pipeline_mode = #tpu.pipeline_mode<synchronous>, transform_indices = @transform_2, window_bounds = array<i64: 1, 128>}, {transform_indices = @transform_3, window_bounds = array<i64: 128, 128>}, {transform_indices = @transform_4, window_bounds = array<i64: 1, 1, 128>}, {transform_indices = @transform_5, window_bounds = array<i64: 1, 1, 128>}]} {
    %c0_i32 = arith.constant 0 : i32
    %0 = arith.cmpi eq, %arg1, %c0_i32 : i32
    %1 = arith.extui %0 : i1 to i32
    %c0_i32_0 = arith.constant 0 : i32
    %2 = arith.cmpi ne, %1, %c0_i32_0 : i32
    scf.if %2 {
      %cst_10 = arith.constant 0.000000e+00 : f32
      %12 = vector.broadcast %cst_10 : f32 to vector<128x128xf32>
      %c0_11 = arith.constant 0 : index
      %c0_12 = arith.constant 0 : index
      %13 = vector.load %arg8[%c0_11, %c0_12] : memref<128x128xf32, #tpu.memory_space<vmem>>, vector<128x128xf32>
      tpu.vector_store %arg8[%c0_11, %c0_12], %12 {strides = array<i32>} : memref<128x128xf32, #tpu.memory_space<vmem>>, vector<128x128xf32>,
    } else {
    }
    %c0 = arith.constant 0 : index
    %c0_1 = arith.constant 0 : index
    %3 = vector.load %arg8[%c0, %c0_1] : memref<128x128xf32, #tpu.memory_space<vmem>>, vector<128x128xf32>
    %c0_2 = arith.constant 0 : index
    %c0_3 = arith.constant 0 : index
    %4 = vector.load %arg2[%c0_2, %c0_3] : memref<128x128xf32, #tpu.memory_space<vmem>>, vector<128x128xf32>
    %c0_4 = arith.constant 0 : index
    %c0_5 = arith.constant 0 : index
    %5 = vector.load %arg3[%c0_4, %c0_5] : memref<128x128xf32, #tpu.memory_space<vmem>>, vector<128x128xf32>
    %cst = arith.constant dense<0.000000e+00> : vector<128x128xf32>
    %6 = tpu.matmul %4, %5, %cst {dimension_numbers = #tpu.dot_dimension_numbers<[1], [0], [0], [1], [0, 0, 1, 1], [], []>} : vector<128x128xf32>, vector<128x128xf32>, vector<128x128xf32> -> vector<128x128xf32>
    %7 = arith.addf %3, %6 : vector<128x128xf32>
    %c0_6 = arith.constant 0 : index
    %c0_7 = arith.constant 0 : index
    %8 = vector.load %arg8[%c0_6, %c0_7] : memref<128x128xf32, #tpu.memory_space<vmem>>, vector<128x128xf32>
    tpu.vector_store %arg8[%c0_6, %c0_7], %7 {strides = array<i32>} : memref<128x128xf32, #tpu.memory_space<vmem>>, vector<128x128xf32>,
    %c0_i32_8 = arith.constant 0 : i32
    %9 = arith.cmpi eq, %arg1, %c0_i32_8 : i32
    %10 = arith.extui %9 : i1 to i32
    %c0_i32_9 = arith.constant 0 : i32
    %11 = arith.cmpi ne, %10, %c0_i32_9 : i32
    scf.if %11 {
      %c0_10 = arith.constant 0 : index
      %c0_11 = arith.constant 0 : index
      %12 = vector.load %arg8[%c0_10, %c0_11] : memref<128x128xf32, #tpu.memory_space<vmem>>, vector<128x128xf32>
      %c0_12 = arith.constant 0 : index
      %c0_13 = arith.constant 0 : index
      %13 = vector.load %arg4[%c0_12, %c0_13] : memref<1x128xf32, #tpu.memory_space<vmem>>, vector<1x128xf32>
      %14 = vector.broadcast %13 : vector<1x128xf32> to vector<128x128xf32>
      %15 = arith.addf %12, %14 : vector<128x128xf32>
      %c0_14 = arith.constant 0 : index
      %c0_15 = arith.constant 0 : index
      %16 = vector.load %arg5[%c0_14, %c0_15] : memref<128x128xf32, #tpu.memory_space<vmem>>, vector<128x128xf32>
      tpu.vector_store %arg5[%c0_14, %c0_15], %15 {strides = array<i32>} : memref<128x128xf32, #tpu.memory_space<vmem>>, vector<128x128xf32>,
      %cst_16 = arith.constant dense<0.000000e+00> : vector<128xf32>
      %17 = vector.multi_reduction <add>, %15, %cst_16 [0] : vector<128x128xf32> to vector<128xf32>
      %18 = vector.shape_cast %17 : vector<128xf32> to vector<1x128xf32>
      %19 = vector.shape_cast %18 : vector<1x128xf32> to vector<1x1x128xf32>
      %c0_17 = arith.constant 0 : index
      %c0_18 = arith.constant 0 : index
      %c0_19 = arith.constant 0 : index
      %20 = vector.load %arg6[%c0_17, %c0_18, %c0_19] : memref<1x1x128xf32, #tpu.memory_space<vmem>>, vector<1x1x128xf32>
      tpu.vector_store %arg6[%c0_17, %c0_18, %c0_19], %19 {strides = array<i32>} : memref<1x1x128xf32, #tpu.memory_space<vmem>>, vector<1x1x128xf32>,
      %21 = arith.mulf %15, %15 : vector<128x128xf32>
      %cst_20 = arith.constant dense<0.000000e+00> : vector<128xf32>
      %22 = vector.multi_reduction <add>, %21, %cst_20 [0] : vector<128x128xf32> to vector<128xf32>
      %23 = vector.shape_cast %22 : vector<128xf32> to vector<1x128xf32>
      %24 = vector.shape_cast %23 : vector<1x128xf32> to vector<1x1x128xf32>
      %c0_21 = arith.constant 0 : index
      %c0_22 = arith.constant 0 : index
      %c0_23 = arith.constant 0 : index
      %25 = vector.load %arg7[%c0_21, %c0_22, %c0_23] : memref<1x1x128xf32, #tpu.memory_space<vmem>>, vector<1x1x128xf32>
      tpu.vector_store %arg7[%c0_21, %c0_22, %c0_23], %24 {strides = array<i32>} : memref<1x1x128xf32, #tpu.memory_space<vmem>>, vector<1x1x128xf32>,
    } else {
    }
    return
  }
  func.func @transform_0(%arg0: i32, %arg1: i32) -> (i32, i32) {
    %c0_i32 = arith.constant 0 : i32
    return %arg0, %arg1 : i32, i32
  }
  func.func @transform_1(%arg0: i32, %arg1: i32) -> (i32, i32) {
    %c0_i32 = arith.constant 0 : i32
    %c0_i32_0 = arith.constant 0 : i32
    return %arg1, %c0_i32 : i32, i32
  }
  func.func @transform_2(%arg0: i32, %arg1: i32) -> (i32, i32) {
    %c0_i32 = arith.constant 0 : i32
    %c0_i32_0 = arith.constant 0 : i32
    %c0_i32_1 = arith.constant 0 : i32
    return %c0_i32, %c0_i32_0 : i32, i32
  }
  func.func @transform_3(%arg0: i32, %arg1: i32) -> (i32, i32) {
    %c0_i32 = arith.constant 0 : i32
    %c0_i32_0 = arith.constant 0 : i32
    return %arg0, %c0_i32 : i32, i32
  }
  func.func @transform_4(%arg0: i32, %arg1: i32) -> (i32, i32, i32) {
    %c0_i32 = arith.constant 0 : i32
    %c0_i32_0 = arith.constant 0 : i32
    %c0_i32_1 = arith.constant 0 : i32
    return %arg0, %c0_i32, %c0_i32_0 : i32, i32, i32
  }
  func.func @transform_5(%arg0: i32, %arg1: i32) -> (i32, i32, i32) {
    %c0_i32 = arith.constant 0 : i32
    %c0_i32_0 = arith.constant 0 : i32
    %c0_i32_1 = arith.constant 0 : i32
    return %arg0, %c0_i32, %c0_i32_0 : i32, i32, i32
  }
}

module attributes {stable_mosaic.version = 11 : i64} {
  func.func @_conv1x1_stats_kernel(%arg0: i32, %arg1: i32, %arg2: memref<128x128xf32, #tpu.memory_space<vmem>>, %arg3: memref<128x128xf32, #tpu.memory_space<vmem>>, %arg4: memref<1x128xf32, #tpu.memory_space<vmem>>, %arg5: memref<128x128xf32, #tpu.memory_space<vmem>>, %arg6: memref<1x1x128xf32, #tpu.memory_space<vmem>>, %arg7: memref<1x1x128xf32, #tpu.memory_space<vmem>>, %arg8: memref<128x128xf32, #tpu.memory_space<vmem>>) attributes {dimension_semantics = [#tpu.dimension_semantics<parallel>, #tpu.dimension_semantics<arbitrary>], iteration_bounds = array<i64: 2, 2>, scalar_prefetch = 0 : i64, scratch_operands = 1 : i64, tpu.core_type = #tpu.core_type<tc>, window_params = [{transform_indices = @transform_0, window_bounds = array<i64: 128, 128>}, {transform_indices = @transform_1, window_bounds = array<i64: 128, 128>}, {pipeline_mode = #tpu.pipeline_mode<synchronous>, transform_indices = @transform_2, window_bounds = array<i64: 1, 128>}, {transform_indices = @transform_3, window_bounds = array<i64: 128, 128>}, {transform_indices = @transform_4, window_bounds = array<i64: 1, 1, 128>}, {transform_indices = @transform_5, window_bounds = array<i64: 1, 1, 128>}]} {
    %c0_i32 = arith.constant 0 : i32
    %0 = arith.cmpi eq, %arg1, %c0_i32 : i32
    %1 = arith.extui %0 : i1 to i32
    %c0_i32_0 = arith.constant 0 : i32
    %2 = arith.cmpi ne, %1, %c0_i32_0 : i32
    scf.if %2 {
      %cst_9 = arith.constant 0.000000e+00 : f32
      %12 = vector.broadcast %cst_9 : f32 to vector<128x128xf32>
      %c0_10 = arith.constant 0 : index
      %c0_11 = arith.constant 0 : index
      %13 = vector.load %arg8[%c0_10, %c0_11] : memref<128x128xf32, #tpu.memory_space<vmem>>, vector<128x128xf32>
      tpu.vector_store %arg8[%c0_10, %c0_11], %12 {strides = array<i32>} : memref<128x128xf32, #tpu.memory_space<vmem>>, vector<128x128xf32>,
    } else {
    }
    %c0 = arith.constant 0 : index
    %c0_1 = arith.constant 0 : index
    %3 = vector.load %arg8[%c0, %c0_1] : memref<128x128xf32, #tpu.memory_space<vmem>>, vector<128x128xf32>
    %c0_2 = arith.constant 0 : index
    %c0_3 = arith.constant 0 : index
    %4 = vector.load %arg2[%c0_2, %c0_3] : memref<128x128xf32, #tpu.memory_space<vmem>>, vector<128x128xf32>
    %c0_4 = arith.constant 0 : index
    %c0_5 = arith.constant 0 : index
    %5 = vector.load %arg3[%c0_4, %c0_5] : memref<128x128xf32, #tpu.memory_space<vmem>>, vector<128x128xf32>
    %cst = arith.constant dense<0.000000e+00> : vector<128x128xf32>
    %6 = tpu.matmul %4, %5, %cst {dimension_numbers = #tpu.dot_dimension_numbers<[1], [0], [0], [1], [0, 0, 1, 1], [], []>} : vector<128x128xf32>, vector<128x128xf32>, vector<128x128xf32> -> vector<128x128xf32>
    %7 = arith.addf %3, %6 : vector<128x128xf32>
    %c0_6 = arith.constant 0 : index
    %c0_7 = arith.constant 0 : index
    %8 = vector.load %arg8[%c0_6, %c0_7] : memref<128x128xf32, #tpu.memory_space<vmem>>, vector<128x128xf32>
    tpu.vector_store %arg8[%c0_6, %c0_7], %7 {strides = array<i32>} : memref<128x128xf32, #tpu.memory_space<vmem>>, vector<128x128xf32>,
    %c1_i32 = arith.constant 1 : i32
    %9 = arith.cmpi eq, %arg1, %c1_i32 : i32
    %10 = arith.extui %9 : i1 to i32
    %c0_i32_8 = arith.constant 0 : i32
    %11 = arith.cmpi ne, %10, %c0_i32_8 : i32
    scf.if %11 {
      %c0_9 = arith.constant 0 : index
      %c0_10 = arith.constant 0 : index
      %12 = vector.load %arg8[%c0_9, %c0_10] : memref<128x128xf32, #tpu.memory_space<vmem>>, vector<128x128xf32>
      %c0_11 = arith.constant 0 : index
      %c0_12 = arith.constant 0 : index
      %13 = vector.load %arg4[%c0_11, %c0_12] : memref<1x128xf32, #tpu.memory_space<vmem>>, vector<1x128xf32>
      %14 = vector.broadcast %13 : vector<1x128xf32> to vector<128x128xf32>
      %15 = arith.addf %12, %14 : vector<128x128xf32>
      %c0_13 = arith.constant 0 : index
      %c0_14 = arith.constant 0 : index
      %16 = vector.load %arg5[%c0_13, %c0_14] : memref<128x128xf32, #tpu.memory_space<vmem>>, vector<128x128xf32>
      tpu.vector_store %arg5[%c0_13, %c0_14], %15 {strides = array<i32>} : memref<128x128xf32, #tpu.memory_space<vmem>>, vector<128x128xf32>,
      %cst_15 = arith.constant dense<0.000000e+00> : vector<128xf32>
      %17 = vector.multi_reduction <add>, %15, %cst_15 [0] : vector<128x128xf32> to vector<128xf32>
      %18 = vector.shape_cast %17 : vector<128xf32> to vector<1x128xf32>
      %19 = vector.shape_cast %18 : vector<1x128xf32> to vector<1x1x128xf32>
      %c0_16 = arith.constant 0 : index
      %c0_17 = arith.constant 0 : index
      %c0_18 = arith.constant 0 : index
      %20 = vector.load %arg6[%c0_16, %c0_17, %c0_18] : memref<1x1x128xf32, #tpu.memory_space<vmem>>, vector<1x1x128xf32>
      tpu.vector_store %arg6[%c0_16, %c0_17, %c0_18], %19 {strides = array<i32>} : memref<1x1x128xf32, #tpu.memory_space<vmem>>, vector<1x1x128xf32>,
      %21 = arith.mulf %15, %15 : vector<128x128xf32>
      %cst_19 = arith.constant dense<0.000000e+00> : vector<128xf32>
      %22 = vector.multi_reduction <add>, %21, %cst_19 [0] : vector<128x128xf32> to vector<128xf32>
      %23 = vector.shape_cast %22 : vector<128xf32> to vector<1x128xf32>
      %24 = vector.shape_cast %23 : vector<1x128xf32> to vector<1x1x128xf32>
      %c0_20 = arith.constant 0 : index
      %c0_21 = arith.constant 0 : index
      %c0_22 = arith.constant 0 : index
      %25 = vector.load %arg7[%c0_20, %c0_21, %c0_22] : memref<1x1x128xf32, #tpu.memory_space<vmem>>, vector<1x1x128xf32>
      tpu.vector_store %arg7[%c0_20, %c0_21, %c0_22], %24 {strides = array<i32>} : memref<1x1x128xf32, #tpu.memory_space<vmem>>, vector<1x1x128xf32>,
    } else {
    }
    return
  }
  func.func @transform_0(%arg0: i32, %arg1: i32) -> (i32, i32) {
    %c0_i32 = arith.constant 0 : i32
    return %arg0, %arg1 : i32, i32
  }
  func.func @transform_1(%arg0: i32, %arg1: i32) -> (i32, i32) {
    %c0_i32 = arith.constant 0 : i32
    %c0_i32_0 = arith.constant 0 : i32
    return %arg1, %c0_i32 : i32, i32
  }
  func.func @transform_2(%arg0: i32, %arg1: i32) -> (i32, i32) {
    %c0_i32 = arith.constant 0 : i32
    %c0_i32_0 = arith.constant 0 : i32
    %c0_i32_1 = arith.constant 0 : i32
    return %c0_i32, %c0_i32_0 : i32, i32
  }
  func.func @transform_3(%arg0: i32, %arg1: i32) -> (i32, i32) {
    %c0_i32 = arith.constant 0 : i32
    %c0_i32_0 = arith.constant 0 : i32
    return %arg0, %c0_i32 : i32, i32
  }
  func.func @transform_4(%arg0: i32, %arg1: i32) -> (i32, i32, i32) {
    %c0_i32 = arith.constant 0 : i32
    %c0_i32_0 = arith.constant 0 : i32
    %c0_i32_1 = arith.constant 0 : i32
    return %arg0, %c0_i32, %c0_i32_0 : i32, i32, i32
  }
  func.func @transform_5(%arg0: i32, %arg1: i32) -> (i32, i32, i32) {
    %c0_i32 = arith.constant 0 : i32
    %c0_i32_0 = arith.constant 0 : i32
    %c0_i32_1 = arith.constant 0 : i32
    return %arg0, %c0_i32, %c0_i32_0 : i32, i32, i32
  }
}

module attributes {stable_mosaic.version = 11 : i64} {
  func.func @_conv1x1_stats_kernel(%arg0: i32, %arg1: i32, %arg2: memref<128x128xf32, #tpu.memory_space<vmem>>, %arg3: memref<128x128xf32, #tpu.memory_space<vmem>>, %arg4: memref<1x128xf32, #tpu.memory_space<vmem>>, %arg5: memref<128x128xf32, #tpu.memory_space<vmem>>, %arg6: memref<1x1x128xf32, #tpu.memory_space<vmem>>, %arg7: memref<1x1x128xf32, #tpu.memory_space<vmem>>, %arg8: memref<128x128xf32, #tpu.memory_space<vmem>>) attributes {dimension_semantics = [#tpu.dimension_semantics<parallel>, #tpu.dimension_semantics<arbitrary>], iteration_bounds = array<i64: 2, 2>, scalar_prefetch = 0 : i64, scratch_operands = 1 : i64, tpu.core_type = #tpu.core_type<tc>, window_params = [{transform_indices = @transform_0, window_bounds = array<i64: 128, 128>}, {transform_indices = @transform_1, window_bounds = array<i64: 128, 128>}, {pipeline_mode = #tpu.pipeline_mode<synchronous>, transform_indices = @transform_2, window_bounds = array<i64: 1, 128>}, {transform_indices = @transform_3, window_bounds = array<i64: 128, 128>}, {transform_indices = @transform_4, window_bounds = array<i64: 1, 1, 128>}, {transform_indices = @transform_5, window_bounds = array<i64: 1, 1, 128>}]} {
    %c0_i32 = arith.constant 0 : i32
    %0 = arith.cmpi eq, %arg1, %c0_i32 : i32
    %1 = arith.extui %0 : i1 to i32
    %c0_i32_0 = arith.constant 0 : i32
    %2 = arith.cmpi ne, %1, %c0_i32_0 : i32
    scf.if %2 {
      %cst_9 = arith.constant 0.000000e+00 : f32
      %12 = vector.broadcast %cst_9 : f32 to vector<128x128xf32>
      %c0_10 = arith.constant 0 : index
      %c0_11 = arith.constant 0 : index
      %13 = vector.load %arg8[%c0_10, %c0_11] : memref<128x128xf32, #tpu.memory_space<vmem>>, vector<128x128xf32>
      tpu.vector_store %arg8[%c0_10, %c0_11], %12 {strides = array<i32>} : memref<128x128xf32, #tpu.memory_space<vmem>>, vector<128x128xf32>,
    } else {
    }
    %c0 = arith.constant 0 : index
    %c0_1 = arith.constant 0 : index
    %3 = vector.load %arg8[%c0, %c0_1] : memref<128x128xf32, #tpu.memory_space<vmem>>, vector<128x128xf32>
    %c0_2 = arith.constant 0 : index
    %c0_3 = arith.constant 0 : index
    %4 = vector.load %arg2[%c0_2, %c0_3] : memref<128x128xf32, #tpu.memory_space<vmem>>, vector<128x128xf32>
    %c0_4 = arith.constant 0 : index
    %c0_5 = arith.constant 0 : index
    %5 = vector.load %arg3[%c0_4, %c0_5] : memref<128x128xf32, #tpu.memory_space<vmem>>, vector<128x128xf32>
    %cst = arith.constant dense<0.000000e+00> : vector<128x128xf32>
    %6 = tpu.matmul %4, %5, %cst {dimension_numbers = #tpu.dot_dimension_numbers<[1], [0], [0], [1], [0, 0, 1, 1], [], []>} : vector<128x128xf32>, vector<128x128xf32>, vector<128x128xf32> -> vector<128x128xf32>
    %7 = arith.addf %3, %6 : vector<128x128xf32>
    %c0_6 = arith.constant 0 : index
    %c0_7 = arith.constant 0 : index
    %8 = vector.load %arg8[%c0_6, %c0_7] : memref<128x128xf32, #tpu.memory_space<vmem>>, vector<128x128xf32>
    tpu.vector_store %arg8[%c0_6, %c0_7], %7 {strides = array<i32>} : memref<128x128xf32, #tpu.memory_space<vmem>>, vector<128x128xf32>,
    %c1_i32 = arith.constant 1 : i32
    %9 = arith.cmpi eq, %arg1, %c1_i32 : i32
    %10 = arith.extui %9 : i1 to i32
    %c0_i32_8 = arith.constant 0 : i32
    %11 = arith.cmpi ne, %10, %c0_i32_8 : i32
    scf.if %11 {
      %c0_9 = arith.constant 0 : index
      %c0_10 = arith.constant 0 : index
      %12 = vector.load %arg8[%c0_9, %c0_10] : memref<128x128xf32, #tpu.memory_space<vmem>>, vector<128x128xf32>
      %c0_11 = arith.constant 0 : index
      %c0_12 = arith.constant 0 : index
      %13 = vector.load %arg4[%c0_11, %c0_12] : memref<1x128xf32, #tpu.memory_space<vmem>>, vector<1x128xf32>
      %14 = vector.broadcast %13 : vector<1x128xf32> to vector<128x128xf32>
      %15 = arith.addf %12, %14 : vector<128x128xf32>
      %c0_13 = arith.constant 0 : index
      %c0_14 = arith.constant 0 : index
      %16 = vector.load %arg5[%c0_13, %c0_14] : memref<128x128xf32, #tpu.memory_space<vmem>>, vector<128x128xf32>
      tpu.vector_store %arg5[%c0_13, %c0_14], %15 {strides = array<i32>} : memref<128x128xf32, #tpu.memory_space<vmem>>, vector<128x128xf32>,
      %cst_15 = arith.constant dense<0.000000e+00> : vector<128xf32>
      %17 = vector.multi_reduction <add>, %15, %cst_15 [0] : vector<128x128xf32> to vector<128xf32>
      %18 = vector.shape_cast %17 : vector<128xf32> to vector<1x128xf32>
      %19 = vector.shape_cast %18 : vector<1x128xf32> to vector<1x1x128xf32>
      %c0_16 = arith.constant 0 : index
      %c0_17 = arith.constant 0 : index
      %c0_18 = arith.constant 0 : index
      %20 = vector.load %arg6[%c0_16, %c0_17, %c0_18] : memref<1x1x128xf32, #tpu.memory_space<vmem>>, vector<1x1x128xf32>
      tpu.vector_store %arg6[%c0_16, %c0_17, %c0_18], %19 {strides = array<i32>} : memref<1x1x128xf32, #tpu.memory_space<vmem>>, vector<1x1x128xf32>,
      %21 = arith.mulf %15, %15 : vector<128x128xf32>
      %cst_19 = arith.constant dense<0.000000e+00> : vector<128xf32>
      %22 = vector.multi_reduction <add>, %21, %cst_19 [0] : vector<128x128xf32> to vector<128xf32>
      %23 = vector.shape_cast %22 : vector<128xf32> to vector<1x128xf32>
      %24 = vector.shape_cast %23 : vector<1x128xf32> to vector<1x1x128xf32>
      %c0_20 = arith.constant 0 : index
      %c0_21 = arith.constant 0 : index
      %c0_22 = arith.constant 0 : index
      %25 = vector.load %arg7[%c0_20, %c0_21, %c0_22] : memref<1x1x128xf32, #tpu.memory_space<vmem>>, vector<1x1x128xf32>
      tpu.vector_store %arg7[%c0_20, %c0_21, %c0_22], %24 {strides = array<i32>} : memref<1x1x128xf32, #tpu.memory_space<vmem>>, vector<1x1x128xf32>,
    } else {
    }
    return
  }
  func.func @transform_0(%arg0: i32, %arg1: i32) -> (i32, i32) {
    %c0_i32 = arith.constant 0 : i32
    return %arg0, %arg1 : i32, i32
  }
  func.func @transform_1(%arg0: i32, %arg1: i32) -> (i32, i32) {
    %c0_i32 = arith.constant 0 : i32
    %c0_i32_0 = arith.constant 0 : i32
    return %arg1, %c0_i32 : i32, i32
  }
  func.func @transform_2(%arg0: i32, %arg1: i32) -> (i32, i32) {
    %c0_i32 = arith.constant 0 : i32
    %c0_i32_0 = arith.constant 0 : i32
    %c0_i32_1 = arith.constant 0 : i32
    return %c0_i32, %c0_i32_0 : i32, i32
  }
  func.func @transform_3(%arg0: i32, %arg1: i32) -> (i32, i32) {
    %c0_i32 = arith.constant 0 : i32
    %c0_i32_0 = arith.constant 0 : i32
    return %arg0, %c0_i32 : i32, i32
  }
  func.func @transform_4(%arg0: i32, %arg1: i32) -> (i32, i32, i32) {
    %c0_i32 = arith.constant 0 : i32
    %c0_i32_0 = arith.constant 0 : i32
    %c0_i32_1 = arith.constant 0 : i32
    return %arg0, %c0_i32, %c0_i32_0 : i32, i32, i32
  }
  func.func @transform_5(%arg0: i32, %arg1: i32) -> (i32, i32, i32) {
    %c0_i32 = arith.constant 0 : i32
    %c0_i32_0 = arith.constant 0 : i32
    %c0_i32_1 = arith.constant 0 : i32
    return %arg0, %c0_i32, %c0_i32_0 : i32, i32, i32
  }
}

module attributes {stable_mosaic.version = 11 : i64} {
  func.func @_bn_act_kernel(%arg0: i32, %arg1: memref<128x256xf32, #tpu.memory_space<vmem>>, %arg2: memref<2x1x256xf32, #tpu.memory_space<vmem>>, %arg3: memref<2x1x256xf32, #tpu.memory_space<vmem>>, %arg4: memref<1x256xf32, #tpu.memory_space<vmem>>, %arg5: memref<1x256xf32, #tpu.memory_space<vmem>>, %arg6: memref<128x256xf32, #tpu.memory_space<vmem>>) attributes {dimension_semantics = [#tpu.dimension_semantics<parallel>], iteration_bounds = array<i64: 2>, scalar_prefetch = 0 : i64, scratch_operands = 0 : i64, tpu.core_type = #tpu.core_type<tc>, window_params = [{transform_indices = @transform_0, window_bounds = array<i64: 128, 256>}, {pipeline_mode = #tpu.pipeline_mode<synchronous>, transform_indices = @transform_1, window_bounds = array<i64: 2, 1, 256>}, {pipeline_mode = #tpu.pipeline_mode<synchronous>, transform_indices = @transform_2, window_bounds = array<i64: 2, 1, 256>}, {pipeline_mode = #tpu.pipeline_mode<synchronous>, transform_indices = @transform_3, window_bounds = array<i64: 1, 256>}, {pipeline_mode = #tpu.pipeline_mode<synchronous>, transform_indices = @transform_4, window_bounds = array<i64: 1, 256>}, {transform_indices = @transform_5, window_bounds = array<i64: 128, 256>}]} {
    %c0 = arith.constant 0 : index
    %c0_0 = arith.constant 0 : index
    %c0_1 = arith.constant 0 : index
    %0 = vector.load %arg2[%c0, %c0_0, %c0_1] : memref<2x1x256xf32, #tpu.memory_space<vmem>>, vector<2x1x256xf32>
    %cst = arith.constant dense<0.000000e+00> : vector<1x256xf32>
    %1 = vector.multi_reduction <add>, %0, %cst [0] : vector<2x1x256xf32> to vector<1x256xf32>
    %c0_2 = arith.constant 0 : index
    %c0_3 = arith.constant 0 : index
    %c0_4 = arith.constant 0 : index
    %2 = vector.load %arg3[%c0_2, %c0_3, %c0_4] : memref<2x1x256xf32, #tpu.memory_space<vmem>>, vector<2x1x256xf32>
    %cst_5 = arith.constant dense<0.000000e+00> : vector<1x256xf32>
    %3 = vector.multi_reduction <add>, %2, %cst_5 [0] : vector<2x1x256xf32> to vector<1x256xf32>
    %cst_6 = arith.constant 3.906250e-03 : f32
    %4 = vector.broadcast %cst_6 : f32 to vector<1x256xf32>
    %5 = arith.mulf %1, %4 : vector<1x256xf32>
    %cst_7 = arith.constant 3.906250e-03 : f32
    %6 = vector.broadcast %cst_7 : f32 to vector<1x256xf32>
    %7 = arith.mulf %3, %6 : vector<1x256xf32>
    %8 = arith.mulf %5, %5 : vector<1x256xf32>
    %9 = arith.subf %7, %8 : vector<1x256xf32>
    %c0_8 = arith.constant 0 : index
    %c0_9 = arith.constant 0 : index
    %10 = vector.load %arg4[%c0_8, %c0_9] : memref<1x256xf32, #tpu.memory_space<vmem>>, vector<1x256xf32>
    %cst_10 = arith.constant 9.99999974E-6 : f32
    %11 = vector.broadcast %cst_10 : f32 to vector<1x256xf32>
    %12 = arith.addf %9, %11 : vector<1x256xf32>
    %13 = math.rsqrt %12 : vector<1x256xf32>
    %14 = arith.mulf %10, %13 : vector<1x256xf32>
    %c0_11 = arith.constant 0 : index
    %c0_12 = arith.constant 0 : index
    %15 = vector.load %arg5[%c0_11, %c0_12] : memref<1x256xf32, #tpu.memory_space<vmem>>, vector<1x256xf32>
    %16 = arith.mulf %5, %14 : vector<1x256xf32>
    %17 = arith.subf %15, %16 : vector<1x256xf32>
    %c0_13 = arith.constant 0 : index
    %c0_14 = arith.constant 0 : index
    %18 = vector.load %arg1[%c0_13, %c0_14] : memref<128x256xf32, #tpu.memory_space<vmem>>, vector<128x256xf32>
    %19 = vector.broadcast %14 : vector<1x256xf32> to vector<128x256xf32>
    %20 = arith.mulf %18, %19 : vector<128x256xf32>
    %21 = vector.broadcast %17 : vector<1x256xf32> to vector<128x256xf32>
    %22 = arith.addf %20, %21 : vector<128x256xf32>
    %c0_15 = arith.constant 0 : index
    %c0_16 = arith.constant 0 : index
    %23 = vector.load %arg6[%c0_15, %c0_16] : memref<128x256xf32, #tpu.memory_space<vmem>>, vector<128x256xf32>
    tpu.vector_store %arg6[%c0_15, %c0_16], %22 {strides = array<i32>} : memref<128x256xf32, #tpu.memory_space<vmem>>, vector<128x256xf32>,
    return
  }
  func.func @transform_0(%arg0: i32) -> (i32, i32) {
    %c0_i32 = arith.constant 0 : i32
    %c0_i32_0 = arith.constant 0 : i32
    return %arg0, %c0_i32 : i32, i32
  }
  func.func @transform_1(%arg0: i32) -> (i32, i32, i32) {
    %c0_i32 = arith.constant 0 : i32
    %c0_i32_0 = arith.constant 0 : i32
    %c0_i32_1 = arith.constant 0 : i32
    %c0_i32_2 = arith.constant 0 : i32
    return %c0_i32, %c0_i32_0, %c0_i32_1 : i32, i32, i32
  }
  func.func @transform_2(%arg0: i32) -> (i32, i32, i32) {
    %c0_i32 = arith.constant 0 : i32
    %c0_i32_0 = arith.constant 0 : i32
    %c0_i32_1 = arith.constant 0 : i32
    %c0_i32_2 = arith.constant 0 : i32
    return %c0_i32, %c0_i32_0, %c0_i32_1 : i32, i32, i32
  }
  func.func @transform_3(%arg0: i32) -> (i32, i32) {
    %c0_i32 = arith.constant 0 : i32
    %c0_i32_0 = arith.constant 0 : i32
    %c0_i32_1 = arith.constant 0 : i32
    return %c0_i32, %c0_i32_0 : i32, i32
  }
  func.func @transform_4(%arg0: i32) -> (i32, i32) {
    %c0_i32 = arith.constant 0 : i32
    %c0_i32_0 = arith.constant 0 : i32
    %c0_i32_1 = arith.constant 0 : i32
    return %c0_i32, %c0_i32_0 : i32, i32
  }
  func.func @transform_5(%arg0: i32) -> (i32, i32) {
    %c0_i32 = arith.constant 0 : i32
    %c0_i32_0 = arith.constant 0 : i32
    return %arg0, %c0_i32 : i32, i32
  }
}

module attributes {stable_mosaic.version = 11 : i64} {
  func.func @_combine_kernel(%arg0: i32, %arg1: memref<128x256xf32, #tpu.memory_space<vmem>>, %arg2: memref<128x256xf32, #tpu.memory_space<vmem>>, %arg3: memref<1x1x256xf32, #tpu.memory_space<vmem>>, %arg4: memref<1x1x256xf32, #tpu.memory_space<vmem>>) attributes {dimension_semantics = [#tpu.dimension_semantics<parallel>], iteration_bounds = array<i64: 2>, scalar_prefetch = 0 : i64, scratch_operands = 0 : i64, tpu.core_type = #tpu.core_type<tc>, window_params = [{transform_indices = @transform_0, window_bounds = array<i64: 128, 256>}, {transform_indices = @transform_1, window_bounds = array<i64: 128, 256>}, {transform_indices = @transform_2, window_bounds = array<i64: 1, 1, 256>}, {transform_indices = @transform_3, window_bounds = array<i64: 1, 1, 256>}]} {
    %c0 = arith.constant 0 : index
    %c0_0 = arith.constant 0 : index
    %0 = vector.load %arg2[%c0, %c0_0] : memref<128x256xf32, #tpu.memory_space<vmem>>, vector<128x256xf32>
    %1 = math.exp %0 : vector<128x256xf32>
    %cst = arith.constant 1.000000e+00 : f32
    %2 = vector.broadcast %cst : f32 to vector<128x256xf32>
    %3 = arith.addf %2, %1 : vector<128x256xf32>
    %4 = math.log %3 : vector<128x256xf32>
    %c0_1 = arith.constant 0 : index
    %c0_2 = arith.constant 0 : index
    %5 = vector.load %arg1[%c0_1, %c0_2] : memref<128x256xf32, #tpu.memory_space<vmem>>, vector<128x256xf32>
    %cst_3 = arith.constant 1.000000e-10 : f32
    %6 = vector.broadcast %cst_3 : f32 to vector<128x256xf32>
    %7 = arith.maximumf %4, %6 : vector<128x256xf32>
    %8 = arith.divf %5, %7 : vector<128x256xf32>
    %cst_4 = arith.constant dense<0.000000e+00> : vector<256xf32>
    %9 = vector.multi_reduction <add>, %4, %cst_4 [0] : vector<128x256xf32> to vector<256xf32>
    %10 = vector.shape_cast %9 : vector<256xf32> to vector<1x256xf32>
    %cst_5 = arith.constant 7.812500e-03 : f32
    %11 = vector.broadcast %cst_5 : f32 to vector<1x256xf32>
    %12 = arith.mulf %10, %11 : vector<1x256xf32>
    %13 = vector.shape_cast %12 : vector<1x256xf32> to vector<1x1x256xf32>
    %c0_6 = arith.constant 0 : index
    %c0_7 = arith.constant 0 : index
    %c0_8 = arith.constant 0 : index
    %14 = vector.load %arg3[%c0_6, %c0_7, %c0_8] : memref<1x1x256xf32, #tpu.memory_space<vmem>>, vector<1x1x256xf32>
    tpu.vector_store %arg3[%c0_6, %c0_7, %c0_8], %13 {strides = array<i32>} : memref<1x1x256xf32, #tpu.memory_space<vmem>>, vector<1x1x256xf32>,
    %cst_9 = arith.constant dense<0.000000e+00> : vector<256xf32>
    %15 = vector.multi_reduction <add>, %8, %cst_9 [0] : vector<128x256xf32> to vector<256xf32>
    %16 = vector.shape_cast %15 : vector<256xf32> to vector<1x256xf32>
    %cst_10 = arith.constant 7.812500e-03 : f32
    %17 = vector.broadcast %cst_10 : f32 to vector<1x256xf32>
    %18 = arith.mulf %16, %17 : vector<1x256xf32>
    %19 = vector.shape_cast %18 : vector<1x256xf32> to vector<1x1x256xf32>
    %c0_11 = arith.constant 0 : index
    %c0_12 = arith.constant 0 : index
    %c0_13 = arith.constant 0 : index
    %20 = vector.load %arg4[%c0_11, %c0_12, %c0_13] : memref<1x1x256xf32, #tpu.memory_space<vmem>>, vector<1x1x256xf32>
    tpu.vector_store %arg4[%c0_11, %c0_12, %c0_13], %19 {strides = array<i32>} : memref<1x1x256xf32, #tpu.memory_space<vmem>>, vector<1x1x256xf32>,
    return
  }
  func.func @transform_0(%arg0: i32) -> (i32, i32) {
    %c0_i32 = arith.constant 0 : i32
    %c0_i32_0 = arith.constant 0 : i32
    return %arg0, %c0_i32 : i32, i32
  }
  func.func @transform_1(%arg0: i32) -> (i32, i32) {
    %c0_i32 = arith.constant 0 : i32
    %c0_i32_0 = arith.constant 0 : i32
    return %arg0, %c0_i32 : i32, i32
  }
  func.func @transform_2(%arg0: i32) -> (i32, i32, i32) {
    %c0_i32 = arith.constant 0 : i32
    %c0_i32_0 = arith.constant 0 : i32
    %c0_i32_1 = arith.constant 0 : i32
    return %arg0, %c0_i32, %c0_i32_0 : i32, i32, i32
  }
  func.func @transform_3(%arg0: i32) -> (i32, i32, i32) {
    %c0_i32 = arith.constant 0 : i32
    %c0_i32_0 = arith.constant 0 : i32
    %c0_i32_1 = arith.constant 0 : i32
    return %arg0, %c0_i32, %c0_i32_0 : i32, i32, i32
  }
}

module attributes {stable_mosaic.version = 11 : i64} {
  func.func @_pooled_head_kernel(%arg0: i32, %arg1: memref<8x256xf32, #tpu.memory_space<vmem>>, %arg2: memref<1x256xf32, #tpu.memory_space<vmem>>, %arg3: memref<1x256xf32, #tpu.memory_space<vmem>>, %arg4: memref<256x128xf32, #tpu.memory_space<vmem>>, %arg5: memref<8x256xf32, #tpu.memory_space<vmem>>, %arg6: memref<8x128xf32, #tpu.memory_space<vmem>>) attributes {dimension_semantics = [#tpu.dimension_semantics<arbitrary>], iteration_bounds = array<i64: 1>, scalar_prefetch = 0 : i64, scratch_operands = 0 : i64, tpu.core_type = #tpu.core_type<tc>, window_params = [{pipeline_mode = #tpu.pipeline_mode<synchronous>, transform_indices = @transform_0, window_bounds = array<i64: 8, 256>}, {pipeline_mode = #tpu.pipeline_mode<synchronous>, transform_indices = @transform_1, window_bounds = array<i64: 1, 256>}, {pipeline_mode = #tpu.pipeline_mode<synchronous>, transform_indices = @transform_2, window_bounds = array<i64: 1, 256>}, {pipeline_mode = #tpu.pipeline_mode<synchronous>, transform_indices = @transform_3, window_bounds = array<i64: 256, 128>}, {pipeline_mode = #tpu.pipeline_mode<synchronous>, transform_indices = @transform_4, window_bounds = array<i64: 8, 256>}, {pipeline_mode = #tpu.pipeline_mode<synchronous>, transform_indices = @transform_5, window_bounds = array<i64: 8, 128>}]} {
    %c0 = arith.constant 0 : index
    %c0_0 = arith.constant 0 : index
    %0 = vector.load %arg1[%c0, %c0_0] : memref<8x256xf32, #tpu.memory_space<vmem>>, vector<8x256xf32>
    %cst = arith.constant dense<0.000000e+00> : vector<256xf32>
    %1 = vector.multi_reduction <add>, %0, %cst [0] : vector<8x256xf32> to vector<256xf32>
    %2 = vector.shape_cast %1 : vector<256xf32> to vector<1x256xf32>
    %3 = arith.mulf %0, %0 : vector<8x256xf32>
    %cst_1 = arith.constant dense<0.000000e+00> : vector<256xf32>
    %4 = vector.multi_reduction <add>, %3, %cst_1 [0] : vector<8x256xf32> to vector<256xf32>
    %5 = vector.shape_cast %4 : vector<256xf32> to vector<1x256xf32>
    %cst_2 = arith.constant 5.000000e-01 : f32
    %6 = vector.broadcast %cst_2 : f32 to vector<1x256xf32>
    %7 = arith.mulf %2, %6 : vector<1x256xf32>
    %cst_3 = arith.constant 5.000000e-01 : f32
    %8 = vector.broadcast %cst_3 : f32 to vector<1x256xf32>
    %9 = arith.mulf %5, %8 : vector<1x256xf32>
    %10 = arith.mulf %7, %7 : vector<1x256xf32>
    %11 = arith.subf %9, %10 : vector<1x256xf32>
    %12 = vector.broadcast %7 : vector<1x256xf32> to vector<8x256xf32>
    %13 = arith.subf %0, %12 : vector<8x256xf32>
    %cst_4 = arith.constant 9.99999974E-6 : f32
    %14 = vector.broadcast %cst_4 : f32 to vector<1x256xf32>
    %15 = arith.addf %11, %14 : vector<1x256xf32>
    %16 = math.rsqrt %15 : vector<1x256xf32>
    %17 = vector.broadcast %16 : vector<1x256xf32> to vector<8x256xf32>
    %18 = arith.mulf %13, %17 : vector<8x256xf32>
    %c0_5 = arith.constant 0 : index
    %c0_6 = arith.constant 0 : index
    %19 = vector.load %arg2[%c0_5, %c0_6] : memref<1x256xf32, #tpu.memory_space<vmem>>, vector<1x256xf32>
    %20 = vector.broadcast %19 : vector<1x256xf32> to vector<8x256xf32>
    %21 = arith.mulf %18, %20 : vector<8x256xf32>
    %c0_7 = arith.constant 0 : index
    %c0_8 = arith.constant 0 : index
    %22 = vector.load %arg3[%c0_7, %c0_8] : memref<1x256xf32, #tpu.memory_space<vmem>>, vector<1x256xf32>
    %23 = vector.broadcast %22 : vector<1x256xf32> to vector<8x256xf32>
    %24 = arith.addf %21, %23 : vector<8x256xf32>
    %c0_9 = arith.constant 0 : index
    %c0_10 = arith.constant 0 : index
    %25 = vector.load %arg5[%c0_9, %c0_10] : memref<8x256xf32, #tpu.memory_space<vmem>>, vector<8x256xf32>
    tpu.vector_store %arg5[%c0_9, %c0_10], %24 {strides = array<i32>} : memref<8x256xf32, #tpu.memory_space<vmem>>, vector<8x256xf32>,
    %c0_11 = arith.constant 0 : index
    %c0_12 = arith.constant 0 : index
    %26 = vector.load %arg4[%c0_11, %c0_12] : memref<256x128xf32, #tpu.memory_space<vmem>>, vector<256x128xf32>
    %cst_13 = arith.constant dense<0.000000e+00> : vector<8x128xf32>
    %27 = tpu.matmul %24, %26, %cst_13 {dimension_numbers = #tpu.dot_dimension_numbers<[1], [0], [0], [1], [0, 0, 1, 1], [], []>} : vector<8x256xf32>, vector<256x128xf32>, vector<8x128xf32> -> vector<8x128xf32>
    %c0_14 = arith.constant 0 : index
    %c0_15 = arith.constant 0 : index
    %28 = vector.load %arg6[%c0_14, %c0_15] : memref<8x128xf32, #tpu.memory_space<vmem>>, vector<8x128xf32>
    tpu.vector_store %arg6[%c0_14, %c0_15], %27 {strides = array<i32>} : memref<8x128xf32, #tpu.memory_space<vmem>>, vector<8x128xf32>,
    return
  }
  func.func @transform_0(%arg0: i32) -> (i32, i32) {
    %c0_i32 = arith.constant 0 : i32
    %c0_i32_0 = arith.constant 0 : i32
    %c0_i32_1 = arith.constant 0 : i32
    return %c0_i32, %c0_i32_0 : i32, i32
  }
  func.func @transform_1(%arg0: i32) -> (i32, i32) {
    %c0_i32 = arith.constant 0 : i32
    %c0_i32_0 = arith.constant 0 : i32
    %c0_i32_1 = arith.constant 0 : i32
    return %c0_i32, %c0_i32_0 : i32, i32
  }
  func.func @transform_2(%arg0: i32) -> (i32, i32) {
    %c0_i32 = arith.constant 0 : i32
    %c0_i32_0 = arith.constant 0 : i32
    %c0_i32_1 = arith.constant 0 : i32
    return %c0_i32, %c0_i32_0 : i32, i32
  }
  func.func @transform_3(%arg0: i32) -> (i32, i32) {
    %c0_i32 = arith.constant 0 : i32
    %c0_i32_0 = arith.constant 0 : i32
    %c0_i32_1 = arith.constant 0 : i32
    return %c0_i32, %c0_i32_0 : i32, i32
  }
  func.func @transform_4(%arg0: i32) -> (i32, i32) {
    %c0_i32 = arith.constant 0 : i32
    %c0_i32_0 = arith.constant 0 : i32
    %c0_i32_1 = arith.constant 0 : i32
    return %c0_i32, %c0_i32_0 : i32, i32
  }
  func.func @transform_5(%arg0: i32) -> (i32, i32) {
    %c0_i32 = arith.constant 0 : i32
    %c0_i32_0 = arith.constant 0 : i32
    %c0_i32_1 = arith.constant 0 : i32
    return %c0_i32, %c0_i32_0 : i32, i32
  }
}

</mosaic_0001>

<bundles_post_ra>
// kernel: bayes_head_forward.19
= control target key start
LH: loop header
LB: loop body
LE: loop exit
PB: predicated region body
PF: predicated region fallthrough
CT: control target
= control target key end

     0   :  { %s457_s18 = smov 0   ;;  %s535_s0 = inlined_call_operand.vmem [shape: f32[256,128], index: 0, kind: input, shape index: {}]   ;;  %s536_s1 = inlined_call_operand.vmem [shape: f32[2,1,128], index: 1, kind: input, shape index: {}]   ;;  %s537_s2 = inlined_call_operand.vmem [shape: f32[2,1,128], index: 2, kind: input, shape index: {}]   ;;  %s538_s3 = inlined_call_operand.vmem [shape: f32[1,128], index: 3, kind: input, shape index: {}]   ;;  %s539_s4 = inlined_call_operand.vmem [shape: f32[1,128], index: 4, kind: input, shape index: {}]   ;;  %s540_s5 = inlined_call_operand.vmem [shape: f32[256,128], index: 5, kind: output, shape index: {}]  }
   0x1 LB: > { %s398_s19 = sadd.s32 4294967295, %s425_s18   ;;  %p402_p0 = scmp.ge.s32.totalorder %s425_s18, 1  ;;  %s425_s18 = sphi %s457_s18, %s15_s18  }
   0x2   : > { %p188_p1 = scmp.lt.s32.totalorder %s425_s18, 3 }
   0x4   : > { %p189_p2 = pnand %p402_p0, %p188_p1 }
   0x5   : > { %v228_v0 = vld [vmem:[%s536_s1] sm:$0x1] (!%p189_p2)  ;;  %v229_v1 = vld [vmem:[%s536_s1 + $0x1] sm:$0x1] (!%p189_p2)  ;;  %vm230_vm0 = vcmask (!%p189_p2), 1040384   ;;  %s403_s28 = sshll.u32 (!%p189_p2), %s398_s19, 4  ;;  %v267_v15 = vlaneseq (!%p189_p2) }
   0x6   : > { %192 = sbr.rel (%p189_p2) target bundleno = 49 (0x31), region = 40  ;;  %v231_v2 = vsel (!%p189_p2), %vm230_vm0, %v228_v0, 0.0  ;;  %v232_v3 = vsel (!%p189_p2), %vm230_vm0, %v229_v1, 0.0  ;;  %v234_v4 = vld [vmem:[%s537_s2] sm:$0x1] (!%p189_p2)  ;;  %p217_p3 = scmp.lt.s32.totalorder (!%p189_p2), %s403_s28, 31 }
   0x7   : > { %v233_v5 = vadd.f32 (!%p189_p2), %v232_v3, %v231_v2  ;;  %v235_v6 = vld [vmem:[%s537_s2 + $0x1] sm:$0x1] (!%p189_p2)  ;;  %v236_v7 = vsel (!%p189_p2), %vm230_vm0, %v234_v4, 0.0  ;;  %v268_v16 = vshrl.u32 (!%p189_p2), %v267_v15, 7  ;;  %v243_v17 = vld [vmem:[%s538_s3] sm:$0x1] (!%p189_p2) }
   0x8   : > { %v237_v8 = vsel (!%p189_p2), %vm230_vm0, %v235_v6, 0.0  ;;  %v247_v21 = vld [vmem:[%s539_s4] sm:$0x1] (!%p189_p2) }
   0x9   : > { %v238_v9 = vadd.f32 (!%p189_p2), %v237_v8, %v236_v7  ;;  %v239_v10 = vmul.f32 (!%p189_p2), 0.00390625, %v233_v5  ;;  %v269_v18 = vsub.s32 (!%p189_p2), 0, %v268_v16 }
   0xb   : > { %v240_v11 = vmul.f32 (!%p189_p2), 0.00390625, %v238_v9  ;;  %v241_v12 = vmul.f32 (!%p189_p2), %v239_v10, %v239_v10 }
   0xd   : > { %v242_v13 = vsub.f32 %v240_v11, %v241_v12  ;;  %s542_s28 = smov (!%p217_p3, %s403_s28), 31 }
   0xe   : > { %s404_s29 = sshll.u32 %s542_s28, 3 }
   0xf   : > { %v244_v14 = vadd.f32 1e-05, %v242_v13  ;;  %s485_s7 = scalar_lea.vmem %s535_s0, %s404_s29  ;;  %s512_s14 = scalar_lea.vmem %s540_s5, %s404_s29 }
  0x10   : > { %v250_v22 = vld [vmem:[%s485_s7] sm:$0xff]  ;;  %v251_v23 = vld [vmem:[%s485_s7 + $0x8] sm:$0xff]  ;;  %v252_v24 = vld [vmem:[%s485_s7 + $0x10] sm:$0xff] }
  0x11   : > { %417 = vrsqrt.f32 %v244_v14  ;;  %v253_v25 = vld [vmem:[%s485_s7 + $0x18] sm:$0xff]  ;;  %v254_v26 = vld [vmem:[%s485_s7 + $0x20] sm:$0xff]  ;;  %v255_v29 = vld [vmem:[%s485_s7 + $0x28] sm:$0xff] }
  0x12   : > { %v256_v30 = vld [vmem:[%s485_s7 + $0x30] sm:$0xff]  ;;  %v257_v31 = vld [vmem:[%s485_s7 + $0x38] sm:$0xff]  ;;  %v258_v32 = vld [vmem:[%s485_s7 + $0x40] sm:$0xff] }
  0x13   : > { %v259_v33 = vld [vmem:[%s485_s7 + $0x48] sm:$0xff]  ;;  %v260_v34 = vld [vmem:[%s485_s7 + $0x50] sm:$0xff]  ;;  %v261_v39 = vld [vmem:[%s485_s7 + $0x58] sm:$0xff] }
  0x14   : > { %v262_v40 = vld [vmem:[%s485_s7 + $0x60] sm:$0xff]  ;;  %v263_v41 = vld [vmem:[%s485_s7 + $0x68] sm:$0xff]  ;;  %v264_v2 = vld [vmem:[%s485_s7 + $0x70] sm:$0xff] }
  0x15   : > { %v265_v3 = vld [vmem:[%s485_s7 + $0x78] sm:$0xff] }
  0x1b   : > { %v418_v19 = vpop.eup %417 }
  0x1c   : > { %v246_v20 = vmul.f32 %v418_v19, %v243_v17 }
  0x1e   : > { %v248_v27 = vmul.f32 %v246_v20, %v239_v10  ;;  %v270_v28 = vrot.slane %v246_v20, %v269_v18 }
  0x20   : > { %v249_v35 = vsub.f32 %v247_v21, %v248_v27  ;;  %v272_v36 = vmul.f32 %v270_v28, %v250_v22  ;;  %v273_v37 = vmul.f32 %v270_v28, %v251_v23  ;;  %v274_v38 = vmul.f32 %v270_v28, %v252_v24 }
  0x21   : > { %v275_v42 = vmul.f32 %v270_v28, %v253_v25  ;;  %v276_v43 = vmul.f32 %v270_v28, %v254_v26  ;;  %v277_v44 = vmul.f32 %v270_v28, %v255_v29  ;;  %v278_v45 = vmul.f32 %v270_v28, %v256_v30 }
  0x22   : > { %v292_v46 = vrot.slane %v249_v35, %v269_v18  ;;  %v279_v47 = vmul.f32 %v270_v28, %v257_v31  ;;  %v280_v48 = vmul.f32 %v270_v28, %v258_v32  ;;  %v281_v49 = vmul.f32 %v270_v28, %v259_v33 }
  0x23   : > { %v282_v50 = vmul.f32 %v270_v28, %v260_v34  ;;  %v283_v51 = vmul.f32 %v270_v28, %v261_v39  ;;  %v284_v52 = vmul.f32 %v270_v28, %v262_v40  ;;  %v285_v53 = vmul.f32 %v270_v28, %v263_v41 }
  0x24   : > { %v294_v54 = vadd.f32 %v292_v46, %v272_v36  ;;  %v295_v55 = vadd.f32 %v292_v46, %v273_v37  ;;  %v296_v56 = vadd.f32 %v292_v46, %v274_v38  ;;  %v297_v57 = vadd.f32 %v292_v46, %v275_v42 }
  0x25   : > { %v298_v58 = vadd.f32 %v292_v46, %v276_v43  ;;  %v299_v59 = vadd.f32 %v292_v46, %v277_v44  ;;  %v300_v60 = vadd.f32 %v292_v46, %v278_v45  ;;  %v301_v61 = vadd.f32 %v292_v46, %v279_v47 }
  0x26   : > { %v310_v62 = vmax.f32 %v294_v54, 0.0  ;;  %v311_v63 = vmax.f32 %v295_v55, 0.0  ;;  %v312_v0 = vmax.f32 %v296_v56, 0.0  ;;  %v313_v1 = vmax.f32 %v297_v57, 0.0 }
  0x27   : > { %v314_v4 = vmax.f32 %v298_v58, 0.0  ;;  %v315_v5 = vmax.f32 %v299_v59, 0.0  ;;  %v316_v6 = vmax.f32 %v300_v60, 0.0  ;;  %v317_v7 = vmax.f32 %v301_v61, 0.0 }
  0x28   : > { %326 = vst [vmem:[%s512_s14] sm:$0xff] %v310_v62  ;;  %327 = vst [vmem:[%s512_s14 + $0x8] sm:$0xff] %v311_v63  ;;  %v302_v8 = vadd.f32 %v292_v46, %v280_v48  ;;  %v303_v9 = vadd.f32 %v292_v46, %v281_v49  ;;  %v304_v10 = vadd.f32 %v292_v46, %v282_v50 }
  0x29   : > { %328 = vst [vmem:[%s512_s14 + $0x10] sm:$0xff] %v312_v0  ;;  %329 = vst [vmem:[%s512_s14 + $0x18] sm:$0xff] %v313_v1  ;;  %v305_v11 = vadd.f32 %v292_v46, %v283_v51  ;;  %v306_v12 = vadd.f32 %v292_v46, %v284_v52  ;;  %v307_v13 = vadd.f32 %v292_v46, %v285_v53 }
  0x2a   : > { %330 = vst [vmem:[%s512_s14 + $0x20] sm:$0xff] %v314_v4  ;;  %331 = vst [vmem:[%s512_s14 + $0x28] sm:$0xff] %v315_v5  ;;  %v286_v14 = vmul.f32 %v270_v28, %v264_v2  ;;  %v287_v15 = vmul.f32 %v270_v28, %v265_v3  ;;  %v318_v16 = vmax.f32 %v302_v8, 0.0  ;;  %v319_v17 = vmax.f32 %v303_v9, 0.0 }
  0x2b   : > { %332 = vst [vmem:[%s512_s14 + $0x30] sm:$0xff] %v316_v6  ;;  %333 = vst [vmem:[%s512_s14 + $0x38] sm:$0xff] %v317_v7  ;;  %v320_v18 = vmax.f32 %v304_v10, 0.0  ;;  %v321_v19 = vmax.f32 %v305_v11, 0.0  ;;  %v322_v20 = vmax.f32 %v306_v12, 0.0  ;;  %v323_v21 = vmax.f32 %v307_v13, 0.0 }
  0x2c   : > { %v308_v22 = vadd.f32 %v292_v46, %v286_v14  ;;  %v309_v23 = vadd.f32 %v292_v46, %v287_v15  ;;  %334 = vst [vmem:[%s512_s14 + $0x40] sm:$0xff] %v318_v16  ;;  %335 = vst [vmem:[%s512_s14 + $0x48] sm:$0xff] %v319_v17 }
  0x2d   : > { %336 = vst [vmem:[%s512_s14 + $0x50] sm:$0xff] %v320_v18  ;;  %337 = vst [vmem:[%s512_s14 + $0x58] sm:$0xff] %v321_v19 }
  0x2e   : > { %338 = vst [vmem:[%s512_s14 + $0x60] sm:$0xff] %v322_v20  ;;  %339 = vst [vmem:[%s512_s14 + $0x68] sm:$0xff] %v323_v21  ;;  %v324_v24 = vmax.f32 %v308_v22, 0.0  ;;  %v325_v25 = vmax.f32 %v309_v23, 0.0 }
  0x30   : > { %340 = vst [vmem:[%s512_s14 + $0x70] sm:$0xff] %v324_v24  ;;  %341 = vst [vmem:[%s512_s14 + $0x78] sm:$0xff] %v325_v25 }
  0x31 PF: > { %s15_s18 = sadd.s32 1, %s425_s18  }
  0x32   : > { %p12_p4 = scmp.ge.s32.totalorder %s15_s18, 4  }
  0x34   :  { %14 = sbr.rel (!%p12_p4) target bundleno = 1 (0x1), region = 70 }

// kernel: bayes_head_forward.18
= control target key start
LH: loop header
LB: loop body
LE: loop exit
PB: predicated region body
PF: predicated region fallthrough
CT: control target
= control target key end

     0   :  { %s1636_s0 = inlined_call_operand.hbm [shape: f32[256,256], index: 0, kind: input, shape index: {}]   ;;  %s1637_s1 = inlined_call_operand.hbm [shape: f32[256,128], index: 1, kind: input, shape index: {}]   ;;  %s1638_s2 = inlined_call_operand.vmem [shape: f32[1,128], index: 2, kind: input, shape index: {}]   ;;  %s1639_s3 = inlined_call_operand.vmem [shape: f32[256,128], index: 3, kind: output, shape index: {0}]   ;;  %s1640_s4 = inlined_call_operand.vmem [shape: f32[2,1,128], index: 4, kind: output, shape index: {1}]   ;;  %s1641_s5 = inlined_call_operand.vmem [shape: f32[2,1,128], index: 5, kind: output, shape index: {2}]  }
   0x1   :  { %1648 = sst [smem:[#allocation12_spill]] %s1638_s2 }
   0x2   :  { %11 = vsyncpa [#allocation4], 0 }
   0x3   :  { %13 = vsyncpa [#allocation4 + $0x1], 0 }
   0x4   :  { %14 = vsyncpa [#allocation6], 0 }
   0x5   :  { %16 = vsyncpa [#allocation6 + $0x1], 0  ;;  %s1294_s18 = smov 0   ;;  %s1296_s19 = smov 0  }
   0x6   :  { %s1298_s20 = smov 0   ;;  %s1300_s21 = smov 0  }
   0x7   :  { %s1302_s22 = smov 0   ;;  %s1304_s23 = smov 0  }
   0x8   :  { %s1306_s24 = smov 0   ;;  %s1308_s25 = smov 0  }
   0x9   :  { %s1310_s26 = smov 0   ;;  %s1312_s27 = smov 0  }
   0xa   :  { %s1314_s28 = smov 0  }
   0xb LB: > { %1649 = sst [smem:[#allocation9_spill]] %s1240_s24  ;;  %s31_s29 = sadd.s32 1, %s1248_s26  ;;  %s1256_s28 = sphi %s1314_s28, %s22_s28   ;;  %s1252_s27 = sphi %s1312_s27, %s1678_s27   ;;  %s1248_s26 = sphi %s1310_s26, %s1677_s26   ;;  %s1244_s25 = sphi %s1308_s25, %s1676_s25   ;;  %s1240_s24 = sphi %s1306_s24, %s1675_s24   ;;  %s1236_s23 = sphi %s1304_s23, %s1674_s23   ;;  %s1232_s22 = sphi %s1302_s22, %s1673_s22   ;;  %s1228_s21 = sphi %s1300_s21, %s1672_s21   ;;  %s1224_s20 = sphi %s1298_s20, %s1671_s20   ;;  %s1220_s19 = sphi %s1296_s19, %s1670_s19   ;;  %s1216_s18 = sphi %s1294_s18, %s1669_s18  }
   0xc   : > { %s34_s30 = sadd.s32 1, %s1252_s27  ;;  %p32_p0 = scmp.ge.s32.totalorder %s31_s29, 2 }
   0xd   : > { %s43_s6 = sadd.s32 1, %s1236_s23  ;;  %p50_p1 = scmp.ne.s32.totalorder %s1236_s23, %s1232_s22 }
   0xe   : > { %p1645_p2 = scmp.eq.s32.totalorder %s1256_s28, 0  ;;  %s1680_s29 = smov (%p32_p0, %s31_s29), 0 }
   0xf   : > { %1650 = sst [smem:[#allocation10_spill]] %s1680_s29  ;;  %s1682_s30 = smov (!%p32_p0, %s34_s30), %s1252_s27 }
  0x10   : > { %s1360_s7 = ssub.s32 %s1248_s26, %s1680_s29  ;;  %p1364_p3 = por %p1645_p2, %p50_p1 }
  0x11   : > { %p36_p4 = scmp.ge.s32.totalorder %s1682_s30, 2  ;;  %p1644_p7 = scmp.lt.s32.totalorder %s1256_s28, 4 }
  0x12   : > { %s208_s9 = sand.u32 1, %s1236_s23   ;;  %s860_s13 = sshll.u32 %s1252_s27, 5 }
  0x13   : > { %s1684_s30 = smov (%p36_p4, %s1682_s30), 0  ;;  %s843_s12 = sshll.u32 %s208_s9, 7 }
  0x14   : > { %1652 = sst [smem:[#allocation11_spill]] %s1684_s30  ;;  %s38_s10 = ssub.s32 %s1252_s27, %s1684_s30 }
  0x15   : > { %s40_s11 = sor.u32 %s1360_s7, %s38_s10  ;;  %s212_s14 = scalar_lea.vmem [#allocation3], %s843_s12 }
  0x16   : > { %p41_p8 = scmp.eq.s32.totalorder %s40_s11, 0  ;;  %s221_s15 = sshll.u32 %s212_s14, 4  ;;  %s1383_s15 = int_to_ptr.vmem [resolvable:$true] %s221_s15 }
  0x17   : > { %s218_s17 = sadd.s32 %s1248_s26, %s860_s13  ;;  %p1389_p9 = pnand %p1644_p7, %p1364_p3 }
  0x18   : > { %s1380_s16 = scalar_select %p41_p8, %s1236_s23, %s43_s6  }
  0x19   : > { %s846_s29 = sshll.u32 %s218_s17, 7  ;;  %p850_p10 = scmp.ge.s32.totalorder %s1256_s28, 1 }
  0x1a   : > { %s1396_s10 = scalar_lea.hbm %s1636_s0, %s846_s29  ;;  %s1399_s6 = scalar_lea.sflag [#allocation4], %s208_s9 }
  0x1b   : > { %s1102_s8 = scalar_lea.hbm %s1396_s10, 2048  ;;  %p1104_p12 = pneg %p1389_p9 }
  0x1c   : > { %p1103_p11 = scmp.ne.s32.totalorder %s1396_s10, %s1102_s8  ;;  %s1107_s29 = scalar_lea.hbm %s1636_s0, 8192 }
  0x1d   : > { %p1108_p1 = scmp.lt.u32.totalorder %s1396_s10, %s1636_s0  ;;  %p1109_p3 = scmp.lt.u32.totalorder %s1107_s29, %s1102_s8 }
  0x1e   : > { %p1105_p13 = pnand %p1104_p12, %p1103_p11  ;;  %p1111_p8 = scmp.lt.u32.totalorder %s1102_s8, %s1396_s10 }
  0x1f   : > { %p1110_p4 = por %p1109_p3, %p1108_p1 }
  0x20   : > { %p1106_p0 = pneg %p1105_p13 }
  0x21   : > { %p1112_p7 = por %p1111_p8, %p1110_p4 }
  0x23   : > { %p1113_p2 = pnand %p1112_p7, %p1106_p0 }
  0x25   : > { %1116 = shalt.err (!%p1113_p2)
}
  0x26   : > { %s1117_s9 = scalar_lea.vmem %s1383_s15, 2048  ;;  %s1258_s13 = smov [#allocation3]  }
  0x27   : > { %p1118_p11 = scmp.ne.s32.totalorder %s1383_s15, %s1117_s9  ;;  %s1122_s14 = sshll.u32 %s1258_s13, 4  ;;  %s1123_s14 = int_to_ptr.vmem [resolvable:$false] %s1122_s14 }
  0x28   : > { %s1124_s17 = scalar_lea.vmem %s1123_s14, 4096  ;;  %p1125_p6 = scmp.lt.s32.totalorder %s1383_s15, %s1123_s14 }
  0x29   : > { %p1120_p13 = pnand %p1118_p11, %p1104_p12  ;;  %p1126_p1 = scmp.lt.s32.totalorder %s1124_s17, %s1117_s9 }
  0x2b   : > { %p1121_p5 = pneg %p1120_p13  ;;  %p1127_p3 = por %p1126_p1, %p1125_p6 }
  0x2d   : > { %p1128_p4 = pnand %p1127_p3, %p1121_p5 }
  0x2f   : > { %1131 = shalt.err (!%p1128_p4)
}
  0x30   : > { %s1259_s8 = smov 256   ;;  %s1260_s24 = smov 128  }
  0x31   : > { %s1261_s30 = smov 8   ;;  %p250_p2 = scmp.lt.s32.totalorder %s1256_s28, 5 }
  0x32   : > { %1005 = dma.hbm_to_vmem [thread:$0]  (!%p1389_p9), %s1396_s10, 2048, %s1383_s15, %s1399_s6, %s1259_s8, %s1260_s24, %s1261_s30  }
  0x33   : > { %p1432_p5 = pnand %p850_p10, %p250_p2  ;;  %s839_s11 = sadd.s32 4294967295, %s1256_s28  }
  0x34   : > { %s69_s12 = sadd.s32 1, %s1224_s20  ;;  %p57_p6 = scmp.eq.s32.totalorder %s839_s11, 0 }
  0x35   : > { %p76_p7 = scmp.ne.s32.totalorder %s1224_s20, %s1220_s19  ;;  %p1655_p12 = scmp.eq.s32.totalorder %s1360_s7, 0 }
  0x36   : > { %p1656_p0 = scmp.ne.s32.totalorder %s1232_s22, %s1228_s21  ;;  %p82_p9 = scmp.ne.s32.totalorder %s1220_s19, %s1216_s18 }
  0x37   : > { %s1443_s9 = scalar_select %p1655_p12, %s1224_s20, %s69_s12  }
  0x38   : > { %p1448_p8 = por %p57_p6, %p1656_p0  ;;  %s231_s15 = sand.u32 1, %s1224_s20  }
  0x39   : > { %p1658_p11 = scmp.eq.s32.totalorder %s1256_s28, 0  ;;  %s847_s10 = sshll.u32 %s231_s15, 7 }
  0x3a   : > { %s1657_s2 = scalar_select %p1448_p8, 1, 0 }
  0x3b   : > { %p78_p10 = por %p76_p7, %p1658_p11  ;;  %p1457_p13 = por %p82_p9, %p57_p6 }
  0x3c   : > { %s861_s13 = sshll.u32 %s1248_s26, 11  ;;  %s235_s14 = scalar_lea.vmem [#allocation5], %s847_s10 }
  0x3d   : > { %s1659_s6 = scalar_select %p1457_p13, 1, 0 }
  0x3e   : > { %s242_s17 = sshll.u32 %s235_s14, 4  ;;  %s1465_s21 = scalar_lea.hbm %s1637_s1, %s861_s13  ;;  %s1467_s17 = int_to_ptr.vmem [resolvable:$true] %s242_s17 }
  0x3f   : > { %p1660_p1 = scmp.lt.s32.totalorder %s1256_s28, 4  ;;  %s1475_s11 = scalar_lea.sflag [#allocation6], %s231_s15 }
  0x40   : > { %s1132_s12 = scalar_lea.hbm %s1465_s21, 2048  ;;  %s1137_s14 = scalar_lea.hbm %s1637_s1, 4096 }
  0x41   : > { %p1471_p3 = pnand %p1660_p1, %p78_p10  ;;  %p1133_p4 = scmp.ne.s32.totalorder %s1465_s21, %s1132_s12 }
  0x42   : > { %p1138_p12 = scmp.lt.u32.totalorder %s1465_s21, %s1637_s1  ;;  %p1139_p0 = scmp.lt.u32.totalorder %s1137_s14, %s1132_s12 }
  0x43   : > { %p1134_p2 = pneg %p1471_p3  ;;  %p1141_p11 = scmp.lt.u32.totalorder %s1132_s12, %s1465_s21 }
  0x44   : > { %p1140_p9 = por %p1139_p0, %p1138_p12 }
  0x45   : > { %p1135_p6 = pnand %p1134_p2, %p1133_p4 }
  0x46   : > { %p1142_p10 = por %p1141_p11, %p1140_p9 }
  0x47   : > { %p1136_p7 = pneg %p1135_p6 }
  0x49   : > { %p1143_p1 = pnand %p1142_p10, %p1136_p7 }
  0x4b   : > { %1146 = shalt.err (!%p1143_p1)
}
  0x4c   : > { %s1147_s15 = scalar_lea.vmem %s1467_s17, 2048  ;;  %s1262_s10 = smov [#allocation5]  }
  0x4d   : > { %p1148_p4 = scmp.ne.s32.totalorder %s1467_s17, %s1147_s15  ;;  %s1152_s13 = sshll.u32 %s1262_s10, 4  ;;  %s1153_s13 = int_to_ptr.vmem [resolvable:$false] %s1152_s13 }
  0x4e   : > { %s1154_s7 = scalar_lea.vmem %s1153_s13, 4096  ;;  %p1155_p8 = scmp.lt.s32.totalorder %s1467_s17, %s1153_s13 }
  0x4f   : > { %p1150_p6 = pnand %p1148_p4, %p1134_p2  ;;  %p1156_p12 = scmp.lt.s32.totalorder %s1154_s7, %s1147_s15 }
  0x51   : > { %p1151_p13 = pneg %p1150_p6  ;;  %p1157_p0 = por %p1156_p12, %p1155_p8 }
  0x53   : > { %p1158_p9 = pnand %p1157_p0, %p1151_p13 }
  0x55   : > { %1161 = shalt.err (!%p1158_p9)
}
  0x56   : > { %1008 = dma.hbm_to_vmem [thread:$0]  (!%p1471_p3), %s1465_s21, 2048, %s1467_s17, %s1475_s11, %s1260_s24, %s1260_s24, %s1261_s30  }
  0x57   : > { %254 = sbr.rel (%p1432_p5) target bundleno = 423 (0x1a7), region = 32  ;;  %s256_s12 = sand.u32 (!%p1432_p5), 1, %s1232_s22  }
  0x58   : > { %s851_s14 = sshll.u32 (!%p1432_p5), %s256_s12, 7  ;;  %s257_s8 = scalar_lea.sflag (!%p1432_p5), [#allocation4], %s256_s12 }
  0x59   : > { %s1509_s15 = scalar_lea.vmem (!%p1432_p5), [#allocation3], %s851_s14  ;;  %p1662_p8 = scmp.ne.s32.totalorder (!%p1432_p5), %s1657_s2, 0 }
  0x5e   : > { %1207 = dma.done.wait (%p1662_p8), %s257_s8, 2048  }
  0x5f   : > { %1209 = vsyncadd (%p1662_p8), %s257_s8, 4294965248  ;;  %s265_s18 = sand.u32 1, %s1220_s19   ;;  %p1663_p5 = scmp.ne.s32.totalorder %s1659_s6, 0 }
  0x60   : > { %s852_s10 = sshll.u32 %s265_s18, 7  ;;  %s266_s24 = scalar_lea.sflag [#allocation6], %s265_s18 }
  0x61   : > { %s1516_s30 = scalar_lea.vmem [#allocation5], %s852_s10 }
  0x62   : > { %1211 = dma.done.wait (%p1663_p5), %s266_s24, 2048  }
  0x63   : > { %1213 = vsyncadd (%p1663_p5), %s266_s24, 4294965248  ;;  %s853_s29 = sshll.u32 %s1244_s25, 4  ;;  %p315_p13 = scmp.lt.s32.totalorder %s1244_s25, 1 }
  0x64   : > { %p310_p3 = scmp.lt.s32.totalorder %s853_s29, 31  ;;  %s1664_s18 = sld [smem:[#allocation9_spill]] }
  0x65   : > { %s1686_s25 = smov (!%p315_p13, %s1244_s25), 1 }
  0x66   : > { %s1688_s29 = smov (!%p310_p3, %s853_s29), 31  ;;  %s317_s21 = scalar_lea.vmem %s1640_s4, %s1686_s25 }
  0x67   : > { %s320_s6 = scalar_lea.vmem %s1641_s5, %s1686_s25  ;;  %s854_s7 = sshll.u32 %s1688_s29, 3 }
  0x68   : > { %s1538_s8 = scalar_lea.vmem %s1639_s3, %s854_s7 }
  0x6a   : > { %p855_p2 = scmp.ne.s32.totalorder %s1664_s18, 0 }
  0x6b   : > { %v1263_v0 = vmov (!%p855_p2), 0.0  }
  0x6c   : > { %324 = sbr.rel (%p855_p2) target bundleno = 116 (0x74), region = 44  ;;  %325 = vst [vmem:[#allocation2] sm:$0xff] (!%p855_p2), %v1263_v0  ;;  %326 = vst [vmem:[#allocation2 + $0x8] sm:$0xff] (!%p855_p2), %v1263_v0 }
  0x6d   : > { %327 = vst [vmem:[#allocation2 + $0x10] sm:$0xff] (!%p855_p2), %v1263_v0  ;;  %328 = vst [vmem:[#allocation2 + $0x18] sm:$0xff] (!%p855_p2), %v1263_v0 }
  0x6e   : > { %329 = vst [vmem:[#allocation2 + $0x20] sm:$0xff] (!%p855_p2), %v1263_v0  ;;  %330 = vst [vmem:[#allocation2 + $0x28] sm:$0xff] (!%p855_p2), %v1263_v0 }
  0x6f   : > { %331 = vst [vmem:[#allocation2 + $0x30] sm:$0xff] (!%p855_p2), %v1263_v0  ;;  %332 = vst [vmem:[#allocation2 + $0x38] sm:$0xff] (!%p855_p2), %v1263_v0 }
  0x70   : > { %333 = vst [vmem:[#allocation2 + $0x40] sm:$0xff] (!%p855_p2), %v1263_v0  ;;  %334 = vst [vmem:[#allocation2 + $0x48] sm:$0xff] (!%p855_p2), %v1263_v0 }
  0x71   : > { %335 = vst [vmem:[#allocation2 + $0x50] sm:$0xff] (!%p855_p2), %v1263_v0  ;;  %336 = vst [vmem:[#allocation2 + $0x58] sm:$0xff] (!%p855_p2), %v1263_v0 }
  0x72   : > { %337 = vst [vmem:[#allocation2 + $0x60] sm:$0xff] (!%p855_p2), %v1263_v0  ;;  %338 = vst [vmem:[#allocation2 + $0x68] sm:$0xff] (!%p855_p2), %v1263_v0 }
  0x73   : > { %339 = vst [vmem:[#allocation2 + $0x70] sm:$0xff] %v1263_v0  ;;  %340 = vst [vmem:[#allocation2 + $0x78] sm:$0xff] %v1263_v0 }
  0x74 PF: > { %v373_v1 = vld [vmem:[%s1516_s30] sm:$0xff]  ;;  %v374_v2 = vld [vmem:[%s1516_s30 + $0x8] sm:$0xff]  ;;  %v375_v3 = vld [vmem:[%s1516_s30 + $0x10] sm:$0xff] }
  0x75   : > { %v950_v4 = vpack.c.bf16 %v374_v2, %v373_v1  ;;  %v376_v5 = vld [vmem:[%s1516_s30 + $0x18] sm:$0xff]  ;;  %v377_v7 = vld [vmem:[%s1516_s30 + $0x20] sm:$0xff]  ;;  %v378_v8 = vld [vmem:[%s1516_s30 + $0x28] sm:$0xff] }
  0x76   : > { %v954_v6 = vpack.c.bf16 %v376_v5, %v375_v3  ;;  %v958_v9 = vpack.c.bf16 %v378_v8, %v377_v7  ;;  %v357_v10 = vld [vmem:[%s1509_s15] sm:$0xff]  ;;  %v379_v12 = vld [vmem:[%s1516_s30 + $0x30] sm:$0xff]  ;;  %v380_v13 = vld [vmem:[%s1516_s30 + $0x38] sm:$0xff] }
  0x77   : > { %951 = vmatprep.subr.bf16.mxu0 %v950_v4  ;;  %982 = vmatprep.subr.bf16.mxu1 %v950_v4  ;;  %v365_v11 = vld [vmem:[%s1509_s15 + $0x40] sm:$0xff]  ;;  %v962_v14 = vpack.c.bf16 %v380_v13, %v379_v12  ;;  %v382_v16 = vld [vmem:[%s1516_s30 + $0x48] sm:$0xff]  ;;  %v383_v18 = vld [vmem:[%s1516_s30 + $0x50] sm:$0xff] }
  0x78   : > { %953 = vmatpush3.bf16.msra.mxu0 %v950_v4  ;;  %990 = vmatpush3.bf16.msra.mxu1 %v950_v4  ;;  %v381_v15 = vld [vmem:[%s1516_s30 + $0x40] sm:$0xff]  ;;  %v384_v19 = vld [vmem:[%s1516_s30 + $0x58] sm:$0xff]  ;;  %v386_v22 = vld [vmem:[%s1516_s30 + $0x68] sm:$0xff] }
  0x79   : > { %955 = vmatprep.subr.bf16.mxu0 %v954_v6  ;;  %983 = vmatprep.subr.bf16.mxu1 %v954_v6  ;;  %v966_v17 = vpack.c.bf16 %v382_v16, %v381_v15  ;;  %v970_v20 = vpack.c.bf16 %v384_v19, %v383_v18  ;;  %v385_v21 = vld [vmem:[%s1516_s30 + $0x60] sm:$0xff]  ;;  %v387_v24 = vld [vmem:[%s1516_s30 + $0x70] sm:$0xff]  ;;  %v388_v25 = vld [vmem:[%s1516_s30 + $0x78] sm:$0xff] }
  0x7a   : > { %926 = vmatprep.mubr.f32.mxu0 %v357_v10  ;;  %938 = vmatprep.mubr.f32.mxu1 %v365_v11  ;;  %v974_v23 = vpack.c.bf16 %v386_v22, %v385_v21  ;;  %v978_v26 = vpack.c.bf16 %v388_v25, %v387_v24  ;;  %v358_v27 = vld [vmem:[%s1509_s15 + $0x8] sm:$0xff]  ;;  %v359_v29 = vld [vmem:[%s1509_s15 + $0x10] sm:$0xff]  ;;  %v360_v31 = vld [vmem:[%s1509_s15 + $0x18] sm:$0xff] }
  0x7b   : > { %v366_v28 = vld [vmem:[%s1509_s15 + $0x48] sm:$0xff]  ;;  %v367_v30 = vld [vmem:[%s1509_s15 + $0x50] sm:$0xff]  ;;  %v368_v32 = vld [vmem:[%s1509_s15 + $0x58] sm:$0xff] }
  0x7c   : > { %957 = vmatpush3.bf16.msra.mxu0 %v954_v6  ;;  %991 = vmatpush3.bf16.msra.mxu1 %v954_v6  ;;  %v361_v33 = vld [vmem:[%s1509_s15 + $0x20] sm:$0xff]  ;;  %v362_v35 = vld [vmem:[%s1509_s15 + $0x28] sm:$0xff]  ;;  %v363_v37 = vld [vmem:[%s1509_s15 + $0x30] sm:$0xff] }
  0x7d   : > { %959 = vmatprep.subr.bf16.mxu0 %v958_v9  ;;  %984 = vmatprep.subr.bf16.mxu1 %v958_v9  ;;  %v369_v34 = vld [vmem:[%s1509_s15 + $0x60] sm:$0xff]  ;;  %v370_v36 = vld [vmem:[%s1509_s15 + $0x68] sm:$0xff]  ;;  %v371_v38 = vld [vmem:[%s1509_s15 + $0x70] sm:$0xff] }
  0x7e   : > { %v364_v39 = vld [vmem:[%s1509_s15 + $0x38] sm:$0xff]  ;;  %v342_v41 = vld [vmem:[#allocation2 + $0x8] sm:$0xff]  ;;  %v341_v43 = vld [vmem:[#allocation2] sm:$0xff] }
  0x7f   : > { %v372_v40 = vld [vmem:[%s1509_s15 + $0x78] sm:$0xff]  ;;  %v350_v42 = vld [vmem:[#allocation2 + $0x48] sm:$0xff]  ;;  %v349_v44 = vld [vmem:[#allocation2 + $0x40] sm:$0xff]  ;;  %s1665_s15 = sld [smem:[#allocation9_spill]] }
  0x80   : > { %961 = vmatpush3.bf16.msra.mxu0 %v958_v9  ;;  %992 = vmatpush3.bf16.msra.mxu1 %v958_v9  ;;  %v344_v53 = vld [vmem:[#allocation2 + $0x18] sm:$0xff]  ;;  %v343_v55 = vld [vmem:[#allocation2 + $0x10] sm:$0xff]  ;;  %v346_v1 = vld [vmem:[#allocation2 + $0x28] sm:$0xff] }
  0x81   : > { %963 = vmatprep.subr.bf16.mxu0 %v962_v14  ;;  %985 = vmatprep.subr.bf16.mxu1 %v962_v14  ;;  %v352_v54 = vld [vmem:[#allocation2 + $0x58] sm:$0xff]  ;;  %v351_v56 = vld [vmem:[#allocation2 + $0x50] sm:$0xff]  ;;  %v354_v2 = vld [vmem:[#allocation2 + $0x68] sm:$0xff] }
  0x82   : > { %v345_v3 = vld [vmem:[#allocation2 + $0x20] sm:$0xff]  ;;  %v348_v13 = vld [vmem:[#allocation2 + $0x38] sm:$0xff]  ;;  %v347_v15 = vld [vmem:[#allocation2 + $0x30] sm:$0xff] }
  0x83   : > { %v353_v4 = vld [vmem:[#allocation2 + $0x60] sm:$0xff]  ;;  %v355_v16 = vld [vmem:[#allocation2 + $0x70] sm:$0xff] }
  0x84   : > { %965 = vmatpush3.bf16.msra.mxu0 %v962_v14  ;;  %993 = vmatpush3.bf16.msra.mxu1 %v962_v14  ;;  %v356_v14 = vld [vmem:[#allocation2 + $0x78] sm:$0xff] }
  0x85   : > { %967 = vmatprep.subr.bf16.mxu0 %v966_v17  ;;  %986 = vmatprep.subr.bf16.mxu1 %v966_v17  ;;  %p856_p7 = scmp.ne.s32.totalorder %s1665_s15, 1 }
  0x86   : > { %s1666_s30 = sld [smem:[#allocation12_spill]] (!%p856_p7) }
  0x88   : > { %969 = vmatpush3.bf16.msra.mxu0 %v966_v17  ;;  %994 = vmatpush3.bf16.msra.mxu1 %v966_v17 }
  0x89   : > { %971 = vmatprep.subr.bf16.mxu0 %v970_v20  ;;  %987 = vmatprep.subr.bf16.mxu1 %v970_v20 }
  0x8c   : > { %973 = vmatpush3.bf16.msra.mxu0 %v970_v20  ;;  %995 = vmatpush3.bf16.msra.mxu1 %v970_v20 }
  0x8d   : > { %975 = vmatprep.subr.bf16.mxu0 %v974_v23  ;;  %988 = vmatprep.subr.bf16.mxu1 %v974_v23 }
  0x90   : > { %977 = vmatpush3.bf16.msra.mxu0 %v974_v23  ;;  %996 = vmatpush3.bf16.msra.mxu1 %v974_v23 }
  0x91   : > { %979 = vmatprep.subr.bf16.mxu0 %v978_v26  ;;  %989 = vmatprep.subr.bf16.mxu1 %v978_v26 }
  0x94   : > { %981 = vmatpush3.bf16.msra.mxu0 %v978_v26  ;;  %997 = vmatpush3.bf16.msra.mxu1 %v978_v26  ;;  %v857_v26 = vld [vmem:[%s1666_s30] ss:$0 sm:$0xff] (!%p856_p7) }
  0x97   : > { %927 = vmatmul.mubr.f32.vlgmr.msra.gmra.mrb[0].mxu0 %v358_v27  ;;  %939 = vmatmul.mubr.f32.vlgmr.msra.gmra.mrb[0].mxu1 %v366_v28 }
  0x98   : > { %929 = vmatprep.mubr.f32.mxu0 %v359_v29  ;;  %941 = vmatprep.mubr.f32.mxu1 %v367_v30 }
  0x9b   : > { %930 = vmatmul.mubr.f32.gmra.mrb[2].mxu0 %v360_v31  ;;  %942 = vmatmul.mubr.f32.gmra.mrb[2].mxu1 %v368_v32 }
  0x9c   : > { %932 = vmatprep.mubr.f32.mxu0 %v361_v33  ;;  %944 = vmatprep.mubr.f32.mxu1 %v369_v34 }
  0x9f   : > { %933 = vmatmul.mubr.f32.gmra.mrb[4].mxu0 %v362_v35  ;;  %945 = vmatmul.mubr.f32.gmra.mrb[4].mxu1 %v370_v36 }
  0xa0   : > { %935 = vmatprep.mubr.f32.mxu0 %v363_v37  ;;  %947 = vmatprep.mubr.f32.mxu1 %v371_v38 }
  0xa3   : > { %936 = vmatmul.mubr.f32.gmra.mrb[6].mxu0 %v364_v39  ;;  %948 = vmatmul.mubr.f32.gmra.mrb[6].mxu1 %v372_v40 }
 0x16a   : > { %v928_v45 = vpop.f32.mrb[0].mxu0  ;;  %v940_v46 = vpop.f32.mrb[0].mxu1 }
 0x16b   : > { %v535_v47 = vadd.f32 %v928_v45, %v342_v41  ;;  %v543_v48 = vadd.f32 %v940_v46, %v350_v42  ;;  %v455_v49 = vpop.f32.mrb[1].mxu0  ;;  %v495_v50 = vpop.f32.mrb[1].mxu1 }
 0x16c   : > { %v534_v51 = vadd.f32 %v455_v49, %v341_v43  ;;  %v542_v52 = vadd.f32 %v495_v50, %v349_v44 }
 0x16d   : > { %551 = vst [vmem:[#allocation2 + $0x8] sm:$0xff] %v535_v47  ;;  %559 = vst [vmem:[#allocation2 + $0x48] sm:$0xff] %v543_v48 }
 0x16e   : > { %550 = vst [vmem:[#allocation2] sm:$0xff] %v534_v51  ;;  %558 = vst [vmem:[#allocation2 + $0x40] sm:$0xff] %v542_v52  ;;  %v931_v57 = vpop.f32.mrb[2].mxu0  ;;  %v943_v58 = vpop.f32.mrb[2].mxu1 }
 0x16f   : > { %v537_v59 = vadd.f32 %v931_v57, %v344_v53  ;;  %v545_v60 = vadd.f32 %v943_v58, %v352_v54  ;;  %v465_v61 = vpop.f32.mrb[3].mxu0  ;;  %v505_v62 = vpop.f32.mrb[3].mxu1 }
 0x170   : > { %v536_v63 = vadd.f32 %v465_v61, %v343_v55  ;;  %v544_v0 = vadd.f32 %v505_v62, %v351_v56 }
 0x171   : > { %553 = vst [vmem:[#allocation2 + $0x18] sm:$0xff] %v537_v59  ;;  %561 = vst [vmem:[#allocation2 + $0x58] sm:$0xff] %v545_v60 }
 0x172   : > { %552 = vst [vmem:[#allocation2 + $0x10] sm:$0xff] %v536_v63  ;;  %560 = vst [vmem:[#allocation2 + $0x50] sm:$0xff] %v544_v0  ;;  %v934_v5 = vpop.f32.mrb[4].mxu0  ;;  %v946_v6 = vpop.f32.mrb[4].mxu1 }
 0x173   : > { %v539_v7 = vadd.f32 %v934_v5, %v346_v1  ;;  %v547_v8 = vadd.f32 %v946_v6, %v354_v2  ;;  %v475_v9 = vpop.f32.mrb[5].mxu0  ;;  %v515_v10 = vpop.f32.mrb[5].mxu1 }
 0x174   : > { %v538_v11 = vadd.f32 %v475_v9, %v345_v3  ;;  %v546_v12 = vadd.f32 %v515_v10, %v353_v4  ;;  %569 = sbr.rel (%p856_p7) target bundleno = 423 (0x1a7), region = 48  ;;  %v571_v27 = vld [vmem:[#allocation2 + $0x8] sm:$0xff] (!%p856_p7) }
 0x175   : > { %555 = vst [vmem:[#allocation2 + $0x28] sm:$0xff] %v539_v7  ;;  %563 = vst [vmem:[#allocation2 + $0x68] sm:$0xff] %v547_v8  ;;  %v570_v25 = vld [vmem:[#allocation2] sm:$0xff] (!%p856_p7)  ;;  %v594_v29 = vadd.f32 (!%p856_p7), %v857_v26, %v571_v27  ;;  %v579_v44 = vld [vmem:[#allocation2 + $0x48] sm:$0xff] (!%p856_p7) }
 0x176   : > { %554 = vst [vmem:[#allocation2 + $0x20] sm:$0xff] %v538_v11  ;;  %562 = vst [vmem:[#allocation2 + $0x60] sm:$0xff] %v546_v12  ;;  %v937_v17 = vpop.f32.mrb[6].mxu0  ;;  %v949_v18 = vpop.f32.mrb[6].mxu1  ;;  %v593_v28 = vadd.f32 (!%p856_p7), %v857_v26, %v570_v25  ;;  %v578_v43 = vld [vmem:[#allocation2 + $0x40] sm:$0xff] (!%p856_p7)  ;;  %v602_v55 = vadd.f32 (!%p856_p7), %v857_v26, %v579_v44 }
 0x177   : > { %v541_v19 = vadd.f32 %v937_v17, %v348_v13  ;;  %v549_v20 = vadd.f32 %v949_v18, %v356_v14  ;;  %v485_v21 = vpop.f32.mrb[7].mxu0  ;;  %v525_v22 = vpop.f32.mrb[7].mxu1  ;;  %610 = vst [vmem:[%s1538_s8 + $0x8] sm:$0xff] (!%p856_p7), %v594_v29  ;;  %v648_v41 = vmul.f32 (!%p856_p7), %v594_v29, %v594_v29  ;;  %v601_v54 = vadd.f32 (!%p856_p7), %v857_v26, %v578_v43 }
 0x178   : > { %v540_v23 = vadd.f32 %v485_v21, %v347_v15  ;;  %v548_v24 = vadd.f32 %v525_v22, %v355_v16  ;;  %v573_v31 = vld [vmem:[#allocation2 + $0x18] sm:$0xff] (!%p856_p7)  ;;  %609 = vst [vmem:[%s1538_s8] sm:$0xff] (!%p856_p7), %v593_v28  ;;  %v647_v39 = vmul.f32 (!%p856_p7), %v593_v28, %v593_v28  ;;  %v625_v40 = vadd.f32 (!%p856_p7), %v594_v29, %v593_v28 }
 0x179   : > { %557 = vst [vmem:[#allocation2 + $0x38] sm:$0xff] %v541_v19  ;;  %565 = vst [vmem:[#allocation2 + $0x78] sm:$0xff] %v549_v20  ;;  %v572_v30 = vld [vmem:[#allocation2 + $0x10] sm:$0xff] (!%p856_p7)  ;;  %v596_v34 = vadd.f32 (!%p856_p7), %v857_v26, %v573_v31  ;;  %v581_v48 = vld [vmem:[#allocation2 + $0x58] sm:$0xff] (!%p856_p7)  ;;  %v655_v15 = vmul.f32 (!%p856_p7), %v601_v54, %v601_v54  ;;  %v656_v18 = vmul.f32 (!%p856_p7), %v602_v55, %v602_v55 }
 0x17a   : > { %556 = vst [vmem:[#allocation2 + $0x30] sm:$0xff] %v540_v23  ;;  %564 = vst [vmem:[#allocation2 + $0x70] sm:$0xff] %v548_v24  ;;  %v595_v33 = vadd.f32 (!%p856_p7), %v857_v26, %v572_v30  ;;  %v580_v45 = vld [vmem:[#allocation2 + $0x50] sm:$0xff] (!%p856_p7)  ;;  %v663_v49 = vadd.f32 (!%p856_p7), %v648_v41, %v647_v39  ;;  %v604_v61 = vadd.f32 (!%p856_p7), %v857_v26, %v581_v48 }
 0x17b   : > { %612 = vst [vmem:[%s1538_s8 + $0x18] sm:$0xff] %v596_v34  ;;  %v650_v51 = vmul.f32 %v596_v34, %v596_v34  ;;  %v603_v56 = vadd.f32 %v857_v26, %v580_v45  ;;  %617 = vst [vmem:[%s1538_s8 + $0x40] sm:$0xff] %v601_v54 }
 0x17c   : > { %v575_v36 = vld [vmem:[#allocation2 + $0x28] sm:$0xff]  ;;  %611 = vst [vmem:[%s1538_s8 + $0x10] sm:$0xff] %v595_v33  ;;  %v649_v46 = vmul.f32 %v595_v33, %v595_v33  ;;  %v626_v50 = vadd.f32 %v625_v40, %v595_v33  ;;  %618 = vst [vmem:[%s1538_s8 + $0x48] sm:$0xff] %v602_v55  ;;  %v658_v24 = vmul.f32 %v604_v61, %v604_v61 }
 0x17d   : > { %v574_v32 = vld [vmem:[#allocation2 + $0x20] sm:$0xff]  ;;  %v598_v42 = vadd.f32 %v857_v26, %v575_v36  ;;  %v583_v57 = vld [vmem:[#allocation2 + $0x68] sm:$0xff]  ;;  %619 = vst [vmem:[%s1538_s8 + $0x50] sm:$0xff] %v603_v56  ;;  %620 = vst [vmem:[%s1538_s8 + $0x58] sm:$0xff] %v604_v61  ;;  %v657_v21 = vmul.f32 %v603_v56, %v603_v56 }
 0x17e   : > { %v597_v35 = vadd.f32 %v857_v26, %v574_v32  ;;  %v582_v53 = vld [vmem:[#allocation2 + $0x60] sm:$0xff]  ;;  %v664_v58 = vadd.f32 %v663_v49, %v649_v46  ;;  %v627_v59 = vadd.f32 %v626_v50, %v596_v34  ;;  %v606_v4 = vadd.f32 %v857_v26, %v583_v57 }
 0x17f   : > { %614 = vst [vmem:[%s1538_s8 + $0x28] sm:$0xff] %v598_v42  ;;  %v605_v0 = vadd.f32 %v857_v26, %v582_v53  ;;  %v652_v3 = vmul.f32 %v598_v42, %v598_v42 }
 0x180   : > { %v577_v38 = vld [vmem:[#allocation2 + $0x38] sm:$0xff]  ;;  %613 = vst [vmem:[%s1538_s8 + $0x20] sm:$0xff] %v597_v35  ;;  %v651_v60 = vmul.f32 %v597_v35, %v597_v35  ;;  %v665_v1 = vadd.f32 %v664_v58, %v650_v51  ;;  %v628_v2 = vadd.f32 %v627_v59, %v597_v35  ;;  %622 = vst [vmem:[%s1538_s8 + $0x68] sm:$0xff] %v606_v4 }
 0x181   : > { %v576_v37 = vld [vmem:[#allocation2 + $0x30] sm:$0xff]  ;;  %v600_v52 = vadd.f32 %v857_v26, %v577_v38  ;;  %v585_v63 = vld [vmem:[#allocation2 + $0x78] sm:$0xff]  ;;  %621 = vst [vmem:[%s1538_s8 + $0x60] sm:$0xff] %v605_v0  ;;  %v659_v27 = vmul.f32 %v605_v0, %v605_v0  ;;  %v660_v30 = vmul.f32 %v606_v4, %v606_v4 }
 0x182   : > { %v599_v47 = vadd.f32 %v857_v26, %v576_v37  ;;  %v584_v62 = vld [vmem:[#allocation2 + $0x70] sm:$0xff]  ;;  %v608_v6 = vadd.f32 %v857_v26, %v585_v63  ;;  %v666_v7 = vadd.f32 %v665_v1, %v651_v60  ;;  %v629_v8 = vadd.f32 %v628_v2, %v598_v42 }
 0x183   : > { %616 = vst [vmem:[%s1538_s8 + $0x38] sm:$0xff] %v600_v52  ;;  %v607_v5 = vadd.f32 %v857_v26, %v584_v62  ;;  %v654_v12 = vmul.f32 %v600_v52, %v600_v52 }
 0x184   : > { %615 = vst [vmem:[%s1538_s8 + $0x30] sm:$0xff] %v599_v47  ;;  %v653_v9 = vmul.f32 %v599_v47, %v599_v47  ;;  %624 = vst [vmem:[%s1538_s8 + $0x78] sm:$0xff] %v608_v6  ;;  %v667_v10 = vadd.f32 %v666_v7, %v652_v3  ;;  %v630_v11 = vadd.f32 %v629_v8, %v599_v47 }
 0x185   : > { %623 = vst [vmem:[%s1538_s8 + $0x70] sm:$0xff] %v607_v5  ;;  %v661_v33 = vmul.f32 %v607_v5, %v607_v5  ;;  %v662_v35 = vmul.f32 %v608_v6, %v608_v6 }
 0x186   : > { %v668_v13 = vadd.f32 %v667_v10, %v653_v9  ;;  %v631_v14 = vadd.f32 %v630_v11, %v600_v52 }
 0x188   : > { %v669_v16 = vadd.f32 %v668_v13, %v654_v12  ;;  %v632_v17 = vadd.f32 %v631_v14, %v601_v54 }
 0x18a   : > { %v670_v19 = vadd.f32 %v669_v16, %v655_v15  ;;  %v633_v20 = vadd.f32 %v632_v17, %v602_v55 }
 0x18c   : > { %v671_v22 = vadd.f32 %v670_v19, %v656_v18  ;;  %v634_v23 = vadd.f32 %v633_v20, %v603_v56 }
 0x18e   : > { %v672_v25 = vadd.f32 %v671_v22, %v657_v21  ;;  %v635_v26 = vadd.f32 %v634_v23, %v604_v61 }
 0x190   : > { %v673_v28 = vadd.f32 %v672_v25, %v658_v24  ;;  %v636_v29 = vadd.f32 %v635_v26, %v605_v0 }
 0x192   : > { %v674_v31 = vadd.f32 %v673_v28, %v659_v27  ;;  %v637_v32 = vadd.f32 %v636_v29, %v606_v4 }
 0x194   : > { %v638_v34 = vadd.f32 %v637_v32, %v607_v5  ;;  %v675_v36 = vadd.f32 %v674_v31, %v660_v30 }
 0x196   : > { %v639_v37 = vadd.f32 %v638_v34, %v608_v6  ;;  %v676_v38 = vadd.f32 %v675_v36, %v661_v33 }
 0x198   : > { %v640_v39 = vrot.slane %v639_v37, 4  ;;  %v677_v40 = vadd.f32 %v676_v38, %v662_v35 }
 0x19a   : > { %v641_v41 = vadd.f32 %v640_v39, %v639_v37  ;;  %v678_v42 = vrot.slane %v677_v40, 4 }
 0x19c   : > { %v642_v43 = vrot.slane %v641_v41, 2  ;;  %v679_v44 = vadd.f32 %v678_v42, %v677_v40 }
 0x19e   : > { %v643_v45 = vadd.f32 %v642_v43, %v641_v41  ;;  %v680_v46 = vrot.slane %v679_v44, 2 }
 0x1a0   : > { %v644_v47 = vrot.slane %v643_v45, 1  ;;  %v681_v48 = vadd.f32 %v680_v46, %v679_v44 }
 0x1a2   : > { %v645_v49 = vadd.f32 %v644_v47, %v643_v45  ;;  %v682_v50 = vrot.slane %v681_v48, 1 }
 0x1a4   : > { %646 = vst [vmem:[%s317_s21] sm:$0x1] %v645_v49  ;;  %v683_v51 = vadd.f32 %v682_v50, %v681_v48 }
 0x1a6   : > { %684 = vst [vmem:[%s320_s6] sm:$0x1] %v683_v51 }
 0x1a7 PF: > { %s22_s28 = sadd.s32 1, %s1256_s28   ;;  %s1667_s13 = sld [smem:[#allocation10_spill]] }
 0x1a8   : > { %p19_p11 = scmp.ge.s32.totalorder %s22_s28, 6   ;;  %s1668_s7 = sld [smem:[#allocation11_spill]] }
 0x1a9   : > { %s1669_s18 = smov %s1220_s19  ;;  %s1670_s19 = smov %s1224_s20 }
 0x1aa   : > { %s1671_s20 = smov %s1443_s9  ;;  %s1672_s21 = smov %s1232_s22 }
 0x1ab   : > { %s1673_s22 = smov %s1236_s23  ;;  %s1674_s23 = smov %s1380_s16 }
 0x1ac   : > { %s1675_s24 = smov %s1248_s26  ;;  %s1676_s25 = smov %s1252_s27 }
 0x1ad   : > { %s1677_s26 = smov %s1667_s13  ;;  %21 = sbr.rel (!%p19_p11) target bundleno = 11 (0xb), region = 117 }
 0x1ae   : > { %s1678_s27 = smov %s1668_s7 }
 0x1b4   :  { %731 = vsyncpa [#allocation4], 1 }
 0x1b5   :  { %733 = vsyncpa [#allocation4 + $0x1], 1 }
 0x1b6   :  { %734 = vsyncpa [#allocation6], 1 }
 0x1b7   :  { %736 = vsyncpa [#allocation6 + $0x1], 1 }

// kernel: bayes_head_forward.20
= control target key start
LH: loop header
LB: loop body
LE: loop exit
PB: predicated region body
PF: predicated region fallthrough
CT: control target
= control target key end

     0   :  { %s1013_s18 = smov 0   ;;  %s1015_s19 = smov 0   ;;  %s1163_s0 = inlined_call_operand.vmem [shape: f32[256,128], index: 0, kind: input, shape index: {}]   ;;  %s1164_s1 = inlined_call_operand.vmem [shape: f32[128,128], index: 1, kind: input, shape index: {}]   ;;  %s1165_s2 = inlined_call_operand.vmem [shape: f32[1,128], index: 2, kind: input, shape index: {}]   ;;  %s1166_s3 = inlined_call_operand.vmem [shape: f32[256,128], index: 3, kind: output, shape index: {0}]   ;;  %s1167_s4 = inlined_call_operand.vmem [shape: f32[2,1,128], index: 4, kind: output, shape index: {1}]   ;;  %s1168_s5 = inlined_call_operand.vmem [shape: f32[2,1,128], index: 5, kind: output, shape index: {2}]  }
   0x1   :  { %s1017_s20 = smov 0  }
   0x2 LB: > { %s28_s21 = sadd.s32 1, %s977_s19  ;;  %p791_p0 = scmp.ge.s32.totalorder %s981_s20, 1  ;;  %s981_s20 = sphi %s1017_s20, %s16_s20   ;;  %s977_s19 = sphi %s1015_s19, %s1170_s19   ;;  %s973_s18 = sphi %s1013_s18, %s1169_s18  }
   0x3   : > { %p30_p1 = scmp.ge.s32.totalorder %s28_s21, 2  ;;  %p221_p2 = scmp.lt.s32.totalorder %s981_s20, 3 }
   0x5   : > { %s1172_s21 = smov (%p30_p1, %s28_s21), 0  ;;  %p222_p3 = pnand %p791_p0, %p221_p2 }
   0x6   : > { %v342_v0 = vld [vmem:[%s1164_s1] sm:$0xff] (!%p222_p3)  ;;  %v343_v1 = vld [vmem:[%s1164_s1 + $0x8] sm:$0xff] (!%p222_p3)  ;;  %v344_v2 = vld [vmem:[%s1164_s1 + $0x10] sm:$0xff] (!%p222_p3)  ;;  %s792_s28 = sshll.u32 (!%p222_p3), %s973_s18, 4  ;;  %p284_p5 = scmp.lt.s32.totalorder (!%p222_p3), %s973_s18, 1 }
   0x7   : > { %225 = sbr.rel (%p222_p3) target bundleno = 303 (0x12f), region = 32  ;;  %v887_v3 = vpack.c.bf16 (!%p222_p3), %v343_v1, %v342_v0  ;;  %v345_v4 = vld [vmem:[%s1164_s1 + $0x18] sm:$0xff] (!%p222_p3)  ;;  %p264_p4 = scmp.lt.s32.totalorder (!%p222_p3), %s792_s28, 31  ;;  %v346_v6 = vld [vmem:[%s1164_s1 + $0x20] sm:$0xff] (!%p222_p3)  ;;  %v347_v7 = vld [vmem:[%s1164_s1 + $0x28] sm:$0xff] (!%p222_p3) }
   0x8   : > { %v891_v5 = vpack.c.bf16 (!%p222_p3), %v345_v4, %v344_v2  ;;  %v895_v8 = vpack.c.bf16 (!%p222_p3), %v347_v7, %v346_v6  ;;  %v348_v9 = vld [vmem:[%s1164_s1 + $0x30] sm:$0xff] (!%p222_p3)  ;;  %v349_v10 = vld [vmem:[%s1164_s1 + $0x38] sm:$0xff] (!%p222_p3)  ;;  %v350_v14 = vld [vmem:[%s1164_s1 + $0x40] sm:$0xff] (!%p222_p3) }
   0x9   : > { %888 = vmatprep.subr.bf16.mxu0 (!%p222_p3), %v887_v3  ;;  %919 = vmatprep.subr.bf16.mxu1 (!%p222_p3), %v887_v3  ;;  %v899_v12 = vpack.c.bf16 (!%p222_p3), %v349_v10, %v348_v9  ;;  %v351_v15 = vld [vmem:[%s1164_s1 + $0x48] sm:$0xff] (!%p222_p3)  ;;  %v352_v17 = vld [vmem:[%s1164_s1 + $0x50] sm:$0xff] (!%p222_p3)  ;;  %v353_v18 = vld [vmem:[%s1164_s1 + $0x58] sm:$0xff] (!%p222_p3) }
   0xa   : > { %890 = vmatpush3.bf16.msra.mxu0 (!%p222_p3), %v887_v3  ;;  %927 = vmatpush3.bf16.msra.mxu1 (!%p222_p3), %v887_v3  ;;  %v903_v16 = vpack.c.bf16 (!%p222_p3), %v351_v15, %v350_v14  ;;  %v907_v19 = vpack.c.bf16 (!%p222_p3), %v353_v18, %v352_v17  ;;  %v354_v20 = vld [vmem:[%s1164_s1 + $0x60] sm:$0xff] (!%p222_p3)  ;;  %v355_v21 = vld [vmem:[%s1164_s1 + $0x68] sm:$0xff] (!%p222_p3)  ;;  %v356_v23 = vld [vmem:[%s1164_s1 + $0x70] sm:$0xff] (!%p222_p3) }
   0xb   : > { %892 = vmatprep.subr.bf16.mxu0 (!%p222_p3), %v891_v5  ;;  %920 = vmatprep.subr.bf16.mxu1 (!%p222_p3), %v891_v5  ;;  %v911_v22 = vpack.c.bf16 (!%p222_p3), %v355_v21, %v354_v20  ;;  %v357_v24 = vld [vmem:[%s1164_s1 + $0x78] sm:$0xff] (!%p222_p3)  ;;  %v796_v40 = vld [vmem:[%s1165_s2] ss:$0 sm:$0xff] (!%p222_p3) }
   0xc   : > { %v915_v25 = vpack.c.bf16 (!%p222_p3), %v357_v24, %v356_v23 }
   0xe   : > { %s1174_s28 = smov (!%p264_p4, %s792_s28), 31  ;;  %894 = vmatpush3.bf16.msra.mxu0 %v891_v5  ;;  %928 = vmatpush3.bf16.msra.mxu1 %v891_v5  ;;  %s1176_s18 = smov (!%p284_p5, %s973_s18), 1 }
   0xf   : > { %s793_s10 = sshll.u32 %s1174_s28, 3  ;;  %896 = vmatprep.subr.bf16.mxu0 %v895_v8  ;;  %921 = vmatprep.subr.bf16.mxu1 %v895_v8  ;;  %s289_s27 = scalar_lea.vmem %s1168_s5, %s1176_s18 }
  0x10   : > { %s1066_s17 = scalar_lea.vmem %s1163_s0, %s793_s10  ;;  %s1116_s24 = scalar_lea.vmem %s1166_s3, %s793_s10 }
  0x11   : > { %v326_v11 = vld [vmem:[%s1066_s17] sm:$0xff]  ;;  %v327_v26 = vld [vmem:[%s1066_s17 + $0x8] sm:$0xff]  ;;  %v328_v28 = vld [vmem:[%s1066_s17 + $0x10] sm:$0xff] }
  0x12   : > { %v334_v13 = vld [vmem:[%s1066_s17 + $0x40] sm:$0xff]  ;;  %863 = vmatprep.mubr.f32.mxu0 %v326_v11  ;;  %898 = vmatpush3.bf16.msra.mxu0 %v895_v8  ;;  %v335_v27 = vld [vmem:[%s1066_s17 + $0x48] sm:$0xff]  ;;  %v336_v29 = vld [vmem:[%s1066_s17 + $0x50] sm:$0xff] }
  0x13   : > { %875 = vmatprep.mubr.f32.mxu1 %v334_v13  ;;  %929 = vmatpush3.bf16.msra.mxu1 %v895_v8  ;;  %v329_v30 = vld [vmem:[%s1066_s17 + $0x18] sm:$0xff]  ;;  %v330_v32 = vld [vmem:[%s1066_s17 + $0x20] sm:$0xff]  ;;  %v331_v34 = vld [vmem:[%s1066_s17 + $0x28] sm:$0xff] }
  0x14   : > { %900 = vmatprep.subr.bf16.mxu0 %v899_v12  ;;  %922 = vmatprep.subr.bf16.mxu1 %v899_v12  ;;  %v337_v31 = vld [vmem:[%s1066_s17 + $0x58] sm:$0xff]  ;;  %v338_v33 = vld [vmem:[%s1066_s17 + $0x60] sm:$0xff]  ;;  %v339_v35 = vld [vmem:[%s1066_s17 + $0x68] sm:$0xff] }
  0x15   : > { %v332_v36 = vld [vmem:[%s1066_s17 + $0x30] sm:$0xff]  ;;  %v333_v38 = vld [vmem:[%s1066_s17 + $0x38] sm:$0xff] }
  0x16   : > { %902 = vmatpush3.bf16.msra.mxu0 %v899_v12  ;;  %v340_v37 = vld [vmem:[%s1066_s17 + $0x70] sm:$0xff]  ;;  %v341_v39 = vld [vmem:[%s1066_s17 + $0x78] sm:$0xff]  ;;  %s286_s17 = scalar_lea.vmem %s1167_s4, %s1176_s18 }
  0x17   : > { %930 = vmatpush3.bf16.msra.mxu1 %v899_v12  ;;  %904 = vmatprep.subr.bf16.mxu0 %v903_v16 }
  0x18   : > { %923 = vmatprep.subr.bf16.mxu1 %v903_v16 }
  0x1a   : > { %906 = vmatpush3.bf16.msra.mxu0 %v903_v16 }
  0x1b   : > { %931 = vmatpush3.bf16.msra.mxu1 %v903_v16  ;;  %908 = vmatprep.subr.bf16.mxu0 %v907_v19 }
  0x1c   : > { %924 = vmatprep.subr.bf16.mxu1 %v907_v19 }
  0x1e   : > { %910 = vmatpush3.bf16.msra.mxu0 %v907_v19 }
  0x1f   : > { %932 = vmatpush3.bf16.msra.mxu1 %v907_v19  ;;  %912 = vmatprep.subr.bf16.mxu0 %v911_v22 }
  0x20   : > { %925 = vmatprep.subr.bf16.mxu1 %v911_v22 }
  0x22   : > { %914 = vmatpush3.bf16.msra.mxu0 %v911_v22 }
  0x23   : > { %933 = vmatpush3.bf16.msra.mxu1 %v911_v22  ;;  %916 = vmatprep.subr.bf16.mxu0 %v915_v25 }
  0x24   : > { %926 = vmatprep.subr.bf16.mxu1 %v915_v25 }
  0x26   : > { %918 = vmatpush3.bf16.msra.mxu0 %v915_v25 }
  0x27   : > { %934 = vmatpush3.bf16.msra.mxu1 %v915_v25 }
  0x29   : > { %864 = vmatmul.mubr.f32.vlgmr.msra.gmra.mrb[0].mxu0 %v327_v26 }
  0x2a   : > { %876 = vmatmul.mubr.f32.vlgmr.msra.gmra.mrb[0].mxu1 %v335_v27  ;;  %866 = vmatprep.mubr.f32.mxu0 %v328_v28 }
  0x2b   : > { %878 = vmatprep.mubr.f32.mxu1 %v336_v29 }
  0x2d   : > { %867 = vmatmul.mubr.f32.gmra.mrb[2].mxu0 %v329_v30 }
  0x2e   : > { %879 = vmatmul.mubr.f32.gmra.mrb[2].mxu1 %v337_v31  ;;  %869 = vmatprep.mubr.f32.mxu0 %v330_v32 }
  0x2f   : > { %881 = vmatprep.mubr.f32.mxu1 %v338_v33 }
  0x31   : > { %870 = vmatmul.mubr.f32.gmra.mrb[4].mxu0 %v331_v34 }
  0x32   : > { %882 = vmatmul.mubr.f32.gmra.mrb[4].mxu1 %v339_v35  ;;  %872 = vmatprep.mubr.f32.mxu0 %v332_v36 }
  0x33   : > { %884 = vmatprep.mubr.f32.mxu1 %v340_v37 }
  0x35   : > { %873 = vmatmul.mubr.f32.gmra.mrb[6].mxu0 %v333_v38 }
  0x36   : > { %885 = vmatmul.mubr.f32.gmra.mrb[6].mxu1 %v341_v39 }
  0xfc   : > { %v865_v41 = vpop.f32.mrb[0].mxu0 }
  0xfd   : > { %v877_v42 = vpop.f32.mrb[0].mxu1  ;;  %v562_v43 = vadd.f32 %v865_v41, %v796_v40  ;;  %v424_v44 = vpop.f32.mrb[1].mxu0 }
  0xfe   : > { %v1118_v45 = vadd.f32 %v877_v42, %v796_v40  ;;  %v464_v46 = vpop.f32.mrb[1].mxu1  ;;  %v561_v47 = vadd.f32 %v796_v40, %v424_v44 }
  0xff   : > { %v1120_v48 = vadd.f32 %v796_v40, %v464_v46  ;;  %578 = vst [vmem:[%s1116_s24 + $0x8] sm:$0xff] %v562_v43  ;;  %v616_v49 = vmul.f32 %v562_v43, %v562_v43 }
 0x100   : > { %586 = vst [vmem:[%s1116_s24 + $0x48] sm:$0xff] %v1118_v45  ;;  %577 = vst [vmem:[%s1116_s24] sm:$0xff] %v561_v47  ;;  %v593_v50 = vadd.f32 %v562_v43, %v561_v47  ;;  %v615_v51 = vmul.f32 %v561_v47, %v561_v47  ;;  %v868_v52 = vpop.f32.mrb[2].mxu0  ;;  %v624_v33 = vmul.f32 %v1118_v45, %v1118_v45 }
 0x101   : > { %585 = vst [vmem:[%s1116_s24 + $0x40] sm:$0xff] %v1120_v48  ;;  %v880_v53 = vpop.f32.mrb[2].mxu1  ;;  %v564_v54 = vadd.f32 %v868_v52, %v796_v40  ;;  %v434_v55 = vpop.f32.mrb[3].mxu0  ;;  %v623_v30 = vmul.f32 %v1120_v48, %v1120_v48 }
 0x102   : > { %v572_v56 = vadd.f32 %v880_v53, %v796_v40  ;;  %v474_v57 = vpop.f32.mrb[3].mxu1  ;;  %v631_v58 = vadd.f32 %v616_v49, %v615_v51  ;;  %v563_v59 = vadd.f32 %v796_v40, %v434_v55 }
 0x103   : > { %v571_v60 = vadd.f32 %v796_v40, %v474_v57  ;;  %580 = vst [vmem:[%s1116_s24 + $0x18] sm:$0xff] %v564_v54  ;;  %v618_v1 = vmul.f32 %v564_v54, %v564_v54 }
 0x104   : > { %588 = vst [vmem:[%s1116_s24 + $0x58] sm:$0xff] %v572_v56  ;;  %579 = vst [vmem:[%s1116_s24 + $0x10] sm:$0xff] %v563_v59  ;;  %v594_v61 = vadd.f32 %v593_v50, %v563_v59  ;;  %v617_v62 = vmul.f32 %v563_v59, %v563_v59  ;;  %v871_v63 = vpop.f32.mrb[4].mxu0  ;;  %v626_v39 = vmul.f32 %v572_v56, %v572_v56 }
 0x105   : > { %587 = vst [vmem:[%s1116_s24 + $0x50] sm:$0xff] %v571_v60  ;;  %v883_v0 = vpop.f32.mrb[4].mxu1  ;;  %v566_v2 = vadd.f32 %v871_v63, %v796_v40  ;;  %v444_v3 = vpop.f32.mrb[5].mxu0  ;;  %v625_v36 = vmul.f32 %v571_v60, %v571_v60 }
 0x106   : > { %v574_v4 = vadd.f32 %v883_v0, %v796_v40  ;;  %v484_v5 = vpop.f32.mrb[5].mxu1  ;;  %v632_v6 = vadd.f32 %v631_v58, %v617_v62  ;;  %v565_v7 = vadd.f32 %v796_v40, %v444_v3  ;;  %v595_v8 = vadd.f32 %v594_v61, %v564_v54 }
 0x107   : > { %v573_v9 = vadd.f32 %v796_v40, %v484_v5  ;;  %582 = vst [vmem:[%s1116_s24 + $0x28] sm:$0xff] %v566_v2  ;;  %v620_v15 = vmul.f32 %v566_v2, %v566_v2 }
 0x108   : > { %590 = vst [vmem:[%s1116_s24 + $0x68] sm:$0xff] %v574_v4  ;;  %581 = vst [vmem:[%s1116_s24 + $0x20] sm:$0xff] %v565_v7  ;;  %v596_v10 = vadd.f32 %v595_v8, %v565_v7  ;;  %v619_v11 = vmul.f32 %v565_v7, %v565_v7  ;;  %v633_v12 = vadd.f32 %v632_v6, %v618_v1  ;;  %v874_v13 = vpop.f32.mrb[6].mxu0 }
 0x109   : > { %589 = vst [vmem:[%s1116_s24 + $0x60] sm:$0xff] %v573_v9  ;;  %v886_v14 = vpop.f32.mrb[6].mxu1  ;;  %v568_v16 = vadd.f32 %v874_v13, %v796_v40  ;;  %v454_v17 = vpop.f32.mrb[7].mxu0  ;;  %v627_v42 = vmul.f32 %v573_v9, %v573_v9  ;;  %v628_v46 = vmul.f32 %v574_v4, %v574_v4 }
 0x10a   : > { %v576_v18 = vadd.f32 %v886_v14, %v796_v40  ;;  %v494_v19 = vpop.f32.mrb[7].mxu1  ;;  %v634_v20 = vadd.f32 %v633_v12, %v619_v11  ;;  %v567_v21 = vadd.f32 %v796_v40, %v454_v17  ;;  %v597_v22 = vadd.f32 %v596_v10, %v566_v2 }
 0x10b   : > { %v575_v23 = vadd.f32 %v796_v40, %v494_v19  ;;  %584 = vst [vmem:[%s1116_s24 + $0x38] sm:$0xff] %v568_v16  ;;  %v622_v27 = vmul.f32 %v568_v16, %v568_v16 }
 0x10c   : > { %592 = vst [vmem:[%s1116_s24 + $0x78] sm:$0xff] %v576_v18  ;;  %583 = vst [vmem:[%s1116_s24 + $0x30] sm:$0xff] %v567_v21  ;;  %v598_v24 = vadd.f32 %v597_v22, %v567_v21  ;;  %v621_v25 = vmul.f32 %v567_v21, %v567_v21  ;;  %v635_v26 = vadd.f32 %v634_v20, %v620_v15 }
 0x10d   : > { %591 = vst [vmem:[%s1116_s24 + $0x70] sm:$0xff] %v575_v23  ;;  %v629_v49 = vmul.f32 %v575_v23, %v575_v23  ;;  %v630_v52 = vmul.f32 %v576_v18, %v576_v18 }
 0x10e   : > { %v636_v28 = vadd.f32 %v635_v26, %v621_v25  ;;  %v599_v29 = vadd.f32 %v598_v24, %v568_v16 }
 0x110   : > { %v600_v31 = vadd.f32 %v599_v29, %v1120_v48  ;;  %v637_v32 = vadd.f32 %v636_v28, %v622_v27 }
 0x112   : > { %v638_v34 = vadd.f32 %v637_v32, %v623_v30  ;;  %v601_v35 = vadd.f32 %v600_v31, %v1118_v45 }
 0x114   : > { %v602_v37 = vadd.f32 %v601_v35, %v571_v60  ;;  %v639_v38 = vadd.f32 %v638_v34, %v624_v33 }
 0x116   : > { %v640_v40 = vadd.f32 %v639_v38, %v625_v36  ;;  %v603_v41 = vadd.f32 %v602_v37, %v572_v56 }
 0x118   : > { %v604_v43 = vadd.f32 %v603_v41, %v573_v9  ;;  %v641_v44 = vadd.f32 %v640_v40, %v626_v39 }
 0x11a   : > { %v642_v47 = vadd.f32 %v641_v44, %v627_v42  ;;  %v605_v48 = vadd.f32 %v604_v43, %v574_v4 }
 0x11c   : > { %v606_v50 = vadd.f32 %v605_v48, %v575_v23  ;;  %v643_v51 = vadd.f32 %v642_v47, %v628_v46 }
 0x11e   : > { %v607_v53 = vadd.f32 %v606_v50, %v576_v18  ;;  %v644_v45 = vadd.f32 %v643_v51, %v629_v49 }
 0x120   : > { %v608_v54 = vrot.slane %v607_v53, 4  ;;  %v645_v55 = vadd.f32 %v644_v45, %v630_v52 }
 0x122   : > { %v609_v57 = vadd.f32 %v608_v54, %v607_v53  ;;  %v646_v58 = vrot.slane %v645_v55, 4 }
 0x124   : > { %v610_v59 = vrot.slane %v609_v57, 2  ;;  %v647_v56 = vadd.f32 %v646_v58, %v645_v55 }
 0x126   : > { %v611_v60 = vadd.f32 %v610_v59, %v609_v57  ;;  %v648_v61 = vrot.slane %v647_v56, 2 }
 0x128   : > { %v612_v62 = vrot.slane %v611_v60, 1  ;;  %v649_v63 = vadd.f32 %v648_v61, %v647_v56 }
 0x12a   : > { %v613_v0 = vadd.f32 %v612_v62, %v611_v60  ;;  %v650_v1 = vrot.slane %v649_v63, 1 }
 0x12c   : > { %614 = vst [vmem:[%s286_s17] sm:$0x1] %v613_v0  ;;  %v651_v2 = vadd.f32 %v650_v1, %v649_v63 }
 0x12e   : > { %652 = vst [vmem:[%s289_s27] sm:$0x1] %v651_v2 }
 0x12f PF: > { %s16_s20 = sadd.s32 1, %s981_s20   ;;  %s1169_s18 = smov %s977_s19 }
 0x130   : > { %p13_p6 = scmp.ge.s32.totalorder %s16_s20, 4   ;;  %s1170_s19 = smov %s1172_s21 }
 0x132   :  { %15 = sbr.rel (!%p13_p6) target bundleno = 2 (0x2), region = 97 }

// kernel: bayes_head_forward.22
= control target key start
LH: loop header
LB: loop body
LE: loop exit
PB: predicated region body
PF: predicated region fallthrough
CT: control target
= control target key end

     0   :  { %s1202_s18 = smov 0   ;;  %s1204_s19 = smov 0   ;;  %s1544_s0 = inlined_call_operand.vmem [shape: f32[256,128], index: 0, kind: input, shape index: {}]   ;;  %s1545_s1 = inlined_call_operand.vmem [shape: f32[128,256], index: 1, kind: input, shape index: {}]   ;;  %s1546_s2 = inlined_call_operand.vmem [shape: f32[1,256], index: 2, kind: input, shape index: {}]   ;;  %s1547_s3 = inlined_call_operand.vmem [shape: f32[256,256], index: 3, kind: output, shape index: {0}]   ;;  %s1548_s4 = inlined_call_operand.vmem [shape: f32[2,1,256], index: 4, kind: output, shape index: {1}]   ;;  %s1549_s5 = inlined_call_operand.vmem [shape: f32[2,1,256], index: 5, kind: output, shape index: {2}]  }
   0x1   :  { %s1206_s20 = smov 0  }
   0x2 LB: > { %s28_s21 = sadd.s32 1, %s1164_s19  ;;  %p1061_p0 = scmp.ge.s32.totalorder %s1168_s20, 1  ;;  %s1168_s20 = sphi %s1206_s20, %s16_s20   ;;  %s1164_s19 = sphi %s1204_s19, %s1551_s19   ;;  %s1160_s18 = sphi %s1202_s18, %s1550_s18  }
   0x3   : > { %p30_p1 = scmp.ge.s32.totalorder %s28_s21, 2  ;;  %p222_p2 = scmp.lt.s32.totalorder %s1168_s20, 3 }
   0x5   : > { %s1553_s21 = smov (%p30_p1, %s28_s21), 0  ;;  %p223_p3 = pnand %p1061_p0, %p222_p2 }
   0x6   : > { %v384_v0 = vld [vmem:[%s1545_s1 + $0x8] sm:$0xff] (!%p223_p3)  ;;  %v386_v1 = vld [vmem:[%s1545_s1 + $0x18] sm:$0xff] (!%p223_p3)  ;;  %v383_v2 = vld [vmem:[%s1545_s1] sm:$0xff] (!%p223_p3)  ;;  %v1170_v7 = vmov (!%p223_p3), 0.0   ;;  %s1062_s24 = sshll.u32 (!%p223_p3), %s1160_s18, 4  ;;  %p291_p5 = scmp.lt.s32.totalorder (!%p223_p3), %s1160_s18, 1 }
   0x7   : > { %226 = sbr.rel (%p223_p3) target bundleno = 323 (0x143), region = 32  ;;  %v1072_v3 = vpack.c.bf16 (!%p223_p3), %v386_v1, %v384_v0  ;;  %v385_v4 = vld [vmem:[%s1545_s1 + $0x10] sm:$0xff] (!%p223_p3)  ;;  %v388_v5 = vld [vmem:[%s1545_s1 + $0x28] sm:$0xff] (!%p223_p3)  ;;  %v390_v6 = vld [vmem:[%s1545_s1 + $0x38] sm:$0xff] (!%p223_p3)  ;;  %479 = vmatprep.mubr.f32.mxu0 (!%p223_p3), %v1170_v7  ;;  %527 = vmatprep.mubr.f32.mxu1 (!%p223_p3), %v1170_v7  ;;  %p269_p4 = scmp.lt.s32.totalorder (!%p223_p3), %s1062_s24, 31  ;;  %v677_v1 = vlaneseq (!%p223_p3) }
   0x8   : > { %v1074_v8 = vpack.c.bf16 (!%p223_p3), %v385_v4, %v383_v2  ;;  %v1076_v9 = vpack.c.bf16 (!%p223_p3), %v390_v6, %v388_v5  ;;  %v387_v10 = vld [vmem:[%s1545_s1 + $0x20] sm:$0xff] (!%p223_p3)  ;;  %v389_v11 = vld [vmem:[%s1545_s1 + $0x30] sm:$0xff] (!%p223_p3)  ;;  %v392_v12 = vld [vmem:[%s1545_s1 + $0x48] sm:$0xff] (!%p223_p3) }
   0x9   : > { %1073 = vmatprep.subr.bf16.mxu0 (!%p223_p3), %v1072_v3  ;;  %v394_v13 = vld [vmem:[%s1545_s1 + $0x58] sm:$0xff] (!%p223_p3)  ;;  %1104 = vmatprep.subr.bf16.mxu1 (!%p223_p3), %v1072_v3  ;;  %v1078_v14 = vpack.c.bf16 (!%p223_p3), %v389_v11, %v387_v10  ;;  %v391_v16 = vld [vmem:[%s1545_s1 + $0x40] sm:$0xff] (!%p223_p3)  ;;  %v393_v17 = vld [vmem:[%s1545_s1 + $0x50] sm:$0xff] (!%p223_p3)  ;;  %v1360_v2 = vshrl.u32 (!%p223_p3), %v677_v1, 7  ;;  %vm813_vm0 = vcmp.lt.s32.totalorder (!%p223_p3), %v677_v1, 256 }
   0xa   : > { %1075 = vmatpush1.bf16.msra.mxu0 (!%p223_p3), %v1074_v8  ;;  %1112 = vmatpush1.bf16.msra.mxu1 (!%p223_p3), %v1074_v8  ;;  %v1080_v15 = vpack.c.bf16 (!%p223_p3), %v394_v13, %v392_v12  ;;  %v396_v18 = vld [vmem:[%s1545_s1 + $0x68] sm:$0xff] (!%p223_p3)  ;;  %v398_v19 = vld [vmem:[%s1545_s1 + $0x78] sm:$0xff] (!%p223_p3)  ;;  %v1082_v20 = vpack.c.bf16 (!%p223_p3), %v393_v17, %v391_v16  ;;  %v395_v22 = vld [vmem:[%s1545_s1 + $0x60] sm:$0xff] (!%p223_p3) }
   0xb   : > { %1077 = vmatprep.subr.bf16.mxu0 (!%p223_p3), %v1076_v9  ;;  %1105 = vmatprep.subr.bf16.mxu1 (!%p223_p3), %v1076_v9  ;;  %v1084_v21 = vpack.c.bf16 (!%p223_p3), %v398_v19, %v396_v18  ;;  %v397_v23 = vld [vmem:[%s1545_s1 + $0x70] sm:$0xff] (!%p223_p3)  ;;  %v400_v24 = vld [vmem:[%s1545_s1 + $0x88] sm:$0xff] (!%p223_p3)  ;;  %v402_v25 = vld [vmem:[%s1545_s1 + $0x98] sm:$0xff] (!%p223_p3)  ;;  %v679_v3 = vsub.s32 (!%p223_p3), 0, %v1360_v2  ;;  %v683_v5 = vsub.s32 (!%p223_p3), 1, %v1360_v2 }
   0xc   : > { %v1086_v26 = vpack.c.bf16 (!%p223_p3), %v397_v23, %v395_v22  ;;  %v1088_v27 = vpack.c.bf16 (!%p223_p3), %v402_v25, %v400_v24  ;;  %v399_v28 = vld [vmem:[%s1545_s1 + $0x80] sm:$0xff] (!%p223_p3)  ;;  %v401_v29 = vld [vmem:[%s1545_s1 + $0x90] sm:$0xff] (!%p223_p3)  ;;  %v404_v30 = vld [vmem:[%s1545_s1 + $0xa8] sm:$0xff] (!%p223_p3) }
   0xd   : > { %v406_v31 = vld [vmem:[%s1545_s1 + $0xb8] sm:$0xff] (!%p223_p3)  ;;  %v1090_v32 = vpack.c.bf16 (!%p223_p3), %v401_v29, %v399_v28  ;;  %v403_v34 = vld [vmem:[%s1545_s1 + $0xa0] sm:$0xff] (!%p223_p3)  ;;  %v405_v35 = vld [vmem:[%s1545_s1 + $0xb0] sm:$0xff] (!%p223_p3) }
   0xe   : > { %1079 = vmatpush1.bf16.msra.mxu0 %v1078_v14  ;;  %1113 = vmatpush1.bf16.msra.mxu1 %v1078_v14  ;;  %v1092_v33 = vpack.c.bf16 %v406_v31, %v404_v30  ;;  %v408_v36 = vld [vmem:[%s1545_s1 + $0xc8] sm:$0xff]  ;;  %v410_v37 = vld [vmem:[%s1545_s1 + $0xd8] sm:$0xff]  ;;  %v1094_v38 = vpack.c.bf16 %v405_v35, %v403_v34  ;;  %v407_v40 = vld [vmem:[%s1545_s1 + $0xc0] sm:$0xff]  ;;  %s1555_s24 = smov (!%p269_p4, %s1062_s24), 31  ;;  %s1557_s18 = smov (!%p291_p5, %s1160_s18), 1 }
   0xf   : > { %1081 = vmatprep.subr.bf16.mxu0 %v1080_v15  ;;  %1106 = vmatprep.subr.bf16.mxu1 %v1080_v15  ;;  %v1096_v39 = vpack.c.bf16 %v410_v37, %v408_v36  ;;  %v409_v41 = vld [vmem:[%s1545_s1 + $0xd0] sm:$0xff]  ;;  %v412_v42 = vld [vmem:[%s1545_s1 + $0xe8] sm:$0xff]  ;;  %v414_v43 = vld [vmem:[%s1545_s1 + $0xf8] sm:$0xff]  ;;  %s1063_s25 = sshll.u32 %s1555_s24, 3  ;;  %s1071_s6 = sshll.u32 %s1555_s24, 4 }
  0x10   : > { %v1098_v44 = vpack.c.bf16 %v409_v41, %v407_v40  ;;  %v1100_v45 = vpack.c.bf16 %v414_v43, %v412_v42  ;;  %v411_v46 = vld [vmem:[%s1545_s1 + $0xe0] sm:$0xff]  ;;  %v413_v47 = vld [vmem:[%s1545_s1 + $0xf0] sm:$0xff]  ;;  %s1327_s28 = scalar_lea.vmem %s1544_s0, %s1063_s25  ;;  %s1375_s9 = scalar_lea.vmem %s1547_s3, %s1071_s6 }
  0x11   : > { %v1102_v48 = vpack.c.bf16 %v413_v47, %v411_v46  ;;  %v367_v49 = vld [vmem:[%s1327_s28] sm:$0xff]  ;;  %v368_v51 = vld [vmem:[%s1327_s28 + $0x8] sm:$0xff]  ;;  %v369_v53 = vld [vmem:[%s1327_s28 + $0x10] sm:$0xff]  ;;  %s1067_s24 = sshll.u32 %s1557_s18, 1 }
  0x12   : > { %1083 = vmatpush1.bf16.msra.mxu0 %v1082_v20  ;;  %1114 = vmatpush1.bf16.msra.mxu1 %v1082_v20  ;;  %v375_v50 = vld [vmem:[%s1327_s28 + $0x40] sm:$0xff]  ;;  %v376_v52 = vld [vmem:[%s1327_s28 + $0x48] sm:$0xff]  ;;  %v377_v54 = vld [vmem:[%s1327_s28 + $0x50] sm:$0xff]  ;;  %s294_s12 = scalar_lea.vmem %s1548_s4, %s1067_s24  ;;  %s298_s15 = scalar_lea.vmem %s1549_s5, %s1067_s24 }
  0x13   : > { %1085 = vmatprep.subr.bf16.mxu0 %v1084_v21  ;;  %1107 = vmatprep.subr.bf16.mxu1 %v1084_v21  ;;  %v370_v55 = vld [vmem:[%s1327_s28 + $0x18] sm:$0xff]  ;;  %v371_v57 = vld [vmem:[%s1327_s28 + $0x20] sm:$0xff]  ;;  %v372_v59 = vld [vmem:[%s1327_s28 + $0x28] sm:$0xff] }
  0x14   : > { %v378_v56 = vld [vmem:[%s1327_s28 + $0x58] sm:$0xff]  ;;  %v379_v58 = vld [vmem:[%s1327_s28 + $0x60] sm:$0xff]  ;;  %v380_v60 = vld [vmem:[%s1327_s28 + $0x68] sm:$0xff] }
  0x15   : > { %v373_v61 = vld [vmem:[%s1327_s28 + $0x30] sm:$0xff]  ;;  %v374_v63 = vld [vmem:[%s1327_s28 + $0x38] sm:$0xff]  ;;  %v675_v4 = vld [vmem:[%s1546_s2] sm:$0x3] }
  0x16   : > { %1087 = vmatpush1.bf16.msra.mxu0 %v1086_v26  ;;  %1115 = vmatpush1.bf16.msra.mxu1 %v1086_v26  ;;  %v381_v62 = vld [vmem:[%s1327_s28 + $0x70] sm:$0xff]  ;;  %v382_v0 = vld [vmem:[%s1327_s28 + $0x78] sm:$0xff]  ;;  %v1368_v6 = vrot.slane %v675_v4, %v679_v3  ;;  %v1370_v8 = vrot.slane %v675_v4, %v683_v5 }
  0x17   : > { %1089 = vmatprep.subr.bf16.mxu0 %v1088_v27  ;;  %1108 = vmatprep.subr.bf16.mxu1 %v1088_v27 }
  0x1a   : > { %1091 = vmatpush1.bf16.msra.mxu0 %v1090_v32  ;;  %1116 = vmatpush1.bf16.msra.mxu1 %v1090_v32 }
  0x1b   : > { %1093 = vmatprep.subr.bf16.mxu0 %v1092_v33  ;;  %1109 = vmatprep.subr.bf16.mxu1 %v1092_v33 }
  0x1e   : > { %1095 = vmatpush1.bf16.msra.mxu0 %v1094_v38  ;;  %1117 = vmatpush1.bf16.msra.mxu1 %v1094_v38 }
  0x1f   : > { %1097 = vmatprep.subr.bf16.mxu0 %v1096_v39  ;;  %1110 = vmatprep.subr.bf16.mxu1 %v1096_v39 }
  0x22   : > { %1099 = vmatpush1.bf16.msra.mxu0 %v1098_v44  ;;  %1118 = vmatpush1.bf16.msra.mxu1 %v1098_v44 }
  0x23   : > { %1101 = vmatprep.subr.bf16.mxu0 %v1100_v45  ;;  %1111 = vmatprep.subr.bf16.mxu1 %v1100_v45 }
  0x26   : > { %1103 = vmatpush1.bf16.msra.mxu0 %v1102_v48  ;;  %1119 = vmatpush1.bf16.msra.mxu1 %v1102_v48 }
  0x29   : > { %480 = vmatmul.mubr.f32.vlgmr.msra.gmra.mrb[0].mxu0 %v367_v49  ;;  %528 = vmatmul.mubr.f32.vlgmr.msra.gmra.mrb[0].mxu1 %v375_v50 }
  0x2a   : > { %485 = vmatprep.mubr.f32.mxu0 %v1170_v7  ;;  %533 = vmatprep.mubr.f32.mxu1 %v1170_v7 }
  0x2d   : > { %486 = vmatmul.mubr.f32.gmra.mrb[2].mxu0 %v368_v51  ;;  %534 = vmatmul.mubr.f32.gmra.mrb[2].mxu1 %v376_v52 }
  0x2e   : > { %491 = vmatprep.mubr.f32.mxu0 %v1170_v7  ;;  %539 = vmatprep.mubr.f32.mxu1 %v1170_v7 }
  0x31   : > { %492 = vmatmul.mubr.f32.gmra.mrb[4].mxu0 %v369_v53  ;;  %540 = vmatmul.mubr.f32.gmra.mrb[4].mxu1 %v377_v54 }
  0x32   : > { %497 = vmatprep.mubr.f32.mxu0 %v1170_v7  ;;  %545 = vmatprep.mubr.f32.mxu1 %v1170_v7 }
  0x35   : > { %498 = vmatmul.mubr.f32.gmra.mrb[6].mxu0 %v370_v55  ;;  %546 = vmatmul.mubr.f32.gmra.mrb[6].mxu1 %v378_v56 }
  0x36   : > { %503 = vmatprep.mubr.f32.mxu0 %v1170_v7  ;;  %551 = vmatprep.mubr.f32.mxu1 %v1170_v7 }
  0x39   : > { %504 = vmatmul.mubr.f32.gmra.mrb[8].mxu0 %v371_v57  ;;  %552 = vmatmul.mubr.f32.gmra.mrb[8].mxu1 %v379_v58 }
  0x3a   : > { %509 = vmatprep.mubr.f32.mxu0 %v1170_v7  ;;  %557 = vmatprep.mubr.f32.mxu1 %v1170_v7 }
  0x3d   : > { %510 = vmatmul.mubr.f32.gmra.mrb[10].mxu0 %v372_v59  ;;  %558 = vmatmul.mubr.f32.gmra.mrb[10].mxu1 %v380_v60 }
  0x3e   : > { %515 = vmatprep.mubr.f32.mxu0 %v1170_v7  ;;  %563 = vmatprep.mubr.f32.mxu1 %v1170_v7 }
  0x41   : > { %516 = vmatmul.mubr.f32.gmra.mrb[12].mxu0 %v373_v61  ;;  %564 = vmatmul.mubr.f32.gmra.mrb[12].mxu1 %v381_v62 }
  0x42   : > { %521 = vmatprep.mubr.f32.mxu0 %v1170_v7  ;;  %569 = vmatprep.mubr.f32.mxu1 %v1170_v7 }
  0x45   : > { %522 = vmatmul.mubr.f32.gmra.mrb[14].mxu0 %v374_v63  ;;  %570 = vmatmul.mubr.f32.gmra.mrb[14].mxu1 %v382_v0 }
  0xfc   : > { %v481_v7 = vpop.f32.mrb[0].mxu0  ;;  %v529_v9 = vpop.f32.mrb[0].mxu1 }
  0xfd   : > { %v687_v10 = vadd.f32 %v1368_v6, %v481_v7  ;;  %v483_v11 = vpop.f32.mrb[1].mxu0  ;;  %v1379_v12 = vadd.f32 %v1368_v6, %v529_v9  ;;  %v531_v13 = vpop.f32.mrb[1].mxu1 }
  0xfe   : > { %v688_v14 = vadd.f32 %v1370_v8, %v483_v11  ;;  %v1383_v15 = vadd.f32 %v1370_v8, %v531_v13 }
  0xff   : > { %719 = vst [vmem:[%s1375_s9] sm:$0xff] %v687_v10  ;;  %735 = vst [vmem:[%s1375_s9 + $0x80] sm:$0xff] %v1379_v12  ;;  %v816_v24 = vmul.f32 %v687_v10, %v687_v10 }
 0x100   : > { %720 = vst [vmem:[%s1375_s9 + $0x8] sm:$0xff] %v688_v14  ;;  %v487_v16 = vpop.f32.mrb[2].mxu0  ;;  %736 = vst [vmem:[%s1375_s9 + $0x88] sm:$0xff] %v1383_v15  ;;  %v535_v17 = vpop.f32.mrb[2].mxu1  ;;  %v817_v27 = vmul.f32 %v688_v14, %v688_v14 }
 0x101   : > { %v689_v18 = vadd.f32 %v1368_v6, %v487_v16  ;;  %v489_v19 = vpop.f32.mrb[3].mxu0  ;;  %v1393_v20 = vadd.f32 %v1368_v6, %v535_v17  ;;  %v537_v21 = vpop.f32.mrb[3].mxu1 }
 0x102   : > { %v690_v22 = vadd.f32 %v1370_v8, %v489_v19  ;;  %v1397_v23 = vadd.f32 %v1370_v8, %v537_v21 }
 0x103   : > { %721 = vst [vmem:[%s1375_s9 + $0x10] sm:$0xff] %v689_v18  ;;  %v751_v25 = vadd.f32 %v689_v18, %v687_v10  ;;  %v818_v26 = vmul.f32 %v689_v18, %v689_v18  ;;  %737 = vst [vmem:[%s1375_s9 + $0x90] sm:$0xff] %v1393_v20 }
 0x104   : > { %722 = vst [vmem:[%s1375_s9 + $0x18] sm:$0xff] %v690_v22  ;;  %v772_v28 = vadd.f32 %v690_v22, %v688_v14  ;;  %v819_v29 = vmul.f32 %v690_v22, %v690_v22  ;;  %v493_v30 = vpop.f32.mrb[4].mxu0  ;;  %738 = vst [vmem:[%s1375_s9 + $0x98] sm:$0xff] %v1397_v23  ;;  %v541_v31 = vpop.f32.mrb[4].mxu1 }
 0x105   : > { %v848_v32 = vadd.f32 %v818_v26, %v816_v24  ;;  %v691_v33 = vadd.f32 %v1368_v6, %v493_v30  ;;  %v495_v34 = vpop.f32.mrb[5].mxu0  ;;  %v1407_v35 = vadd.f32 %v1368_v6, %v541_v31  ;;  %v543_v36 = vpop.f32.mrb[5].mxu1 }
 0x106   : > { %v869_v37 = vadd.f32 %v819_v29, %v817_v27  ;;  %v692_v38 = vadd.f32 %v1370_v8, %v495_v34  ;;  %v1411_v39 = vadd.f32 %v1370_v8, %v543_v36 }
 0x107   : > { %723 = vst [vmem:[%s1375_s9 + $0x20] sm:$0xff] %v691_v33  ;;  %v752_v40 = vadd.f32 %v751_v25, %v691_v33  ;;  %v820_v41 = vmul.f32 %v691_v33, %v691_v33  ;;  %739 = vst [vmem:[%s1375_s9 + $0xa0] sm:$0xff] %v1407_v35 }
 0x108   : > { %724 = vst [vmem:[%s1375_s9 + $0x28] sm:$0xff] %v692_v38  ;;  %v773_v42 = vadd.f32 %v772_v28, %v692_v38  ;;  %v821_v43 = vmul.f32 %v692_v38, %v692_v38  ;;  %v499_v44 = vpop.f32.mrb[6].mxu0  ;;  %740 = vst [vmem:[%s1375_s9 + $0xa8] sm:$0xff] %v1411_v39  ;;  %v547_v45 = vpop.f32.mrb[6].mxu1 }
 0x109   : > { %v849_v46 = vadd.f32 %v848_v32, %v820_v41  ;;  %v693_v47 = vadd.f32 %v1368_v6, %v499_v44  ;;  %v501_v48 = vpop.f32.mrb[7].mxu0  ;;  %v1421_v49 = vadd.f32 %v1368_v6, %v547_v45  ;;  %v549_v50 = vpop.f32.mrb[7].mxu1 }
 0x10a   : > { %v870_v51 = vadd.f32 %v869_v37, %v821_v43  ;;  %v694_v52 = vadd.f32 %v1370_v8, %v501_v48  ;;  %v1425_v53 = vadd.f32 %v1370_v8, %v549_v50 }
 0x10b   : > { %725 = vst [vmem:[%s1375_s9 + $0x30] sm:$0xff] %v693_v47  ;;  %v753_v54 = vadd.f32 %v752_v40, %v693_v47  ;;  %v822_v55 = vmul.f32 %v693_v47, %v693_v47  ;;  %741 = vst [vmem:[%s1375_s9 + $0xb0] sm:$0xff] %v1421_v49 }
 0x10c   : > { %726 = vst [vmem:[%s1375_s9 + $0x38] sm:$0xff] %v694_v52  ;;  %v774_v56 = vadd.f32 %v773_v42, %v694_v52  ;;  %v823_v57 = vmul.f32 %v694_v52, %v694_v52  ;;  %v505_v58 = vpop.f32.mrb[8].mxu0  ;;  %742 = vst [vmem:[%s1375_s9 + $0xb8] sm:$0xff] %v1425_v53  ;;  %v553_v59 = vpop.f32.mrb[8].mxu1 }
 0x10d   : > { %v850_v60 = vadd.f32 %v849_v46, %v822_v55  ;;  %v695_v61 = vadd.f32 %v1368_v6, %v505_v58  ;;  %v507_v62 = vpop.f32.mrb[9].mxu0  ;;  %v1435_v63 = vadd.f32 %v1368_v6, %v553_v59  ;;  %v555_v0 = vpop.f32.mrb[9].mxu1 }
 0x10e   : > { %v871_v3 = vadd.f32 %v870_v51, %v823_v57  ;;  %v696_v4 = vadd.f32 %v1370_v8, %v507_v62  ;;  %v1439_v5 = vadd.f32 %v1370_v8, %v555_v0  ;;  %v832_v62 = vmul.f32 %v1379_v12, %v1379_v12 }
 0x10f   : > { %727 = vst [vmem:[%s1375_s9 + $0x40] sm:$0xff] %v695_v61  ;;  %v754_v7 = vadd.f32 %v753_v54, %v695_v61  ;;  %v824_v9 = vmul.f32 %v695_v61, %v695_v61  ;;  %743 = vst [vmem:[%s1375_s9 + $0xc0] sm:$0xff] %v1435_v63 }
 0x110   : > { %728 = vst [vmem:[%s1375_s9 + $0x48] sm:$0xff] %v696_v4  ;;  %v775_v10 = vadd.f32 %v774_v56, %v696_v4  ;;  %v825_v11 = vmul.f32 %v696_v4, %v696_v4  ;;  %v511_v13 = vpop.f32.mrb[10].mxu0  ;;  %744 = vst [vmem:[%s1375_s9 + $0xc8] sm:$0xff] %v1439_v5  ;;  %v559_v14 = vpop.f32.mrb[10].mxu1 }
 0x111   : > { %v851_v16 = vadd.f32 %v850_v60, %v824_v9  ;;  %v697_v17 = vadd.f32 %v1368_v6, %v511_v13  ;;  %v513_v18 = vpop.f32.mrb[11].mxu0  ;;  %v1449_v19 = vadd.f32 %v1368_v6, %v559_v14  ;;  %v561_v21 = vpop.f32.mrb[11].mxu1 }
 0x112   : > { %v872_v22 = vadd.f32 %v871_v3, %v825_v11  ;;  %v698_v24 = vadd.f32 %v1370_v8, %v513_v18  ;;  %v1453_v25 = vadd.f32 %v1370_v8, %v561_v21  ;;  %v833_v3 = vmul.f32 %v1383_v15, %v1383_v15 }
 0x113   : > { %729 = vst [vmem:[%s1375_s9 + $0x50] sm:$0xff] %v697_v17  ;;  %v755_v26 = vadd.f32 %v754_v7, %v697_v17  ;;  %v826_v27 = vmul.f32 %v697_v17, %v697_v17  ;;  %745 = vst [vmem:[%s1375_s9 + $0xd0] sm:$0xff] %v1449_v19  ;;  %v834_v7 = vmul.f32 %v1393_v20, %v1393_v20 }
 0x114   : > { %730 = vst [vmem:[%s1375_s9 + $0x58] sm:$0xff] %v698_v24  ;;  %v776_v28 = vadd.f32 %v775_v10, %v698_v24  ;;  %v827_v29 = vmul.f32 %v698_v24, %v698_v24  ;;  %v517_v30 = vpop.f32.mrb[12].mxu0  ;;  %746 = vst [vmem:[%s1375_s9 + $0xd8] sm:$0xff] %v1453_v25  ;;  %v565_v31 = vpop.f32.mrb[12].mxu1  ;;  %v835_v11 = vmul.f32 %v1397_v23, %v1397_v23 }
 0x115   : > { %v852_v32 = vadd.f32 %v851_v16, %v826_v27  ;;  %v699_v33 = vadd.f32 %v1368_v6, %v517_v30  ;;  %v519_v34 = vpop.f32.mrb[13].mxu0  ;;  %v1463_v36 = vadd.f32 %v1368_v6, %v565_v31  ;;  %v567_v37 = vpop.f32.mrb[13].mxu1  ;;  %v841_v30 = vmul.f32 %v1439_v5, %v1439_v5 }
 0x116   : > { %v873_v38 = vadd.f32 %v872_v22, %v827_v29  ;;  %v700_v40 = vadd.f32 %v1370_v8, %v519_v34  ;;  %v1467_v41 = vadd.f32 %v1370_v8, %v567_v37  ;;  %v843_v37 = vmul.f32 %v1453_v25, %v1453_v25 }
 0x117   : > { %731 = vst [vmem:[%s1375_s9 + $0x60] sm:$0xff] %v699_v33  ;;  %v756_v42 = vadd.f32 %v755_v26, %v699_v33  ;;  %v828_v43 = vmul.f32 %v699_v33, %v699_v33  ;;  %747 = vst [vmem:[%s1375_s9 + $0xe0] sm:$0xff] %v1463_v36  ;;  %v842_v33 = vmul.f32 %v1449_v19, %v1449_v19 }
 0x118   : > { %732 = vst [vmem:[%s1375_s9 + $0x68] sm:$0xff] %v700_v40  ;;  %v777_v44 = vadd.f32 %v776_v28, %v700_v40  ;;  %v829_v45 = vmul.f32 %v700_v40, %v700_v40  ;;  %v523_v46 = vpop.f32.mrb[14].mxu0  ;;  %748 = vst [vmem:[%s1375_s9 + $0xe8] sm:$0xff] %v1467_v41  ;;  %v571_v47 = vpop.f32.mrb[14].mxu1  ;;  %v840_v28 = vmul.f32 %v1435_v63, %v1435_v63 }
 0x119   : > { %v853_v48 = vadd.f32 %v852_v32, %v828_v43  ;;  %v701_v50 = vadd.f32 %v1368_v6, %v523_v46  ;;  %v525_v51 = vpop.f32.mrb[15].mxu0  ;;  %v717_v52 = vadd.f32 %v1368_v6, %v571_v47  ;;  %v573_v54 = vpop.f32.mrb[15].mxu1  ;;  %v844_v40 = vmul.f32 %v1463_v36, %v1463_v36 }
 0x11a   : > { %v874_v55 = vadd.f32 %v873_v38, %v829_v45  ;;  %v702_v56 = vadd.f32 %v1370_v8, %v525_v51  ;;  %v718_v57 = vadd.f32 %v1370_v8, %v573_v54 }
 0x11b   : > { %733 = vst [vmem:[%s1375_s9 + $0x70] sm:$0xff] %v701_v50  ;;  %v757_v58 = vadd.f32 %v756_v42, %v701_v50  ;;  %v830_v59 = vmul.f32 %v701_v50, %v701_v50  ;;  %749 = vst [vmem:[%s1375_s9 + $0xf0] sm:$0xff] %v717_v52 }
 0x11c   : > { %734 = vst [vmem:[%s1375_s9 + $0x78] sm:$0xff] %v702_v56  ;;  %v778_v60 = vadd.f32 %v777_v44, %v702_v56  ;;  %v831_v61 = vmul.f32 %v702_v56, %v702_v56  ;;  %750 = vst [vmem:[%s1375_s9 + $0xf8] sm:$0xff] %v718_v57  ;;  %v845_v44 = vmul.f32 %v1467_v41, %v1467_v41 }
 0x11d   : > { %v758_v0 = vadd.f32 %v757_v58, %v1379_v12  ;;  %v854_v6 = vadd.f32 %v853_v48, %v830_v59  ;;  %v836_v12 = vmul.f32 %v1407_v35, %v1407_v35  ;;  %v1171_v58 = vmov 1966171168  }
 0x11e   : > { %v779_v4 = vadd.f32 %v778_v60, %v1383_v15  ;;  %v875_v8 = vadd.f32 %v874_v55, %v831_v61  ;;  %v837_v15 = vmul.f32 %v1411_v39, %v1411_v39  ;;  %v797_v59 = vunpack.c.l.s4 %v1171_v58 }
 0x11f   : > { %v759_v9 = vadd.f32 %v758_v0, %v1393_v20  ;;  %v855_v10 = vadd.f32 %v854_v6, %v832_v62  ;;  %v838_v20 = vmul.f32 %v1421_v49, %v1421_v49 }
 0x120   : > { %v780_v13 = vadd.f32 %v779_v4, %v1397_v23  ;;  %v876_v14 = vadd.f32 %v875_v8, %v833_v3  ;;  %v839_v23 = vmul.f32 %v1425_v53, %v1425_v53 }
 0x121   : > { %v856_v16 = vadd.f32 %v855_v10, %v834_v7  ;;  %v760_v17 = vadd.f32 %v759_v9, %v1407_v35 }
 0x122   : > { %v877_v18 = vadd.f32 %v876_v14, %v835_v11  ;;  %v781_v21 = vadd.f32 %v780_v13, %v1411_v39 }
 0x123   : > { %v761_v22 = vadd.f32 %v760_v17, %v1421_v49  ;;  %v857_v24 = vadd.f32 %v856_v16, %v836_v12 }
 0x124   : > { %v782_v26 = vadd.f32 %v781_v21, %v1425_v53  ;;  %v878_v27 = vadd.f32 %v877_v18, %v837_v15 }
 0x125   : > { %v762_v35 = vadd.f32 %v761_v22, %v1435_v63  ;;  %v858_v29 = vadd.f32 %v857_v24, %v838_v20 }
 0x126   : > { %v783_v39 = vadd.f32 %v782_v26, %v1439_v5  ;;  %v879_v31 = vadd.f32 %v878_v27, %v839_v23  ;;  %v846_v5 = vmul.f32 %v717_v52, %v717_v52 }
 0x127   : > { %v859_v49 = vadd.f32 %v858_v29, %v840_v28  ;;  %v763_v32 = vadd.f32 %v762_v35, %v1449_v19  ;;  %v847_v19 = vmul.f32 %v718_v57, %v718_v57 }
 0x128   : > { %v880_v53 = vadd.f32 %v879_v31, %v841_v30  ;;  %v784_v34 = vadd.f32 %v783_v39, %v1453_v25 }
 0x129   : > { %v860_v63 = vadd.f32 %v859_v49, %v842_v33  ;;  %v764_v38 = vadd.f32 %v763_v32, %v1463_v36 }
 0x12a   : > { %v881_v42 = vadd.f32 %v880_v53, %v843_v37  ;;  %v785_v43 = vadd.f32 %v784_v34, %v1467_v41 }
 0x12b   : > { %v861_v45 = vadd.f32 %v860_v63, %v844_v40  ;;  %v765_v46 = vadd.f32 %v764_v38, %v717_v52 }
 0x12c   : > { %v882_v47 = vadd.f32 %v881_v42, %v845_v44  ;;  %v786_v48 = vadd.f32 %v785_v43, %v718_v57  ;;  %v798_v57 = vunpack.c.0.s8 %v797_v59 }
 0x12d   : > { %v766_v25 = vrot.slane %v765_v46, 4  ;;  %v862_v50 = vadd.f32 %v861_v45, %v846_v5 }
 0x12e   : > { %v787_v51 = vrot.slane %v786_v48, 4  ;;  %v883_v54 = vadd.f32 %v882_v47, %v847_v19  ;;  %v801_v12 = vsub.s32 %v798_v57, %v1360_v2 }
 0x12f   : > { %v767_v55 = vadd.f32 %v766_v25, %v765_v46  ;;  %v863_v56 = vrot.slane %v862_v50, 4 }
 0x130   : > { %v788_v36 = vadd.f32 %v787_v51, %v786_v48  ;;  %v884_v60 = vrot.slane %v883_v54, 4 }
 0x131   : > { %v768_v61 = vrot.slane %v767_v55, 2  ;;  %v864_v62 = vadd.f32 %v863_v56, %v862_v50 }
 0x132   : > { %v789_v41 = vrot.slane %v788_v36, 2  ;;  %v885_v0 = vadd.f32 %v884_v60, %v883_v54 }
 0x133   : > { %v769_v6 = vadd.f32 %v768_v61, %v767_v55  ;;  %v865_v52 = vrot.slane %v864_v62, 2 }
 0x134   : > { %v790_v3 = vadd.f32 %v789_v41, %v788_v36  ;;  %v886_v4 = vrot.slane %v885_v0, 2 }
 0x135   : > { %v770_v8 = vrot.slane %v769_v6, 1  ;;  %v866_v7 = vadd.f32 %v865_v52, %v864_v62 }
 0x136   : > { %v791_v9 = vrot.slane %v790_v3, 1  ;;  %v887_v10 = vadd.f32 %v886_v4, %v885_v0 }
 0x137   : > { %v771_v11 = vadd.f32 %v770_v8, %v769_v6  ;;  %v867_v13 = vrot.slane %v866_v7, 1 }
 0x138   : > { %v792_v14 = vadd.f32 %v791_v9, %v790_v3  ;;  %v888_v16 = vrot.slane %v887_v10, 1 }
 0x139   : > { %v868_v17 = vadd.f32 %v867_v13, %v866_v7 }
 0x13a   : > { %v795_v15 = vcombine.low %v771_v11, %v792_v14  ;;  %v889_v18 = vadd.f32 %v888_v16, %v887_v10 }
 0x13c   : > { %v802_v21 = vrot.slane %v795_v15, %v801_v12  ;;  %v892_v20 = vcombine.low %v868_v17, %v889_v18 }
 0x13e   : > { %v809_v22 = vrot.slane %v802_v21, %v801_v12  ;;  %v899_v24 = vrot.slane %v892_v20, %v801_v12 }
 0x140   : > { %815 = vst.msk [vmem:[%s294_s12] sm:$0x3] %vm813_vm0, %v809_v22  ;;  %v906_v2 = vrot.slane %v899_v24, %v801_v12 }
 0x142   : > { %908 = vst.msk [vmem:[%s298_s15] sm:$0x3] %vm813_vm0, %v906_v2 }
 0x143 PF: > { %s16_s20 = sadd.s32 1, %s1168_s20   ;;  %s1550_s18 = smov %s1164_s19 }
 0x144   : > { %p13_p6 = scmp.ge.s32.totalorder %s16_s20, 4   ;;  %s1551_s19 = smov %s1553_s21 }
 0x146   :  { %15 = sbr.rel (!%p13_p6) target bundleno = 2 (0x2), region = 97 }

// kernel: bayes_head_forward.23
= control target key start
LH: loop header
LB: loop body
LE: loop exit
PB: predicated region body
PF: predicated region fallthrough
CT: control target
= control target key end

     0   :  { %s623_s18 = smov 0   ;;  %s839_s0 = inlined_call_operand.vmem [shape: f32[256,256], index: 0, kind: input, shape index: {}]   ;;  %s840_s1 = inlined_call_operand.vmem [shape: f32[2,1,256], index: 1, kind: input, shape index: {}]   ;;  %s841_s2 = inlined_call_operand.vmem [shape: f32[2,1,256], index: 2, kind: input, shape index: {}]   ;;  %s842_s3 = inlined_call_operand.vmem [shape: f32[1,256], index: 3, kind: input, shape index: {}]   ;;  %s843_s4 = inlined_call_operand.vmem [shape: f32[1,256], index: 4, kind: input, shape index: {}]   ;;  %s844_s5 = inlined_call_operand.vmem [shape: f32[256,256], index: 5, kind: output, shape index: {}]  }
   0x1 LB: > { %s556_s19 = sadd.s32 4294967295, %s590_s18   ;;  %p560_p0 = scmp.ge.s32.totalorder %s590_s18, 1  ;;  %s590_s18 = sphi %s623_s18, %s15_s18  }
   0x2   : > { %p189_p1 = scmp.lt.s32.totalorder %s590_s18, 3 }
   0x4   : > { %p190_p2 = pnand %p560_p0, %p189_p1 }
   0x5   : > { %v237_v0 = vlaneseq (!%p190_p2)  ;;  %v233_v2 = vld [vmem:[%s840_s1] sm:$0x3] (!%p190_p2)  ;;  %v234_v3 = vld [vmem:[%s840_s1 + $0x2] sm:$0x3] (!%p190_p2)  ;;  %vm257_vm0 = vcmask (!%p190_p2), 1040384   ;;  %s561_s28 = sshll.u32 (!%p190_p2), %s556_s19, 4 }
   0x6   : > { %193 = sbr.rel (%p190_p2) target bundleno = 76 (0x4c), region = 40  ;;  %v264_v6 = vld [vmem:[%s841_s2] sm:$0x3] (!%p190_p2)  ;;  %v265_v7 = vld [vmem:[%s841_s2 + $0x2] sm:$0x3] (!%p190_p2)  ;;  %p220_p3 = scmp.lt.s32.totalorder (!%p190_p2), %s561_s28, 31 }
   0x7   : > { %v238_v1 = vshrl.u32 (!%p190_p2), %v237_v0, 7  ;;  %v592_v38 = vmov (!%p190_p2), 1966171168   ;;  %v302_v46 = vld [vmem:[%s842_s3] sm:$0x3] (!%p190_p2) }
   0x8   : > { %v311_v39 = vunpack.c.l.s4 (!%p190_p2), %v592_v38 }
   0x9   : > { %v637_v4 = vsub.s32 (!%p190_p2), 0, %v238_v1  ;;  %v639_v5 = vsub.s32 (!%p190_p2), 1, %v238_v1 }
   0xa   : > { %v312_v40 = vunpack.c.0.s8 (!%p190_p2), %v311_v39 }
   0xb   : > { %v240_v8 = vrot.slane (!%p190_p2), %v233_v2, %v637_v4  ;;  %v244_v9 = vrot.slane (!%p190_p2), %v233_v2, %v639_v5  ;;  %v248_v10 = vrot.slane (!%p190_p2), %v234_v3, %v637_v4  ;;  %v252_v11 = vrot.slane (!%p190_p2), %v234_v3, %v639_v5 }
   0xc   : > { %v271_v12 = vrot.slane (!%p190_p2), %v264_v6, %v637_v4  ;;  %v275_v13 = vrot.slane (!%p190_p2), %v264_v6, %v639_v5  ;;  %v279_v14 = vrot.slane (!%p190_p2), %v265_v7, %v637_v4  ;;  %v283_v15 = vrot.slane (!%p190_p2), %v265_v7, %v639_v5  ;;  %v326_v7 = vld [vmem:[%s843_s4] sm:$0x3] (!%p190_p2) }
   0xd   : > { %v258_v16 = vsel %vm257_vm0, %v240_v8, 0.0  ;;  %v259_v17 = vsel %vm257_vm0, %v248_v10, 0.0  ;;  %v261_v18 = vsel %vm257_vm0, %v244_v9, 0.0  ;;  %v262_v19 = vsel %vm257_vm0, %v252_v11, 0.0  ;;  %s846_s28 = smov (!%p220_p3, %s561_s28), 31 }
   0xe   : > { %v260_v20 = vadd.f32 %v259_v17, %v258_v16  ;;  %v263_v21 = vadd.f32 %v262_v19, %v261_v18  ;;  %v288_v22 = vsel %vm257_vm0, %v271_v12, 0.0  ;;  %v289_v23 = vsel %vm257_vm0, %v279_v14, 0.0  ;;  %s569_s29 = sshll.u32 %s846_s28, 4 }
   0xf   : > { %v290_v24 = vadd.f32 %v289_v23, %v288_v22  ;;  %v291_v25 = vsel %vm257_vm0, %v275_v13, 0.0  ;;  %v292_v26 = vsel %vm257_vm0, %v283_v15, 0.0  ;;  %v667_v42 = vsub.s32 %v312_v40, %v238_v1  ;;  %s680_s9 = scalar_lea.vmem %s839_s0, %s569_s29  ;;  %s766_s14 = scalar_lea.vmem %s844_s5, %s569_s29 }
  0x10   : > { %v293_v27 = vadd.f32 %v292_v26, %v291_v25  ;;  %v294_v28 = vmul.f32 0.00390625, %v260_v20  ;;  %v295_v29 = vmul.f32 0.00390625, %v263_v21  ;;  %v359_v51 = vld [vmem:[%s680_s9] sm:$0xff]  ;;  %v360_v52 = vld [vmem:[%s680_s9 + $0x8] sm:$0xff]  ;;  %v361_v53 = vld [vmem:[%s680_s9 + $0x10] sm:$0xff] }
  0x11   : > { %v296_v30 = vmul.f32 0.00390625, %v290_v24  ;;  %v362_v54 = vld [vmem:[%s680_s9 + $0x18] sm:$0xff]  ;;  %v363_v55 = vld [vmem:[%s680_s9 + $0x20] sm:$0xff]  ;;  %v364_v58 = vld [vmem:[%s680_s9 + $0x28] sm:$0xff] }
  0x12   : > { %v297_v31 = vmul.f32 0.00390625, %v293_v27  ;;  %v298_v32 = vmul.f32 %v294_v28, %v294_v28  ;;  %v299_v33 = vmul.f32 %v295_v29, %v295_v29  ;;  %v365_v59 = vld [vmem:[%s680_s9 + $0x30] sm:$0xff]  ;;  %v366_v60 = vld [vmem:[%s680_s9 + $0x38] sm:$0xff]  ;;  %v367_v61 = vld [vmem:[%s680_s9 + $0x40] sm:$0xff] }
  0x13   : > { %v368_v62 = vld [vmem:[%s680_s9 + $0x48] sm:$0xff]  ;;  %v369_v63 = vld [vmem:[%s680_s9 + $0x50] sm:$0xff]  ;;  %v370_v2 = vld [vmem:[%s680_s9 + $0x58] sm:$0xff] }
  0x14   : > { %v300_v34 = vsub.f32 %v296_v30, %v298_v32  ;;  %v301_v35 = vsub.f32 %v297_v31, %v299_v33  ;;  %v371_v3 = vld [vmem:[%s680_s9 + $0x60] sm:$0xff]  ;;  %v372_v6 = vld [vmem:[%s680_s9 + $0x68] sm:$0xff]  ;;  %v373_v12 = vld [vmem:[%s680_s9 + $0x70] sm:$0xff] }
  0x15   : > { %v374_v13 = vld [vmem:[%s680_s9 + $0x78] sm:$0xff]  ;;  %v375_v14 = vld [vmem:[%s680_s9 + $0x80] sm:$0xff]  ;;  %v376_v19 = vld [vmem:[%s680_s9 + $0x88] sm:$0xff] }
  0x16   : > { %v303_v36 = vadd.f32 1e-05, %v300_v34  ;;  %v304_v37 = vadd.f32 1e-05, %v301_v35  ;;  %v377_v20 = vld [vmem:[%s680_s9 + $0x90] sm:$0xff]  ;;  %v378_v21 = vld [vmem:[%s680_s9 + $0x98] sm:$0xff] }
  0x17   : > { %v379_v26 = vld [vmem:[%s680_s9 + $0xa0] sm:$0xff]  ;;  %v380_v27 = vld [vmem:[%s680_s9 + $0xa8] sm:$0xff]  ;;  %v382_v33 = vld [vmem:[%s680_s9 + $0xb8] sm:$0xff] }
  0x18   : > { %580 = vrsqrt.f32 %v303_v36  ;;  %v383_v34 = vld [vmem:[%s680_s9 + $0xc0] sm:$0xff]  ;;  %v384_v35 = vld [vmem:[%s680_s9 + $0xc8] sm:$0xff]  ;;  %v385_v40 = vld [vmem:[%s680_s9 + $0xd0] sm:$0xff] }
  0x19   : > { %582 = vrsqrt.f32 %v304_v37 }
  0x22   : > { %v581_v41 = vpop.eup %580 }
  0x23   : > { %v583_v43 = vpop.eup %582 }
  0x24   : > { %v309_v44 = vcombine.low %v581_v41, %v583_v43  ;;  %v386_v41 = vld [vmem:[%s680_s9 + $0xd8] sm:$0xff] }
  0x26   : > { %v316_v45 = vrot.slane %v309_v44, %v667_v42 }
  0x28   : > { %v323_v47 = vrot.slane %v316_v45, %v667_v42 }
  0x2a   : > { %v325_v48 = vmul.f32 %v323_v47, %v302_v46  ;;  %v388_v47 = vld [vmem:[%s680_s9 + $0xe8] sm:$0xff] }
  0x2c   : > { %v683_v49 = vrot.slane %v325_v48, %v637_v4  ;;  %v686_v50 = vrot.slane %v325_v48, %v639_v5  ;;  %v389_v48 = vld [vmem:[%s680_s9 + $0xf0] sm:$0xff] }
  0x2e   : > { %v338_v56 = vmul.f32 %v683_v49, %v294_v28  ;;  %v339_v57 = vmul.f32 %v686_v50, %v295_v29  ;;  %v391_v1 = vmul.f32 %v359_v51, %v683_v49  ;;  %v392_v8 = vmul.f32 %v360_v52, %v686_v50  ;;  %v381_v28 = vld [vmem:[%s680_s9 + $0xb0] sm:$0xff]  ;;  %v390_v51 = vld [vmem:[%s680_s9 + $0xf8] sm:$0xff] }
  0x2f   : > { %v393_v9 = vmul.f32 %v361_v53, %v683_v49  ;;  %v394_v10 = vmul.f32 %v362_v54, %v686_v50  ;;  %v395_v11 = vmul.f32 %v363_v55, %v683_v49  ;;  %v396_v16 = vmul.f32 %v364_v58, %v686_v50 }
  0x30   : > { %v342_v0 = vcombine.low %v338_v56, %v339_v57  ;;  %v397_v17 = vmul.f32 %v365_v59, %v683_v49  ;;  %v398_v18 = vmul.f32 %v366_v60, %v686_v50  ;;  %v399_v22 = vmul.f32 %v367_v61, %v683_v49 }
  0x31   : > { %v400_v23 = vmul.f32 %v368_v62, %v686_v50  ;;  %v401_v24 = vmul.f32 %v369_v63, %v683_v49  ;;  %v402_v25 = vmul.f32 %v370_v2, %v686_v50  ;;  %v403_v30 = vmul.f32 %v371_v3, %v683_v49 }
  0x32   : > { %v349_v15 = vrot.slane %v342_v0, %v667_v42  ;;  %v404_v31 = vmul.f32 %v372_v6, %v686_v50  ;;  %v405_v32 = vmul.f32 %v373_v12, %v683_v49  ;;  %v406_v36 = vmul.f32 %v374_v13, %v686_v50 }
  0x33   : > { %v407_v37 = vmul.f32 %v375_v14, %v683_v49  ;;  %v408_v38 = vmul.f32 %v376_v19, %v686_v50  ;;  %v409_v39 = vmul.f32 %v377_v20, %v683_v49  ;;  %v410_v44 = vmul.f32 %v378_v21, %v686_v50 }
  0x34   : > { %v356_v29 = vrot.slane %v349_v15, %v667_v42  ;;  %v387_v42 = vld [vmem:[%s680_s9 + $0xe0] sm:$0xff]  ;;  %v411_v45 = vmul.f32 %v379_v26, %v683_v49  ;;  %v412_v46 = vmul.f32 %v380_v27, %v686_v50  ;;  %v413_v52 = vmul.f32 %v381_v28, %v683_v49 }
  0x35   : > { %v414_v53 = vmul.f32 %v382_v33, %v686_v50  ;;  %v415_v54 = vmul.f32 %v383_v34, %v683_v49  ;;  %v416_v55 = vmul.f32 %v384_v35, %v686_v50  ;;  %v417_v58 = vmul.f32 %v385_v40, %v683_v49 }
  0x36   : > { %v358_v43 = vsub.f32 %v326_v7, %v356_v29  ;;  %v418_v59 = vmul.f32 %v386_v41, %v686_v50  ;;  %v420_v60 = vmul.f32 %v388_v47, %v686_v50  ;;  %v422_v61 = vmul.f32 %v390_v51, %v686_v50 }
  0x38   : > { %v754_v56 = vrot.slane %v358_v43, %v637_v4  ;;  %v757_v57 = vrot.slane %v358_v43, %v639_v5  ;;  %v419_v4 = vmul.f32 %v387_v42, %v683_v49  ;;  %v421_v5 = vmul.f32 %v389_v48, %v683_v49 }
  0x3a   : > { %v434_v62 = vadd.f32 %v754_v56, %v391_v1  ;;  %v435_v63 = vadd.f32 %v757_v57, %v392_v8  ;;  %v436_v0 = vadd.f32 %v754_v56, %v393_v9  ;;  %v437_v2 = vadd.f32 %v757_v57, %v394_v10 }
  0x3b   : > { %v438_v3 = vadd.f32 %v754_v56, %v395_v11  ;;  %v439_v6 = vadd.f32 %v757_v57, %v396_v16  ;;  %v440_v49 = vadd.f32 %v754_v56, %v397_v17  ;;  %v441_v50 = vadd.f32 %v757_v57, %v398_v18 }
  0x3c   : > { %466 = vst [vmem:[%s766_s14] sm:$0xff] %v434_v62  ;;  %467 = vst [vmem:[%s766_s14 + $0x8] sm:$0xff] %v435_v63  ;;  %v442_v1 = vadd.f32 %v754_v56, %v399_v22  ;;  %v443_v7 = vadd.f32 %v757_v57, %v400_v23  ;;  %v444_v8 = vadd.f32 %v754_v56, %v401_v24 }
  0x3d   : > { %468 = vst [vmem:[%s766_s14 + $0x10] sm:$0xff] %v436_v0  ;;  %469 = vst [vmem:[%s766_s14 + $0x18] sm:$0xff] %v437_v2  ;;  %v445_v9 = vadd.f32 %v757_v57, %v402_v25  ;;  %v446_v10 = vadd.f32 %v754_v56, %v403_v30  ;;  %v447_v11 = vadd.f32 %v757_v57, %v404_v31 }
  0x3e   : > { %470 = vst [vmem:[%s766_s14 + $0x20] sm:$0xff] %v438_v3  ;;  %471 = vst [vmem:[%s766_s14 + $0x28] sm:$0xff] %v439_v6  ;;  %v448_v12 = vadd.f32 %v754_v56, %v405_v32  ;;  %v449_v13 = vadd.f32 %v757_v57, %v406_v36  ;;  %v450_v14 = vadd.f32 %v754_v56, %v407_v37 }
  0x3f   : > { %472 = vst [vmem:[%s766_s14 + $0x30] sm:$0xff] %v440_v49  ;;  %473 = vst [vmem:[%s766_s14 + $0x38] sm:$0xff] %v441_v50  ;;  %v451_v15 = vadd.f32 %v757_v57, %v408_v38  ;;  %v452_v16 = vadd.f32 %v754_v56, %v409_v39  ;;  %v453_v17 = vadd.f32 %v757_v57, %v410_v44 }
  0x40   : > { %474 = vst [vmem:[%s766_s14 + $0x40] sm:$0xff] %v442_v1  ;;  %475 = vst [vmem:[%s766_s14 + $0x48] sm:$0xff] %v443_v7  ;;  %v454_v18 = vadd.f32 %v754_v56, %v411_v45  ;;  %v455_v19 = vadd.f32 %v757_v57, %v412_v46  ;;  %v456_v20 = vadd.f32 %v754_v56, %v413_v52 }
  0x41   : > { %476 = vst [vmem:[%s766_s14 + $0x50] sm:$0xff] %v444_v8  ;;  %477 = vst [vmem:[%s766_s14 + $0x58] sm:$0xff] %v445_v9  ;;  %v457_v21 = vadd.f32 %v757_v57, %v414_v53  ;;  %v458_v22 = vadd.f32 %v754_v56, %v415_v54  ;;  %v459_v23 = vadd.f32 %v757_v57, %v416_v55 }
  0x42   : > { %478 = vst [vmem:[%s766_s14 + $0x60] sm:$0xff] %v446_v10  ;;  %479 = vst [vmem:[%s766_s14 + $0x68] sm:$0xff] %v447_v11  ;;  %v460_v24 = vadd.f32 %v754_v56, %v417_v58  ;;  %v461_v25 = vadd.f32 %v757_v57, %v418_v59  ;;  %v462_v26 = vadd.f32 %v754_v56, %v419_v4 }
  0x43   : > { %480 = vst [vmem:[%s766_s14 + $0x70] sm:$0xff] %v448_v12  ;;  %481 = vst [vmem:[%s766_s14 + $0x78] sm:$0xff] %v449_v13  ;;  %v463_v27 = vadd.f32 %v757_v57, %v420_v60  ;;  %v464_v28 = vadd.f32 %v754_v56, %v421_v5  ;;  %v465_v29 = vadd.f32 %v757_v57, %v422_v61 }
  0x44   : > { %482 = vst [vmem:[%s766_s14 + $0x80] sm:$0xff] %v450_v14  ;;  %483 = vst [vmem:[%s766_s14 + $0x88] sm:$0xff] %v451_v15 }
  0x45   : > { %484 = vst [vmem:[%s766_s14 + $0x90] sm:$0xff] %v452_v16  ;;  %485 = vst [vmem:[%s766_s14 + $0x98] sm:$0xff] %v453_v17 }
  0x46   : > { %486 = vst [vmem:[%s766_s14 + $0xa0] sm:$0xff] %v454_v18  ;;  %487 = vst [vmem:[%s766_s14 + $0xa8] sm:$0xff] %v455_v19 }
  0x47   : > { %488 = vst [vmem:[%s766_s14 + $0xb0] sm:$0xff] %v456_v20  ;;  %489 = vst [vmem:[%s766_s14 + $0xb8] sm:$0xff] %v457_v21 }
  0x48   : > { %490 = vst [vmem:[%s766_s14 + $0xc0] sm:$0xff] %v458_v22  ;;  %491 = vst [vmem:[%s766_s14 + $0xc8] sm:$0xff] %v459_v23 }
  0x49   : > { %492 = vst [vmem:[%s766_s14 + $0xd0] sm:$0xff] %v460_v24  ;;  %493 = vst [vmem:[%s766_s14 + $0xd8] sm:$0xff] %v461_v25 }
  0x4a   : > { %494 = vst [vmem:[%s766_s14 + $0xe0] sm:$0xff] %v462_v26  ;;  %495 = vst [vmem:[%s766_s14 + $0xe8] sm:$0xff] %v463_v27 }
  0x4b   : > { %496 = vst [vmem:[%s766_s14 + $0xf0] sm:$0xff] %v464_v28  ;;  %497 = vst [vmem:[%s766_s14 + $0xf8] sm:$0xff] %v465_v29 }
  0x4c PF: > { %s15_s18 = sadd.s32 1, %s590_s18  }
  0x4d   : > { %p12_p4 = scmp.ge.s32.totalorder %s15_s18, 4  }
  0x4f   :  { %14 = sbr.rel (!%p12_p4) target bundleno = 1 (0x1), region = 70 }

// kernel: bayes_head_forward.30
= control target key start
LH: loop header
LB: loop body
LE: loop exit
PB: predicated region body
PF: predicated region fallthrough
CT: control target
= control target key end

     0   :  { %s1179_s18 = smov 0   ;;  %s1181_s19 = smov 0   ;;  %s1370_s0 = inlined_call_operand.vmem [shape: f32[256,256], index: 0, kind: input, shape index: {}]   ;;  %s1371_s1 = inlined_call_operand.vmem [shape: f32[256,128], index: 1, kind: input, shape index: {}]   ;;  %s1372_s2 = inlined_call_operand.vmem [shape: f32[1,128], index: 2, kind: input, shape index: {}]   ;;  %s1373_s3 = inlined_call_operand.vmem [shape: f32[256,128], index: 3, kind: output, shape index: {0}]   ;;  %s1374_s4 = inlined_call_operand.vmem [shape: f32[2,1,128], index: 4, kind: output, shape index: {1}]   ;;  %s1375_s5 = inlined_call_operand.vmem [shape: f32[2,1,128], index: 5, kind: output, shape index: {2}]  }
   0x1   :  { %s1183_s20 = smov 0   ;;  %s1185_s21 = smov 0  }
   0x2   :  { %s1187_s22 = smov 0   ;;  %s1189_s23 = smov 0  }
   0x3   :  { %s1191_s24 = smov 0  }
   0x4 LB: > { %s25_s25 = sadd.s32 1, %s1138_s22  ;;  %s28_s26 = sadd.s32 1, %s1142_s23  ;;  %s1146_s24 = sphi %s1191_s24, %s16_s24   ;;  %s1142_s23 = sphi %s1189_s23, %s1381_s23   ;;  %s1138_s22 = sphi %s1187_s22, %s1380_s22   ;;  %s1134_s21 = sphi %s1185_s21, %s1379_s21   ;;  %s1130_s20 = sphi %s1183_s20, %s1378_s20   ;;  %s1126_s19 = sphi %s1181_s19, %s1377_s19   ;;  %s1122_s18 = sphi %s1179_s18, %s1376_s18  }
   0x5   : > { %p26_p0 = scmp.ge.s32.totalorder %s25_s25, 2  ;;  %p44_p1 = scmp.ne.s32.totalorder %s1126_s19, %s1122_s18 }
   0x6   : > { %p45_p2 = scmp.eq.s32.totalorder %s1146_s24, 0  ;;  %s37_s30 = sadd.s32 1, %s1126_s19 }
   0x7   : > { %s1383_s25 = smov (%p26_p0, %s25_s25), 0  ;;  %s1385_s26 = smov (!%p26_p0, %s28_s26), %s1142_s23 }
   0x8   : > { %p46_p3 = por %p45_p2, %p44_p1  ;;  %p30_p4 = scmp.ge.s32.totalorder %s1385_s26, 2 }
   0x9   : > { %s33_s27 = ssub.s32 %s1138_s22, %s1383_s25  ;;  %p882_p6 = scmp.ge.s32.totalorder %s1146_s24, 4 }
   0xa   : > { %s1387_s26 = smov (%p30_p4, %s1385_s26), 0 }
   0xb   : > { %s32_s28 = ssub.s32 %s1142_s23, %s1387_s26  ;;  %198 = sbr.rel (%p882_p6) target bundleno = 32 (0x20), region = 20 }
   0xc   : > { %s34_s29 = sor.u32 %s33_s27, %s32_s28 }
   0xd   : > { %p35_p5 = scmp.eq.s32.totalorder %s34_s29, 0 }
   0xf   : > { %s1230_s6 = scalar_select %p35_p5, %s1126_s19, %s37_s30  }
  0x12   : > { %201 = sbr.rel (!%p46_p3) target bundleno = 32 (0x20), region = 24  ;;  %s203_s7 = sand.u32 (%p46_p3), 1, %s1126_s19  }
  0x13   : > { %s898_s8 = sshll.u32 (%p46_p3), %s1142_s23, 5  ;;  %s883_s9 = sshll.u32 (%p46_p3), %s203_s7, 7 }
  0x14   : > { %s208_s10 = sadd.s32 (%p46_p3), %s1138_s22, %s898_s8  ;;  %s205_s15 = scalar_lea.vmem (%p46_p3), [#allocation3], %s883_s9 }
  0x15   : > { %s886_s11 = sshll.u32 (%p46_p3), %s208_s10, 3 }
  0x16   : > { %s1239_s14 = scalar_lea.vmem (%p46_p3), %s1370_s0, %s886_s11 }
  0x17   : > { %v268_v0 = vld [vmem:[%s1239_s14] sm:$0xff] (%p46_p3)  ;;  %v270_v1 = vld [vmem:[%s1239_s14 + $0x10] sm:$0xff] (%p46_p3) }
  0x18   : > { %v272_v2 = vld [vmem:[%s1239_s14 + $0x20] sm:$0xff] (%p46_p3)  ;;  %269 = vst [vmem:[%s205_s15] sm:$0xff] (%p46_p3), %v268_v0  ;;  %271 = vst [vmem:[%s205_s15 + $0x8] sm:$0xff] (%p46_p3), %v270_v1  ;;  %v274_v3 = vld [vmem:[%s1239_s14 + $0x30] sm:$0xff] (%p46_p3) }
  0x19   : > { %273 = vst [vmem:[%s205_s15 + $0x10] sm:$0xff] %v272_v2  ;;  %v276_v4 = vld [vmem:[%s1239_s14 + $0x40] sm:$0xff]  ;;  %v278_v5 = vld [vmem:[%s1239_s14 + $0x50] sm:$0xff]  ;;  %275 = vst [vmem:[%s205_s15 + $0x18] sm:$0xff] %v274_v3 }
  0x1a   : > { %277 = vst [vmem:[%s205_s15 + $0x20] sm:$0xff] %v276_v4  ;;  %279 = vst [vmem:[%s205_s15 + $0x28] sm:$0xff] %v278_v5  ;;  %v280_v6 = vld [vmem:[%s1239_s14 + $0x60] sm:$0xff]  ;;  %v282_v7 = vld [vmem:[%s1239_s14 + $0x70] sm:$0xff] }
  0x1b   : > { %v284_v8 = vld [vmem:[%s1239_s14 + $0x80] sm:$0xff]  ;;  %281 = vst [vmem:[%s205_s15 + $0x30] sm:$0xff] %v280_v6  ;;  %283 = vst [vmem:[%s205_s15 + $0x38] sm:$0xff] %v282_v7  ;;  %v286_v9 = vld [vmem:[%s1239_s14 + $0x90] sm:$0xff] }
  0x1c   : > { %285 = vst [vmem:[%s205_s15 + $0x40] sm:$0xff] %v284_v8  ;;  %v288_v10 = vld [vmem:[%s1239_s14 + $0xa0] sm:$0xff]  ;;  %v290_v11 = vld [vmem:[%s1239_s14 + $0xb0] sm:$0xff]  ;;  %287 = vst [vmem:[%s205_s15 + $0x48] sm:$0xff] %v286_v9 }
  0x1d   : > { %289 = vst [vmem:[%s205_s15 + $0x50] sm:$0xff] %v288_v10  ;;  %291 = vst [vmem:[%s205_s15 + $0x58] sm:$0xff] %v290_v11  ;;  %v292_v12 = vld [vmem:[%s1239_s14 + $0xc0] sm:$0xff]  ;;  %v294_v13 = vld [vmem:[%s1239_s14 + $0xd0] sm:$0xff] }
  0x1e   : > { %v296_v14 = vld [vmem:[%s1239_s14 + $0xe0] sm:$0xff]  ;;  %293 = vst [vmem:[%s205_s15 + $0x60] sm:$0xff] %v292_v12  ;;  %295 = vst [vmem:[%s205_s15 + $0x68] sm:$0xff] %v294_v13  ;;  %v298_v15 = vld [vmem:[%s1239_s14 + $0xf0] sm:$0xff] }
  0x1f   : > { %297 = vst [vmem:[%s205_s15 + $0x70] sm:$0xff] %v296_v14  ;;  %299 = vst [vmem:[%s205_s15 + $0x78] sm:$0xff] %v298_v15 }
  0x20 PF: > { %p887_p7 = scmp.ge.s32.totalorder %s1146_s24, 1  ;;  %p313_p8 = scmp.lt.s32.totalorder %s1146_s24, 5 }
  0x22   : > { %p314_p9 = pnand %p887_p7, %p313_p8 }
  0x23   : > { %s320_s16 = sand.u32 (!%p314_p9), 1, %s1122_s18   ;;  %s889_s17 = sshll.u32 (!%p314_p9), %s1130_s20, 4 }
  0x24   : > { %317 = sbr.rel (%p314_p9) target bundleno = 362 (0x16a), region = 66  ;;  %s888_s27 = sshll.u32 (!%p314_p9), %s320_s16, 7 }
  0x25   : > { %p360_p10 = scmp.lt.s32.totalorder (!%p314_p9), %s889_s17, 31  ;;  %s891_s28 = sshll.u32 (!%p314_p9), %s1134_s21, 4 }
  0x26   : > { %p366_p11 = scmp.lt.s32.totalorder (!%p314_p9), %s891_s28, 31  ;;  %p371_p12 = scmp.lt.s32.totalorder (!%p314_p9), %s1134_s21, 1 }
  0x27   : > { %p893_p13 = scmp.ne.s32.totalorder (!%p314_p9), %s1130_s20, 0 }
  0x2b   : > { %s1389_s17 = smov (!%p360_p10, %s889_s17), 31  ;;  %s1391_s28 = smov (!%p366_p11, %s891_s28), 31 }
  0x2c   : > { %s890_s29 = sshll.u32 %s1389_s17, 3  ;;  %s1393_s21 = smov (!%p371_p12, %s1134_s21), 1  ;;  %v1148_v16 = vmov (!%p893_p13), 0.0  }
  0x2d   : > { %s1266_s8 = scalar_lea.vmem %s1371_s1, %s890_s29  ;;  %s892_s9 = sshll.u32 %s1391_s28, 3  ;;  %381 = vst [vmem:[#allocation2] sm:$0xff] (!%p893_p13), %v1148_v16  ;;  %382 = vst [vmem:[#allocation2 + $0x8] sm:$0xff] (!%p893_p13), %v1148_v16 }
  0x2e   : > { %s1274_s11 = scalar_lea.vmem %s1373_s3, %s892_s9  ;;  %s373_s14 = scalar_lea.vmem %s1374_s4, %s1393_s21  ;;  %383 = vst [vmem:[#allocation2 + $0x10] sm:$0xff] (!%p893_p13), %v1148_v16  ;;  %384 = vst [vmem:[#allocation2 + $0x18] sm:$0xff] (!%p893_p13), %v1148_v16 }
  0x2f   : > { %s376_s17 = scalar_lea.vmem %s1375_s5, %s1393_s21  ;;  %s1284_s29 = scalar_lea.vmem [#allocation3], %s888_s27  ;;  %385 = vst [vmem:[#allocation2 + $0x20] sm:$0xff] (!%p893_p13), %v1148_v16  ;;  %386 = vst [vmem:[#allocation2 + $0x28] sm:$0xff] (!%p893_p13), %v1148_v16 }
  0x30   : > { %380 = sbr.rel (%p893_p13) target bundleno = 55 (0x37), region = 74  ;;  %387 = vst [vmem:[#allocation2 + $0x30] sm:$0xff] (!%p893_p13), %v1148_v16  ;;  %388 = vst [vmem:[#allocation2 + $0x38] sm:$0xff] (!%p893_p13), %v1148_v16 }
  0x31   : > { %389 = vst [vmem:[#allocation2 + $0x40] sm:$0xff] (!%p893_p13), %v1148_v16  ;;  %390 = vst [vmem:[#allocation2 + $0x48] sm:$0xff] (!%p893_p13), %v1148_v16 }
  0x32   : > { %391 = vst [vmem:[#allocation2 + $0x50] sm:$0xff] (!%p893_p13), %v1148_v16  ;;  %392 = vst [vmem:[#allocation2 + $0x58] sm:$0xff] (!%p893_p13), %v1148_v16 }
  0x33   : > { %393 = vst [vmem:[#allocation2 + $0x60] sm:$0xff] (!%p893_p13), %v1148_v16  ;;  %394 = vst [vmem:[#allocation2 + $0x68] sm:$0xff] (!%p893_p13), %v1148_v16 }
  0x34   : > { %395 = vst [vmem:[#allocation2 + $0x70] sm:$0xff] (!%p893_p13), %v1148_v16  ;;  %396 = vst [vmem:[#allocation2 + $0x78] sm:$0xff] (!%p893_p13), %v1148_v16 }
  0x37 PF: > { %v429_v17 = vld [vmem:[%s1266_s8] sm:$0xff]  ;;  %v430_v18 = vld [vmem:[%s1266_s8 + $0x8] sm:$0xff]  ;;  %v431_v19 = vld [vmem:[%s1266_s8 + $0x10] sm:$0xff]  ;;  %p894_p0 = scmp.ne.s32.totalorder %s1130_s20, 1 }
  0x38   : > { %v987_v20 = vpack.c.bf16 %v430_v18, %v429_v17  ;;  %v432_v21 = vld [vmem:[%s1266_s8 + $0x18] sm:$0xff]  ;;  %v433_v23 = vld [vmem:[%s1266_s8 + $0x20] sm:$0xff]  ;;  %v434_v24 = vld [vmem:[%s1266_s8 + $0x28] sm:$0xff] }
  0x39   : > { %v991_v22 = vpack.c.bf16 %v432_v21, %v431_v19  ;;  %v995_v25 = vpack.c.bf16 %v434_v24, %v433_v23  ;;  %v413_v26 = vld [vmem:[%s1284_s29] sm:$0xff]  ;;  %v435_v28 = vld [vmem:[%s1266_s8 + $0x30] sm:$0xff]  ;;  %v436_v29 = vld [vmem:[%s1266_s8 + $0x38] sm:$0xff] }
  0x3a   : > { %988 = vmatprep.subr.bf16.mxu0 %v987_v20  ;;  %1019 = vmatprep.subr.bf16.mxu1 %v987_v20  ;;  %v421_v27 = vld [vmem:[%s1284_s29 + $0x40] sm:$0xff]  ;;  %v999_v30 = vpack.c.bf16 %v436_v29, %v435_v28  ;;  %v438_v32 = vld [vmem:[%s1266_s8 + $0x48] sm:$0xff]  ;;  %v439_v34 = vld [vmem:[%s1266_s8 + $0x50] sm:$0xff] }
  0x3b   : > { %990 = vmatpush3.bf16.msra.mxu0 %v987_v20  ;;  %1027 = vmatpush3.bf16.msra.mxu1 %v987_v20  ;;  %v437_v31 = vld [vmem:[%s1266_s8 + $0x40] sm:$0xff]  ;;  %v440_v35 = vld [vmem:[%s1266_s8 + $0x58] sm:$0xff]  ;;  %v442_v38 = vld [vmem:[%s1266_s8 + $0x68] sm:$0xff] }
  0x3c   : > { %992 = vmatprep.subr.bf16.mxu0 %v991_v22  ;;  %1020 = vmatprep.subr.bf16.mxu1 %v991_v22  ;;  %v1003_v33 = vpack.c.bf16 %v438_v32, %v437_v31  ;;  %v1007_v36 = vpack.c.bf16 %v440_v35, %v439_v34  ;;  %v441_v37 = vld [vmem:[%s1266_s8 + $0x60] sm:$0xff]  ;;  %v443_v40 = vld [vmem:[%s1266_s8 + $0x70] sm:$0xff]  ;;  %v444_v41 = vld [vmem:[%s1266_s8 + $0x78] sm:$0xff] }
  0x3d   : > { %963 = vmatprep.mubr.f32.mxu0 %v413_v26  ;;  %975 = vmatprep.mubr.f32.mxu1 %v421_v27  ;;  %v1011_v39 = vpack.c.bf16 %v442_v38, %v441_v37  ;;  %v1015_v42 = vpack.c.bf16 %v444_v41, %v443_v40  ;;  %v414_v43 = vld [vmem:[%s1284_s29 + $0x8] sm:$0xff]  ;;  %v415_v45 = vld [vmem:[%s1284_s29 + $0x10] sm:$0xff]  ;;  %v416_v47 = vld [vmem:[%s1284_s29 + $0x18] sm:$0xff] }
  0x3e   : > { %v422_v44 = vld [vmem:[%s1284_s29 + $0x48] sm:$0xff]  ;;  %v423_v46 = vld [vmem:[%s1284_s29 + $0x50] sm:$0xff]  ;;  %v424_v48 = vld [vmem:[%s1284_s29 + $0x58] sm:$0xff] }
  0x3f   : > { %994 = vmatpush3.bf16.msra.mxu0 %v991_v22  ;;  %1028 = vmatpush3.bf16.msra.mxu1 %v991_v22  ;;  %v417_v49 = vld [vmem:[%s1284_s29 + $0x20] sm:$0xff]  ;;  %v418_v51 = vld [vmem:[%s1284_s29 + $0x28] sm:$0xff]  ;;  %v419_v53 = vld [vmem:[%s1284_s29 + $0x30] sm:$0xff] }
  0x40   : > { %996 = vmatprep.subr.bf16.mxu0 %v995_v25  ;;  %1021 = vmatprep.subr.bf16.mxu1 %v995_v25  ;;  %v425_v50 = vld [vmem:[%s1284_s29 + $0x60] sm:$0xff]  ;;  %v426_v52 = vld [vmem:[%s1284_s29 + $0x68] sm:$0xff]  ;;  %v427_v54 = vld [vmem:[%s1284_s29 + $0x70] sm:$0xff] }
  0x41   : > { %v420_v55 = vld [vmem:[%s1284_s29 + $0x38] sm:$0xff]  ;;  %v398_v57 = vld [vmem:[#allocation2 + $0x8] sm:$0xff]  ;;  %v397_v59 = vld [vmem:[#allocation2] sm:$0xff] }
  0x42   : > { %v428_v56 = vld [vmem:[%s1284_s29 + $0x78] sm:$0xff]  ;;  %v406_v58 = vld [vmem:[#allocation2 + $0x48] sm:$0xff]  ;;  %v405_v60 = vld [vmem:[#allocation2 + $0x40] sm:$0xff] }
  0x43   : > { %998 = vmatpush3.bf16.msra.mxu0 %v995_v25  ;;  %1029 = vmatpush3.bf16.msra.mxu1 %v995_v25  ;;  %v400_v5 = vld [vmem:[#allocation2 + $0x18] sm:$0xff]  ;;  %v399_v7 = vld [vmem:[#allocation2 + $0x10] sm:$0xff]  ;;  %v402_v17 = vld [vmem:[#allocation2 + $0x28] sm:$0xff] }
  0x44   : > { %1000 = vmatprep.subr.bf16.mxu0 %v999_v30  ;;  %1022 = vmatprep.subr.bf16.mxu1 %v999_v30  ;;  %v408_v6 = vld [vmem:[#allocation2 + $0x58] sm:$0xff]  ;;  %v407_v8 = vld [vmem:[#allocation2 + $0x50] sm:$0xff]  ;;  %v410_v18 = vld [vmem:[#allocation2 + $0x68] sm:$0xff] }
  0x45   : > { %v401_v19 = vld [vmem:[#allocation2 + $0x20] sm:$0xff]  ;;  %v404_v29 = vld [vmem:[#allocation2 + $0x38] sm:$0xff]  ;;  %v403_v31 = vld [vmem:[#allocation2 + $0x30] sm:$0xff] }
  0x46   : > { %v409_v20 = vld [vmem:[#allocation2 + $0x60] sm:$0xff]  ;;  %v411_v32 = vld [vmem:[#allocation2 + $0x70] sm:$0xff] }
  0x47   : > { %1002 = vmatpush3.bf16.msra.mxu0 %v999_v30  ;;  %1030 = vmatpush3.bf16.msra.mxu1 %v999_v30  ;;  %v412_v30 = vld [vmem:[#allocation2 + $0x78] sm:$0xff] }
  0x48   : > { %1004 = vmatprep.subr.bf16.mxu0 %v1003_v33  ;;  %1023 = vmatprep.subr.bf16.mxu1 %v1003_v33 }
  0x4b   : > { %1006 = vmatpush3.bf16.msra.mxu0 %v1003_v33  ;;  %1031 = vmatpush3.bf16.msra.mxu1 %v1003_v33 }
  0x4c   : > { %1008 = vmatprep.subr.bf16.mxu0 %v1007_v36  ;;  %1024 = vmatprep.subr.bf16.mxu1 %v1007_v36 }
  0x4f   : > { %1010 = vmatpush3.bf16.msra.mxu0 %v1007_v36  ;;  %1032 = vmatpush3.bf16.msra.mxu1 %v1007_v36 }
  0x50   : > { %1012 = vmatprep.subr.bf16.mxu0 %v1011_v39  ;;  %1025 = vmatprep.subr.bf16.mxu1 %v1011_v39 }
  0x53   : > { %1014 = vmatpush3.bf16.msra.mxu0 %v1011_v39  ;;  %1033 = vmatpush3.bf16.msra.mxu1 %v1011_v39 }
  0x54   : > { %1016 = vmatprep.subr.bf16.mxu0 %v1015_v42  ;;  %1026 = vmatprep.subr.bf16.mxu1 %v1015_v42 }
  0x57   : > { %1018 = vmatpush3.bf16.msra.mxu0 %v1015_v42  ;;  %1034 = vmatpush3.bf16.msra.mxu1 %v1015_v42  ;;  %v895_v42 = vld [vmem:[%s1372_s2] ss:$0 sm:$0xff] (!%p894_p0) }
  0x5a   : > { %964 = vmatmul.mubr.f32.vlgmr.msra.gmra.mrb[0].mxu0 %v414_v43  ;;  %976 = vmatmul.mubr.f32.vlgmr.msra.gmra.mrb[0].mxu1 %v422_v44 }
  0x5b   : > { %966 = vmatprep.mubr.f32.mxu0 %v415_v45  ;;  %978 = vmatprep.mubr.f32.mxu1 %v423_v46 }
  0x5e   : > { %967 = vmatmul.mubr.f32.gmra.mrb[2].mxu0 %v416_v47  ;;  %979 = vmatmul.mubr.f32.gmra.mrb[2].mxu1 %v424_v48 }
  0x5f   : > { %969 = vmatprep.mubr.f32.mxu0 %v417_v49  ;;  %981 = vmatprep.mubr.f32.mxu1 %v425_v50 }
  0x62   : > { %970 = vmatmul.mubr.f32.gmra.mrb[4].mxu0 %v418_v51  ;;  %982 = vmatmul.mubr.f32.gmra.mrb[4].mxu1 %v426_v52 }
  0x63   : > { %972 = vmatprep.mubr.f32.mxu0 %v419_v53  ;;  %984 = vmatprep.mubr.f32.mxu1 %v427_v54 }
  0x66   : > { %973 = vmatmul.mubr.f32.gmra.mrb[6].mxu0 %v420_v55  ;;  %985 = vmatmul.mubr.f32.gmra.mrb[6].mxu1 %v428_v56 }
 0x12d   : > { %v965_v61 = vpop.f32.mrb[0].mxu0  ;;  %v977_v62 = vpop.f32.mrb[0].mxu1 }
 0x12e   : > { %v591_v63 = vadd.f32 %v965_v61, %v398_v57  ;;  %v599_v0 = vadd.f32 %v977_v62, %v406_v58  ;;  %v511_v1 = vpop.f32.mrb[1].mxu0  ;;  %v551_v2 = vpop.f32.mrb[1].mxu1 }
 0x12f   : > { %v590_v3 = vadd.f32 %v511_v1, %v397_v59  ;;  %v598_v4 = vadd.f32 %v551_v2, %v405_v60 }
 0x130   : > { %607 = vst [vmem:[#allocation2 + $0x8] sm:$0xff] %v591_v63  ;;  %615 = vst [vmem:[#allocation2 + $0x48] sm:$0xff] %v599_v0 }
 0x131   : > { %606 = vst [vmem:[#allocation2] sm:$0xff] %v590_v3  ;;  %614 = vst [vmem:[#allocation2 + $0x40] sm:$0xff] %v598_v4  ;;  %v968_v9 = vpop.f32.mrb[2].mxu0  ;;  %v980_v10 = vpop.f32.mrb[2].mxu1 }
 0x132   : > { %v593_v11 = vadd.f32 %v968_v9, %v400_v5  ;;  %v601_v12 = vadd.f32 %v980_v10, %v408_v6  ;;  %v521_v13 = vpop.f32.mrb[3].mxu0  ;;  %v561_v14 = vpop.f32.mrb[3].mxu1 }
 0x133   : > { %v592_v15 = vadd.f32 %v521_v13, %v399_v7  ;;  %v600_v16 = vadd.f32 %v561_v14, %v407_v8 }
 0x134   : > { %609 = vst [vmem:[#allocation2 + $0x18] sm:$0xff] %v593_v11  ;;  %617 = vst [vmem:[#allocation2 + $0x58] sm:$0xff] %v601_v12 }
 0x135   : > { %608 = vst [vmem:[#allocation2 + $0x10] sm:$0xff] %v592_v15  ;;  %616 = vst [vmem:[#allocation2 + $0x50] sm:$0xff] %v600_v16  ;;  %v971_v21 = vpop.f32.mrb[4].mxu0  ;;  %v983_v22 = vpop.f32.mrb[4].mxu1 }
 0x136   : > { %v595_v23 = vadd.f32 %v971_v21, %v402_v17  ;;  %v603_v24 = vadd.f32 %v983_v22, %v410_v18  ;;  %v531_v25 = vpop.f32.mrb[5].mxu0  ;;  %v571_v26 = vpop.f32.mrb[5].mxu1 }
 0x137   : > { %v594_v27 = vadd.f32 %v531_v25, %v401_v19  ;;  %v602_v28 = vadd.f32 %v571_v26, %v409_v20  ;;  %625 = sbr.rel (%p894_p0) target bundleno = 362 (0x16a), region = 78  ;;  %v627_v43 = vld [vmem:[#allocation2 + $0x8] sm:$0xff] (!%p894_p0) }
 0x138   : > { %611 = vst [vmem:[#allocation2 + $0x28] sm:$0xff] %v595_v23  ;;  %619 = vst [vmem:[#allocation2 + $0x68] sm:$0xff] %v603_v24  ;;  %v626_v41 = vld [vmem:[#allocation2] sm:$0xff] (!%p894_p0)  ;;  %v650_v45 = vadd.f32 (!%p894_p0), %v895_v42, %v627_v43  ;;  %v635_v60 = vld [vmem:[#allocation2 + $0x48] sm:$0xff] (!%p894_p0) }
 0x139   : > { %610 = vst [vmem:[#allocation2 + $0x20] sm:$0xff] %v594_v27  ;;  %618 = vst [vmem:[#allocation2 + $0x60] sm:$0xff] %v602_v28  ;;  %v974_v33 = vpop.f32.mrb[6].mxu0  ;;  %v986_v34 = vpop.f32.mrb[6].mxu1  ;;  %v649_v44 = vadd.f32 (!%p894_p0), %v895_v42, %v626_v41  ;;  %v634_v59 = vld [vmem:[#allocation2 + $0x40] sm:$0xff] (!%p894_p0)  ;;  %v658_v7 = vadd.f32 (!%p894_p0), %v895_v42, %v635_v60 }
 0x13a   : > { %v597_v35 = vadd.f32 %v974_v33, %v404_v29  ;;  %v605_v36 = vadd.f32 %v986_v34, %v412_v30  ;;  %v541_v37 = vpop.f32.mrb[7].mxu0  ;;  %v581_v38 = vpop.f32.mrb[7].mxu1  ;;  %666 = vst [vmem:[%s1274_s11 + $0x8] sm:$0xff] (!%p894_p0), %v650_v45  ;;  %v704_v57 = vmul.f32 (!%p894_p0), %v650_v45, %v650_v45  ;;  %v657_v6 = vadd.f32 (!%p894_p0), %v895_v42, %v634_v59 }
 0x13b   : > { %v596_v39 = vadd.f32 %v541_v37, %v403_v31  ;;  %v604_v40 = vadd.f32 %v581_v38, %v411_v32  ;;  %v629_v47 = vld [vmem:[#allocation2 + $0x18] sm:$0xff] (!%p894_p0)  ;;  %665 = vst [vmem:[%s1274_s11] sm:$0xff] (!%p894_p0), %v649_v44  ;;  %v703_v55 = vmul.f32 (!%p894_p0), %v649_v44, %v649_v44  ;;  %v681_v56 = vadd.f32 (!%p894_p0), %v650_v45, %v649_v44 }
 0x13c   : > { %613 = vst [vmem:[#allocation2 + $0x38] sm:$0xff] %v597_v35  ;;  %621 = vst [vmem:[#allocation2 + $0x78] sm:$0xff] %v605_v36  ;;  %v628_v46 = vld [vmem:[#allocation2 + $0x10] sm:$0xff] (!%p894_p0)  ;;  %v652_v50 = vadd.f32 (!%p894_p0), %v895_v42, %v629_v47  ;;  %v637_v0 = vld [vmem:[#allocation2 + $0x58] sm:$0xff] (!%p894_p0)  ;;  %v711_v31 = vmul.f32 (!%p894_p0), %v657_v6, %v657_v6  ;;  %v712_v34 = vmul.f32 (!%p894_p0), %v658_v7, %v658_v7 }
 0x13d   : > { %612 = vst [vmem:[#allocation2 + $0x30] sm:$0xff] %v596_v39  ;;  %620 = vst [vmem:[#allocation2 + $0x70] sm:$0xff] %v604_v40  ;;  %v651_v49 = vadd.f32 (!%p894_p0), %v895_v42, %v628_v46  ;;  %v636_v61 = vld [vmem:[#allocation2 + $0x50] sm:$0xff] (!%p894_p0)  ;;  %v719_v1 = vadd.f32 (!%p894_p0), %v704_v57, %v703_v55  ;;  %v660_v13 = vadd.f32 (!%p894_p0), %v895_v42, %v637_v0 }
 0x13e   : > { %668 = vst [vmem:[%s1274_s11 + $0x18] sm:$0xff] %v652_v50  ;;  %v706_v3 = vmul.f32 %v652_v50, %v652_v50  ;;  %v659_v8 = vadd.f32 %v895_v42, %v636_v61  ;;  %673 = vst [vmem:[%s1274_s11 + $0x40] sm:$0xff] %v657_v6 }
 0x13f   : > { %v631_v52 = vld [vmem:[#allocation2 + $0x28] sm:$0xff]  ;;  %667 = vst [vmem:[%s1274_s11 + $0x10] sm:$0xff] %v651_v49  ;;  %v705_v62 = vmul.f32 %v651_v49, %v651_v49  ;;  %v682_v2 = vadd.f32 %v681_v56, %v651_v49  ;;  %674 = vst [vmem:[%s1274_s11 + $0x48] sm:$0xff] %v658_v7  ;;  %v714_v40 = vmul.f32 %v660_v13, %v660_v13 }
 0x140   : > { %v630_v48 = vld [vmem:[#allocation2 + $0x20] sm:$0xff]  ;;  %v654_v58 = vadd.f32 %v895_v42, %v631_v52  ;;  %v639_v9 = vld [vmem:[#allocation2 + $0x68] sm:$0xff]  ;;  %675 = vst [vmem:[%s1274_s11 + $0x50] sm:$0xff] %v659_v8  ;;  %676 = vst [vmem:[%s1274_s11 + $0x58] sm:$0xff] %v660_v13  ;;  %v713_v37 = vmul.f32 %v659_v8, %v659_v8 }
 0x141   : > { %v653_v51 = vadd.f32 %v895_v42, %v630_v48  ;;  %v638_v5 = vld [vmem:[#allocation2 + $0x60] sm:$0xff]  ;;  %v720_v10 = vadd.f32 %v719_v1, %v705_v62  ;;  %v683_v11 = vadd.f32 %v682_v2, %v652_v50  ;;  %v662_v20 = vadd.f32 %v895_v42, %v639_v9 }
 0x142   : > { %670 = vst [vmem:[%s1274_s11 + $0x28] sm:$0xff] %v654_v58  ;;  %v661_v16 = vadd.f32 %v895_v42, %v638_v5  ;;  %v708_v19 = vmul.f32 %v654_v58, %v654_v58 }
 0x143   : > { %v633_v54 = vld [vmem:[#allocation2 + $0x38] sm:$0xff]  ;;  %669 = vst [vmem:[%s1274_s11 + $0x20] sm:$0xff] %v653_v51  ;;  %v707_v12 = vmul.f32 %v653_v51, %v653_v51  ;;  %v721_v17 = vadd.f32 %v720_v10, %v706_v3  ;;  %v684_v18 = vadd.f32 %v683_v11, %v653_v51  ;;  %678 = vst [vmem:[%s1274_s11 + $0x68] sm:$0xff] %v662_v20 }
 0x144   : > { %v632_v53 = vld [vmem:[#allocation2 + $0x30] sm:$0xff]  ;;  %v656_v4 = vadd.f32 %v895_v42, %v633_v54  ;;  %v641_v15 = vld [vmem:[#allocation2 + $0x78] sm:$0xff]  ;;  %677 = vst [vmem:[%s1274_s11 + $0x60] sm:$0xff] %v661_v16  ;;  %v715_v43 = vmul.f32 %v661_v16, %v661_v16  ;;  %v716_v46 = vmul.f32 %v662_v20, %v662_v20 }
 0x145   : > { %v655_v63 = vadd.f32 %v895_v42, %v632_v53  ;;  %v640_v14 = vld [vmem:[#allocation2 + $0x70] sm:$0xff]  ;;  %v664_v22 = vadd.f32 %v895_v42, %v641_v15  ;;  %v722_v23 = vadd.f32 %v721_v17, %v707_v12  ;;  %v685_v24 = vadd.f32 %v684_v18, %v654_v58 }
 0x146   : > { %672 = vst [vmem:[%s1274_s11 + $0x38] sm:$0xff] %v656_v4  ;;  %v663_v21 = vadd.f32 %v895_v42, %v640_v14  ;;  %v710_v28 = vmul.f32 %v656_v4, %v656_v4 }
 0x147   : > { %671 = vst [vmem:[%s1274_s11 + $0x30] sm:$0xff] %v655_v63  ;;  %v709_v25 = vmul.f32 %v655_v63, %v655_v63  ;;  %680 = vst [vmem:[%s1274_s11 + $0x78] sm:$0xff] %v664_v22  ;;  %v723_v26 = vadd.f32 %v722_v23, %v708_v19  ;;  %v686_v27 = vadd.f32 %v685_v24, %v655_v63 }
 0x148   : > { %679 = vst [vmem:[%s1274_s11 + $0x70] sm:$0xff] %v663_v21  ;;  %v717_v49 = vmul.f32 %v663_v21, %v663_v21  ;;  %v718_v51 = vmul.f32 %v664_v22, %v664_v22 }
 0x149   : > { %v724_v29 = vadd.f32 %v723_v26, %v709_v25  ;;  %v687_v30 = vadd.f32 %v686_v27, %v656_v4 }
 0x14b   : > { %v725_v32 = vadd.f32 %v724_v29, %v710_v28  ;;  %v688_v33 = vadd.f32 %v687_v30, %v657_v6 }
 0x14d   : > { %v726_v35 = vadd.f32 %v725_v32, %v711_v31  ;;  %v689_v36 = vadd.f32 %v688_v33, %v658_v7 }
 0x14f   : > { %v727_v38 = vadd.f32 %v726_v35, %v712_v34  ;;  %v690_v39 = vadd.f32 %v689_v36, %v659_v8 }
 0x151   : > { %v728_v41 = vadd.f32 %v727_v38, %v713_v37  ;;  %v691_v42 = vadd.f32 %v690_v39, %v660_v13 }
 0x153   : > { %v729_v44 = vadd.f32 %v728_v41, %v714_v40  ;;  %v692_v45 = vadd.f32 %v691_v42, %v661_v16 }
 0x155   : > { %v730_v47 = vadd.f32 %v729_v44, %v715_v43  ;;  %v693_v48 = vadd.f32 %v692_v45, %v662_v20 }
 0x157   : > { %v694_v50 = vadd.f32 %v693_v48, %v663_v21  ;;  %v731_v52 = vadd.f32 %v730_v47, %v716_v46 }
 0x159   : > { %v695_v53 = vadd.f32 %v694_v50, %v664_v22  ;;  %v732_v54 = vadd.f32 %v731_v52, %v717_v49 }
 0x15b   : > { %v696_v55 = vrot.slane %v695_v53, 4  ;;  %v733_v56 = vadd.f32 %v732_v54, %v718_v51 }
 0x15d   : > { %v697_v57 = vadd.f32 %v696_v55, %v695_v53  ;;  %v734_v58 = vrot.slane %v733_v56, 4 }
 0x15f   : > { %v698_v59 = vrot.slane %v697_v57, 2  ;;  %v735_v60 = vadd.f32 %v734_v58, %v733_v56 }
 0x161   : > { %v699_v61 = vadd.f32 %v698_v59, %v697_v57  ;;  %v736_v62 = vrot.slane %v735_v60, 2 }
 0x163   : > { %v700_v63 = vrot.slane %v699_v61, 1  ;;  %v737_v0 = vadd.f32 %v736_v62, %v735_v60 }
 0x165   : > { %v701_v1 = vadd.f32 %v700_v63, %v699_v61  ;;  %v738_v2 = vrot.slane %v737_v0, 1 }
 0x167   : > { %702 = vst [vmem:[%s373_s14] sm:$0x1] %v701_v1  ;;  %v739_v3 = vadd.f32 %v738_v2, %v737_v0 }
 0x169   : > { %740 = vst [vmem:[%s376_s17] sm:$0x1] %v739_v3 }
 0x16a PF: > { %s16_s24 = sadd.s32 1, %s1146_s24   ;;  %s1376_s18 = smov %s1126_s19 }
 0x16b   : > { %p13_p1 = scmp.ge.s32.totalorder %s16_s24, 6   ;;  %s1377_s19 = smov %s1230_s6 }
 0x16c   : > { %s1378_s20 = smov %s1138_s22  ;;  %s1379_s21 = smov %s1142_s23 }
 0x16d   : > { %s1380_s22 = smov %s1383_s25  ;;  %s1381_s23 = smov %s1387_s26 }
 0x16e   :  { %15 = sbr.rel (!%p13_p1) target bundleno = 4 (0x4), region = 140 }

// kernel: bayes_head_forward.34
= control target key start
LH: loop header
LB: loop body
LE: loop exit
PB: predicated region body
PF: predicated region fallthrough
CT: control target
= control target key end

     0   :  { %s1003_s12 = smov 0   ;;  %s1381_s0 = inlined_call_operand.vmem [shape: f32[256,256], index: 0, kind: input, shape index: {}]   ;;  %s1382_s1 = inlined_call_operand.vmem [shape: f32[256,256], index: 1, kind: input, shape index: {}]   ;;  %s1383_s2 = inlined_call_operand.vmem [shape: f32[2,1,256], index: 2, kind: output, shape index: {0}]   ;;  %s1384_s3 = inlined_call_operand.vmem [shape: f32[2,1,256], index: 3, kind: output, shape index: {1}]  }
   0x1 LB: > { %s1009_s13 = sadd.s32 4294967295, %s980_s12   ;;  %p760_p0 = scmp.ge.s32.totalorder %s980_s12, 1  ;;  %s980_s12 = sphi %s1003_s12, %s14_s12  }
   0x2   : > { %p154_p1 = scmp.lt.s32.totalorder %s980_s12, 3 }
   0x4   : > { %p155_p2 = pnand %p760_p0, %p154_p1 }
   0x5   : > { %s761_s14 = sshll.u32 (!%p155_p2), %s1009_s13, 4  ;;  %p202_p4 = scmp.lt.s32.totalorder (!%p155_p2), %s1009_s13, 1 }
   0x6   : > { %158 = sbr.rel (%p155_p2) target bundleno = 150 (0x96), region = 28  ;;  %p189_p3 = scmp.lt.s32.totalorder (!%p155_p2), %s761_s14, 31 }
   0xd   : > { %s1388_s14 = smov (!%p189_p3, %s761_s14), 31  ;;  %s1390_s13 = smov (!%p202_p4, %s1009_s13), 1 }
   0xe   : > { %s771_s15 = sshll.u32 %s1388_s14, 4  ;;  %s767_s22 = sshll.u32 %s1390_s13, 1 }
   0xf   : > { %s1022_s18 = scalar_lea.vmem %s1382_s1, %s771_s15  ;;  %s1231_s21 = scalar_lea.vmem %s1381_s0, %s771_s15 }
  0x10   : > { %v210_v0 = vld [vmem:[%s1022_s18] sm:$0xff]  ;;  %v211_v1 = vld [vmem:[%s1022_s18 + $0x8] sm:$0xff]  ;;  %v212_v2 = vld [vmem:[%s1022_s18 + $0x10] sm:$0xff]  ;;  %s205_s25 = scalar_lea.vmem %s1383_s2, %s767_s22  ;;  %s209_s28 = scalar_lea.vmem %s1384_s3, %s767_s22 }
  0x11   : > { %v213_v3 = vld [vmem:[%s1022_s18 + $0x18] sm:$0xff]  ;;  %v242_v4 = vmul.f32 1.442695, %v210_v0  ;;  %v214_v5 = vld [vmem:[%s1022_s18 + $0x20] sm:$0xff]  ;;  %v244_v6 = vmul.f32 1.442695, %v211_v1 }
  0x12   : > { %v215_v7 = vld [vmem:[%s1022_s18 + $0x28] sm:$0xff]  ;;  %v246_v8 = vmul.f32 1.442695, %v212_v2  ;;  %v216_v9 = vld [vmem:[%s1022_s18 + $0x30] sm:$0xff]  ;;  %v248_v10 = vmul.f32 1.442695, %v213_v3 }
  0x13   : > { %782 = vpow2.f32 %v242_v4  ;;  %v217_v11 = vld [vmem:[%s1022_s18 + $0x38] sm:$0xff]  ;;  %v250_v12 = vmul.f32 1.442695, %v214_v5  ;;  %v218_v13 = vld [vmem:[%s1022_s18 + $0x40] sm:$0xff]  ;;  %v252_v14 = vmul.f32 1.442695, %v215_v7 }
  0x14   : > { %784 = vpow2.f32 %v244_v6  ;;  %v219_v15 = vld [vmem:[%s1022_s18 + $0x48] sm:$0xff]  ;;  %v220_v16 = vld [vmem:[%s1022_s18 + $0x50] sm:$0xff]  ;;  %v254_v17 = vmul.f32 1.442695, %v216_v9  ;;  %v221_v18 = vld [vmem:[%s1022_s18 + $0x58] sm:$0xff] }
  0x15   : > { %786 = vpow2.f32 %v246_v8  ;;  %v222_v19 = vld [vmem:[%s1022_s18 + $0x60] sm:$0xff]  ;;  %v256_v20 = vmul.f32 1.442695, %v217_v11  ;;  %v223_v21 = vld [vmem:[%s1022_s18 + $0x68] sm:$0xff]  ;;  %v258_v22 = vmul.f32 1.442695, %v218_v13 }
  0x16   : > { %788 = vpow2.f32 %v248_v10  ;;  %v224_v23 = vld [vmem:[%s1022_s18 + $0x70] sm:$0xff]  ;;  %v260_v24 = vmul.f32 1.442695, %v219_v15  ;;  %v262_v25 = vmul.f32 1.442695, %v220_v16  ;;  %v225_v26 = vld [vmem:[%s1022_s18 + $0x78] sm:$0xff] }
  0x17   : > { %790 = vpow2.f32 %v250_v12  ;;  %v264_v27 = vmul.f32 1.442695, %v221_v18  ;;  %v266_v28 = vmul.f32 1.442695, %v222_v19  ;;  %v226_v29 = vld [vmem:[%s1022_s18 + $0x80] sm:$0xff]  ;;  %v227_v32 = vld [vmem:[%s1022_s18 + $0x88] sm:$0xff] }
  0x18   : > { %792 = vpow2.f32 %v252_v14  ;;  %v268_v30 = vmul.f32 1.442695, %v223_v21  ;;  %v270_v33 = vmul.f32 1.442695, %v224_v23  ;;  %v228_v35 = vld [vmem:[%s1022_s18 + $0x90] sm:$0xff]  ;;  %v229_v38 = vld [vmem:[%s1022_s18 + $0x98] sm:$0xff] }
  0x19   : > { %794 = vpow2.f32 %v254_v17  ;;  %v272_v36 = vmul.f32 1.442695, %v225_v26  ;;  %v274_v39 = vmul.f32 1.442695, %v226_v29  ;;  %v230_v41 = vld [vmem:[%s1022_s18 + $0xa0] sm:$0xff]  ;;  %v231_v44 = vld [vmem:[%s1022_s18 + $0xa8] sm:$0xff]  ;;  %v580_v26 = vlaneseq }
  0x1a   : > { %796 = vpow2.f32 %v256_v20  ;;  %v276_v42 = vmul.f32 1.442695, %v227_v32  ;;  %v278_v45 = vmul.f32 1.442695, %v228_v35  ;;  %v232_v47 = vld [vmem:[%s1022_s18 + $0xb0] sm:$0xff]  ;;  %v233_v50 = vld [vmem:[%s1022_s18 + $0xb8] sm:$0xff] }
  0x1b   : > { %798 = vpow2.f32 %v258_v22  ;;  %v280_v48 = vmul.f32 1.442695, %v229_v38  ;;  %v282_v51 = vmul.f32 1.442695, %v230_v41  ;;  %v234_v53 = vld [vmem:[%s1022_s18 + $0xc0] sm:$0xff]  ;;  %v235_v56 = vld [vmem:[%s1022_s18 + $0xc8] sm:$0xff] }
  0x1c   : > { %800 = vpow2.f32 %v260_v24  ;;  %v284_v54 = vmul.f32 1.442695, %v231_v44  ;;  %v286_v57 = vmul.f32 1.442695, %v232_v47  ;;  %v236_v59 = vld [vmem:[%s1022_s18 + $0xd0] sm:$0xff]  ;;  %v237_v62 = vld [vmem:[%s1022_s18 + $0xd8] sm:$0xff] }
  0x1d   : > { %v1041_v31 = vpop.eup %782  ;;  %802 = vpow2.f32 %v262_v25  ;;  %v288_v60 = vmul.f32 1.442695, %v233_v50  ;;  %v290_v63 = vmul.f32 1.442695, %v234_v53  ;;  %v238_v1 = vld [vmem:[%s1022_s18 + $0xe0] sm:$0xff]  ;;  %v239_v4 = vld [vmem:[%s1022_s18 + $0xe8] sm:$0xff] }
  0x1e   : > { %v1044_v34 = vpop.eup %784  ;;  %804 = vpow2.f32 %v264_v27  ;;  %v292_v2 = vmul.f32 1.442695, %v235_v56  ;;  %v294_v5 = vmul.f32 1.442695, %v236_v59  ;;  %v240_v7 = vld [vmem:[%s1022_s18 + $0xf0] sm:$0xff]  ;;  %v241_v10 = vld [vmem:[%s1022_s18 + $0xf8] sm:$0xff] }
  0x1f   : > { %v1047_v37 = vpop.eup %786  ;;  %806 = vpow2.f32 %v266_v28  ;;  %v296_v8 = vmul.f32 1.442695, %v237_v62  ;;  %v298_v11 = vmul.f32 1.442695, %v238_v1  ;;  %v300_v13 = vmul.f32 1.442695, %v239_v4 }
  0x20   : > { %v1050_v40 = vpop.eup %788  ;;  %808 = vpow2.f32 %v268_v30  ;;  %v302_v15 = vmul.f32 1.442695, %v240_v7  ;;  %v304_v17 = vmul.f32 1.442695, %v241_v10  ;;  %v306_v19 = vadd.f32 1.0, %v1041_v31 }
  0x21   : > { %v1053_v43 = vpop.eup %790  ;;  %810 = vpow2.f32 %v270_v33  ;;  %v307_v21 = vadd.f32 1.0, %v1044_v34  ;;  %v308_v23 = vadd.f32 1.0, %v1047_v37  ;;  %v982_v24 = vmov 1966171168  }
  0x22   : > { %v1056_v46 = vpop.eup %792  ;;  %812 = vpow2.f32 %v272_v36  ;;  %v578_v25 = vunpack.c.l.s4 %v982_v24  ;;  %v309_v28 = vadd.f32 1.0, %v1050_v40  ;;  %v310_v30 = vadd.f32 1.0, %v1053_v43 }
  0x23   : > { %v1059_v49 = vpop.eup %794  ;;  %814 = vpow2.f32 %v274_v39  ;;  %v311_v32 = vadd.f32 1.0, %v1056_v46  ;;  %v581_v36 = vshrl.u32 %v580_v26, 7  ;;  %vm1354_vm0 = vcmp.lt.s32.totalorder %v580_v26, 256 }
  0x24   : > { %v1062_v52 = vpop.eup %796  ;;  %816 = vpow2.f32 %v276_v42  ;;  %v312_v34 = vadd.f32 1.0, %v1059_v49  ;;  %v579_v35 = vunpack.c.0.s8 %v578_v25 }
  0x25   : > { %v1065_v55 = vpop.eup %798  ;;  %818 = vpow2.f32 %v278_v45  ;;  %v313_v38 = vadd.f32 1.0, %v1062_v52 }
  0x26   : > { %v1068_v58 = vpop.eup %800  ;;  %820 = vpow2.f32 %v280_v48  ;;  %v314_v40 = vadd.f32 1.0, %v1065_v55  ;;  %v1092_v45 = vsub.s32 %v579_v35, %v581_v36 }
  0x27   : > { %v1071_v61 = vpop.eup %802  ;;  %822 = vpow2.f32 %v282_v51  ;;  %v315_v42 = vadd.f32 1.0, %v1068_v58 }
  0x28   : > { %v1074_v0 = vpop.eup %804  ;;  %824 = vpow2.f32 %v284_v54  ;;  %v316_v44 = vadd.f32 1.0, %v1071_v61 }
  0x29   : > { %v807_v3 = vpop.eup %806  ;;  %826 = vpow2.f32 %v286_v57  ;;  %v317_v47 = vadd.f32 1.0, %v1074_v0 }
  0x2a   : > { %v809_v6 = vpop.eup %808  ;;  %828 = vpow2.f32 %v288_v60  ;;  %v318_v48 = vadd.f32 1.0, %v807_v3 }
  0x2b   : > { %v811_v9 = vpop.eup %810  ;;  %830 = vpow2.f32 %v290_v63  ;;  %v319_v49 = vadd.f32 1.0, %v809_v6 }
  0x2c   : > { %v813_v12 = vpop.eup %812  ;;  %832 = vpow2.f32 %v292_v2  ;;  %v320_v51 = vadd.f32 1.0, %v811_v9 }
  0x2d   : > { %v815_v14 = vpop.eup %814  ;;  %834 = vpow2.f32 %v294_v5  ;;  %v321_v52 = vadd.f32 1.0, %v813_v12 }
  0x2e   : > { %v817_v16 = vpop.eup %816  ;;  %836 = vpow2.f32 %v296_v8  ;;  %v322_v53 = vadd.f32 1.0, %v815_v14 }
  0x2f   : > { %v819_v18 = vpop.eup %818  ;;  %838 = vpow2.f32 %v298_v11  ;;  %v323_v55 = vadd.f32 1.0, %v817_v16 }
  0x30   : > { %v821_v20 = vpop.eup %820  ;;  %840 = vpow2.f32 %v300_v13  ;;  %v324_v56 = vadd.f32 1.0, %v819_v18 }
  0x31   : > { %v823_v22 = vpop.eup %822  ;;  %842 = vpow2.f32 %v302_v15  ;;  %v325_v57 = vadd.f32 1.0, %v821_v20 }
  0x32   : > { %v825_v27 = vpop.eup %824  ;;  %844 = vpow2.f32 %v304_v17  ;;  %v326_v59 = vadd.f32 1.0, %v823_v22 }
  0x33   : > { %v827_v29 = vpop.eup %826  ;;  %846 = vlog2.f32 %v306_v19  ;;  %v327_v60 = vadd.f32 1.0, %v825_v27 }
  0x34   : > { %v829_v31 = vpop.eup %828  ;;  %848 = vlog2.f32 %v307_v21  ;;  %v328_v61 = vadd.f32 1.0, %v827_v29 }
  0x35   : > { %v831_v33 = vpop.eup %830  ;;  %850 = vlog2.f32 %v308_v23  ;;  %v329_v63 = vadd.f32 1.0, %v829_v31 }
  0x36   : > { %v833_v37 = vpop.eup %832  ;;  %852 = vlog2.f32 %v309_v28  ;;  %v1095_v0 = vadd.f32 1.0, %v831_v33 }
  0x37   : > { %v835_v39 = vpop.eup %834  ;;  %854 = vlog2.f32 %v310_v30  ;;  %v1097_v1 = vadd.f32 1.0, %v833_v37 }
  0x38   : > { %v837_v41 = vpop.eup %836  ;;  %856 = vlog2.f32 %v311_v32  ;;  %v1099_v3 = vadd.f32 1.0, %v835_v39 }
  0x39   : > { %v839_v43 = vpop.eup %838  ;;  %858 = vlog2.f32 %v312_v34  ;;  %v1101_v4 = vadd.f32 1.0, %v837_v41 }
  0x3a   : > { %v841_v46 = vpop.eup %840  ;;  %860 = vlog2.f32 %v313_v38  ;;  %v1105_v7 = vadd.f32 1.0, %v839_v43 }
  0x3b   : > { %v843_v50 = vpop.eup %842  ;;  %862 = vlog2.f32 %v314_v40  ;;  %v1111_v11 = vadd.f32 1.0, %v841_v46 }
  0x3c   : > { %v845_v54 = vpop.eup %844  ;;  %864 = vlog2.f32 %v315_v42  ;;  %v1113_v12 = vadd.f32 1.0, %v843_v50 }
  0x3d   : > { %v847_v58 = vpop.eup %846  ;;  %866 = vlog2.f32 %v316_v44  ;;  %v1117_v15 = vadd.f32 1.0, %v845_v54 }
  0x3e   : > { %v849_v62 = vpop.eup %848  ;;  %868 = vlog2.f32 %v317_v47  ;;  %v1103_v5 = vmul.f32 0.6931472, %v847_v58 }
  0x3f   : > { %v851_v2 = vpop.eup %850  ;;  %870 = vlog2.f32 %v318_v48  ;;  %v1107_v8 = vmul.f32 0.6931472, %v849_v62 }
  0x40   : > { %v853_v6 = vpop.eup %852  ;;  %v1109_v9 = vmul.f32 0.6931472, %v851_v2  ;;  %872 = vlog2.f32 %v319_v49  ;;  %v434_v20 = vmax.f32 %v1103_v5, 1e-10 }
  0x41   : > { %v855_v10 = vpop.eup %854  ;;  %v1115_v13 = vmul.f32 0.6931472, %v853_v6  ;;  %874 = vlog2.f32 %v320_v51  ;;  %v435_v24 = vmax.f32 %v1107_v8, 1e-10 }
  0x42   : > { %v857_v14 = vpop.eup %856  ;;  %v1119_v16 = vmul.f32 0.6931472, %v855_v10  ;;  %876 = vlog2.f32 %v321_v52  ;;  %v530_v17 = vadd.f32 %v1109_v9, %v1103_v5  ;;  %v436_v29 = vmax.f32 %v1109_v9, 1e-10 }
  0x43   : > { %v859_v18 = vpop.eup %858  ;;  %v1123_v19 = vmul.f32 0.6931472, %v857_v14  ;;  %878 = vlog2.f32 %v322_v53  ;;  %v551_v21 = vadd.f32 %v1115_v13, %v1107_v8  ;;  %v437_v33 = vmax.f32 %v1115_v13, 1e-10 }
  0x44   : > { %v861_v22 = vpop.eup %860  ;;  %v1128_v23 = vmul.f32 0.6931472, %v859_v18  ;;  %880 = vlog2.f32 %v323_v55  ;;  %v531_v25 = vadd.f32 %v530_v17, %v1119_v16  ;;  %v438_v37 = vmax.f32 %v1119_v16, 1e-10 }
  0x45   : > { %v863_v27 = vpop.eup %862  ;;  %v1132_v28 = vmul.f32 0.6931472, %v861_v22  ;;  %882 = vlog2.f32 %v324_v56  ;;  %v552_v30 = vadd.f32 %v551_v21, %v1123_v19  ;;  %v439_v41 = vmax.f32 %v1123_v19, 1e-10 }
  0x46   : > { %v865_v31 = vpop.eup %864  ;;  %v1136_v32 = vmul.f32 0.6931472, %v863_v27  ;;  %884 = vlog2.f32 %v325_v57  ;;  %v532_v34 = vadd.f32 %v531_v25, %v1128_v23  ;;  %v440_v46 = vmax.f32 %v1128_v23, 1e-10 }
  0x47   : > { %v867_v35 = vpop.eup %866  ;;  %v1140_v36 = vmul.f32 0.6931472, %v865_v31  ;;  %886 = vlog2.f32 %v326_v59  ;;  %v553_v38 = vadd.f32 %v552_v30, %v1132_v28  ;;  %v441_v50 = vmax.f32 %v1132_v28, 1e-10  ;;  %v403_v28 = vld [vmem:[%s1231_s21 + $0x8] sm:$0xff] }
  0x48   : > { %v869_v39 = vpop.eup %868  ;;  %v1144_v40 = vmul.f32 0.6931472, %v867_v35  ;;  %888 = vlog2.f32 %v327_v60  ;;  %v533_v42 = vadd.f32 %v532_v34, %v1136_v32  ;;  %v442_v54 = vmax.f32 %v1136_v32, 1e-10  ;;  %v404_v32 = vld [vmem:[%s1231_s21 + $0x10] sm:$0xff] }
  0x49   : > { %v871_v43 = vpop.eup %870  ;;  %v1148_v44 = vmul.f32 0.6931472, %v869_v39  ;;  %890 = vlog2.f32 %v328_v61  ;;  %v554_v47 = vadd.f32 %v553_v38, %v1140_v36  ;;  %v443_v58 = vmax.f32 %v1140_v36, 1e-10 }
  0x4a   : > { %v873_v48 = vpop.eup %872  ;;  %v1152_v49 = vmul.f32 0.6931472, %v871_v43  ;;  %892 = vlog2.f32 %v329_v63  ;;  %v534_v51 = vadd.f32 %v533_v42, %v1144_v40  ;;  %v444_v62 = vmax.f32 %v1144_v40, 1e-10 }
  0x4b   : > { %v875_v52 = vpop.eup %874  ;;  %v1156_v53 = vmul.f32 0.6931472, %v873_v48  ;;  %894 = vlog2.f32 %v1095_v0  ;;  %v555_v55 = vadd.f32 %v554_v47, %v1148_v44 }
  0x4c   : > { %v877_v56 = vpop.eup %876  ;;  %v1161_v57 = vmul.f32 0.6931472, %v875_v52  ;;  %896 = vlog2.f32 %v1097_v1  ;;  %v535_v59 = vadd.f32 %v534_v51, %v1152_v49  ;;  %v445_v1 = vmax.f32 %v1148_v44, 1e-10 }
  0x4d   : > { %v879_v60 = vpop.eup %878  ;;  %v1166_v61 = vmul.f32 0.6931472, %v877_v56  ;;  %898 = vlog2.f32 %v1099_v3  ;;  %v556_v63 = vadd.f32 %v555_v55, %v1156_v53  ;;  %v446_v3 = vmax.f32 %v1152_v49, 1e-10 }
  0x4e   : > { %v881_v0 = vpop.eup %880  ;;  %v1171_v2 = vmul.f32 0.6931472, %v879_v60  ;;  %900 = vlog2.f32 %v1101_v4  ;;  %v536_v6 = vadd.f32 %v535_v59, %v1161_v57  ;;  %v447_v4 = vmax.f32 %v1156_v53, 1e-10 }
  0x4f   : > { %v883_v10 = vpop.eup %882  ;;  %v1176_v14 = vmul.f32 0.6931472, %v881_v0  ;;  %902 = vlog2.f32 %v1105_v7  ;;  %v557_v17 = vadd.f32 %v556_v63, %v1166_v61  ;;  %v448_v7 = vmax.f32 %v1161_v57, 1e-10 }
  0x50   : > { %v885_v18 = vpop.eup %884  ;;  %v1181_v21 = vmul.f32 0.6931472, %v883_v10  ;;  %904 = vlog2.f32 %v1111_v11  ;;  %v537_v22 = vadd.f32 %v536_v6, %v1171_v2  ;;  %v449_v11 = vmax.f32 %v1166_v61, 1e-10 }
  0x51   : > { %v887_v25 = vpop.eup %886  ;;  %v1186_v27 = vmul.f32 0.6931472, %v885_v18  ;;  %906 = vlog2.f32 %v1113_v12  ;;  %v558_v30 = vadd.f32 %v557_v17, %v1176_v14  ;;  %v450_v42 = vmax.f32 %v1171_v2, 1e-10 }
  0x52   : > { %v889_v31 = vpop.eup %888  ;;  %v1191_v34 = vmul.f32 0.6931472, %v887_v25  ;;  %908 = vlog2.f32 %v1117_v15  ;;  %v538_v35 = vadd.f32 %v537_v22, %v1181_v21  ;;  %v451_v48 = vmax.f32 %v1176_v14, 1e-10 }
  0x53   : > { %v891_v38 = vpop.eup %890  ;;  %v1196_v39 = vmul.f32 0.6931472, %v889_v31  ;;  %910 = vrcp.f32 %v434_v20  ;;  %v559_v12 = vadd.f32 %v558_v30, %v1186_v27  ;;  %v452_v55 = vmax.f32 %v1181_v21, 1e-10  ;;  %v402_v30 = vld [vmem:[%s1231_s21] sm:$0xff] }
  0x54   : > { %v893_v43 = vpop.eup %892  ;;  %v1202_v47 = vmul.f32 0.6931472, %v891_v38  ;;  %912 = vrcp.f32 %v435_v24  ;;  %v539_v15 = vadd.f32 %v538_v35, %v1191_v34  ;;  %v453_v59 = vmax.f32 %v1186_v27, 1e-10 }
  0x55   : > { %v895_v51 = vpop.eup %894  ;;  %v1208_v52 = vmul.f32 0.6931472, %v893_v43  ;;  %914 = vrcp.f32 %v436_v29  ;;  %v560_v5 = vadd.f32 %v559_v12, %v1196_v39  ;;  %v454_v63 = vmax.f32 %v1191_v34, 1e-10 }
  0x56   : > { %v897_v20 = vpop.eup %896  ;;  %v1214_v56 = vmul.f32 0.6931472, %v895_v51  ;;  %916 = vrcp.f32 %v437_v33  ;;  %v540_v8 = vadd.f32 %v539_v15, %v1202_v47  ;;  %v455_v33 = vmax.f32 %v1196_v39, 1e-10 }
  0x57   : > { %v899_v24 = vpop.eup %898  ;;  %v1220_v60 = vmul.f32 0.6931472, %v897_v20  ;;  %918 = vrcp.f32 %v438_v37  ;;  %v561_v9 = vadd.f32 %v560_v5, %v1208_v52  ;;  %v456_v6 = vmax.f32 %v1202_v47, 1e-10  ;;  %v405_v5 = vld [vmem:[%s1231_s21 + $0x18] sm:$0xff] }
  0x58   : > { %v901_v29 = vpop.eup %900  ;;  %v1233_v13 = vmul.f32 0.6931472, %v899_v24  ;;  %920 = vrcp.f32 %v439_v41  ;;  %v541_v16 = vadd.f32 %v540_v8, %v1214_v56  ;;  %v457_v22 = vmax.f32 %v1208_v52, 1e-10  ;;  %v406_v24 = vld [vmem:[%s1231_s21 + $0x20] sm:$0xff] }
  0x59   : > { %v903_v37 = vpop.eup %902  ;;  %v1239_v0 = vmul.f32 0.6931472, %v901_v29  ;;  %922 = vrcp.f32 %v440_v46  ;;  %v562_v10 = vadd.f32 %v561_v9, %v1220_v60  ;;  %v458_v23 = vmax.f32 %v1214_v56, 1e-10 }
  0x5a   : > { %v905_v17 = vpop.eup %904  ;;  %v1245_v18 = vmul.f32 0.6931472, %v903_v37  ;;  %924 = vrcp.f32 %v441_v50  ;;  %v542_v19 = vadd.f32 %v541_v16, %v1233_v13  ;;  %v459_v50 = vmax.f32 %v1220_v60, 1e-10  ;;  %v407_v16 = vld [vmem:[%s1231_s21 + $0x28] sm:$0xff] }
  0x5b   : > { %v907_v41 = vpop.eup %906  ;;  %v1251_v25 = vmul.f32 0.6931472, %v905_v17  ;;  %926 = vrcp.f32 %v442_v54  ;;  %v563_v46 = vadd.f32 %v562_v10, %v1239_v0  ;;  %v460_v54 = vmax.f32 %v1233_v13, 1e-10  ;;  %v408_v17 = vld [vmem:[%s1231_s21 + $0x30] sm:$0xff] }
  0x5c   : > { %v909_v31 = vpop.eup %908  ;;  %v1258_v35 = vmul.f32 0.6931472, %v907_v41  ;;  %928 = vrcp.f32 %v443_v58  ;;  %v543_v38 = vadd.f32 %v542_v19, %v1245_v18  ;;  %v461_v36 = vmax.f32 %v1239_v0, 1e-10 }
  0x5d   : > { %v911_v12 = vpop.eup %910  ;;  %v1265_v43 = vmul.f32 0.6931472, %v909_v31  ;;  %930 = vrcp.f32 %v444_v62  ;;  %v564_v15 = vadd.f32 %v563_v46, %v1251_v25  ;;  %v462_v9 = vmax.f32 %v1245_v18, 1e-10 }
  0x5e   : > { %v913_v51 = vpop.eup %912  ;;  %v467_v20 = vmul.f32 %v911_v12, %v402_v30  ;;  %932 = vrcp.f32 %v445_v1  ;;  %v544_v58 = vadd.f32 %v543_v38, %v1258_v35  ;;  %v463_v37 = vmax.f32 %v1251_v25, 1e-10  ;;  %v409_v30 = vld [vmem:[%s1231_s21 + $0x38] sm:$0xff] }
  0x5f   : > { %v915_v8 = vpop.eup %914  ;;  %v469_v40 = vmul.f32 %v913_v51, %v403_v28  ;;  %934 = vrcp.f32 %v446_v3  ;;  %v565_v62 = vadd.f32 %v564_v15, %v1265_v43  ;;  %v464_v19 = vmax.f32 %v1258_v35, 1e-10  ;;  %v410_v28 = vld [vmem:[%s1231_s21 + $0x40] sm:$0xff]  ;;  %v425_v25 = vld [vmem:[%s1231_s21 + $0xb8] sm:$0xff] }
  0x60   : > { %v917_v29 = vpop.eup %916  ;;  %v471_v44 = vmul.f32 %v915_v8, %v404_v32  ;;  %936 = vrcp.f32 %v447_v4  ;;  %v545_v1 = vrot.slane %v544_v58, 4  ;;  %v411_v32 = vld [vmem:[%s1231_s21 + $0x48] sm:$0xff]  ;;  %v413_v8 = vld [vmem:[%s1231_s21 + $0x58] sm:$0xff] }
  0x61   : > { %v919_v10 = vpop.eup %918  ;;  %v473_v41 = vmul.f32 %v917_v29, %v405_v5  ;;  %938 = vrcp.f32 %v448_v7  ;;  %v566_v49 = vrot.slane %v565_v62, 4  ;;  %v412_v5 = vld [vmem:[%s1231_s21 + $0x50] sm:$0xff] }
  0x62   : > { %v921_v3 = vpop.eup %920  ;;  %v475_v46 = vmul.f32 %v919_v10, %v406_v24  ;;  %940 = vrcp.f32 %v449_v11  ;;  %v546_v53 = vadd.f32 %v545_v1, %v544_v58  ;;  %v597_v4 = vadd.f32 %v471_v44, %v467_v20  ;;  %v415_v44 = vld [vmem:[%s1231_s21 + $0x68] sm:$0xff] }
  0x63   : > { %v923_v31 = vpop.eup %922  ;;  %v477_v38 = vmul.f32 %v921_v3, %v407_v16  ;;  %942 = vrcp.f32 %v450_v42  ;;  %v567_v57 = vadd.f32 %v566_v49, %v565_v62  ;;  %v618_v12 = vadd.f32 %v473_v41, %v469_v40  ;;  %v414_v62 = vld [vmem:[%s1231_s21 + $0x60] sm:$0xff]  ;;  %v417_v3 = vld [vmem:[%s1231_s21 + $0x78] sm:$0xff] }
  0x64   : > { %v925_v7 = vpop.eup %924  ;;  %v479_v15 = vmul.f32 %v923_v31, %v408_v17  ;;  %944 = vrcp.f32 %v451_v48  ;;  %v547_v61 = vrot.slane %v546_v53, 2  ;;  %v598_v11 = vadd.f32 %v597_v4, %v475_v46  ;;  %v416_v17 = vld [vmem:[%s1231_s21 + $0x70] sm:$0xff] }
  0x65   : > { %v927_v51 = vpop.eup %926  ;;  %v481_v20 = vmul.f32 %v925_v7, %v409_v30  ;;  %946 = vrcp.f32 %v452_v55  ;;  %v568_v2 = vrot.slane %v567_v57, 2  ;;  %v619_v42 = vadd.f32 %v618_v12, %v477_v38  ;;  %v420_v12 = vld [vmem:[%s1231_s21 + $0x90] sm:$0xff] }
  0x66   : > { %v929_v58 = vpop.eup %928  ;;  %v483_v24 = vmul.f32 %v927_v51, %v410_v28  ;;  %948 = vrcp.f32 %v453_v59  ;;  %v548_v14 = vadd.f32 %v547_v61, %v546_v53  ;;  %v599_v48 = vadd.f32 %v598_v11, %v479_v15  ;;  %v418_v53 = vld [vmem:[%s1231_s21 + $0x80] sm:$0xff]  ;;  %v419_v28 = vld [vmem:[%s1231_s21 + $0x88] sm:$0xff]  ;;  %v421_v15 = vld [vmem:[%s1231_s21 + $0x98] sm:$0xff] }
  0x67   : > { %v931_v40 = vpop.eup %930  ;;  %v485_v29 = vmul.f32 %v929_v58, %v411_v32  ;;  %950 = vrcp.f32 %v454_v63  ;;  %v569_v21 = vadd.f32 %v568_v2, %v567_v57  ;;  %v620_v55 = vadd.f32 %v619_v42, %v481_v20  ;;  %v422_v51 = vld [vmem:[%s1231_s21 + $0xa0] sm:$0xff]  ;;  %v423_v2 = vld [vmem:[%s1231_s21 + $0xa8] sm:$0xff]  ;;  %v424_v42 = vld [vmem:[%s1231_s21 + $0xb0] sm:$0xff] }
  0x68   : > { %v933_v16 = vpop.eup %932  ;;  %v487_v1 = vmul.f32 %v931_v40, %v412_v5  ;;  %952 = vrcp.f32 %v455_v33  ;;  %v549_v27 = vrot.slane %v548_v14, 1  ;;  %v600_v59 = vadd.f32 %v599_v48, %v483_v24 }
  0x69   : > { %v935_v10 = vpop.eup %934  ;;  %v489_v41 = vmul.f32 %v933_v16, %v413_v8  ;;  %954 = vrcp.f32 %v456_v6  ;;  %v570_v34 = vrot.slane %v569_v21, 1  ;;  %v621_v63 = vadd.f32 %v620_v55, %v485_v29 }
  0x6a   : > { %v937_v49 = vpop.eup %936  ;;  %v491_v30 = vmul.f32 %v935_v10, %v414_v62  ;;  %956 = vrcp.f32 %v457_v22  ;;  %v550_v39 = vadd.f32 %v549_v27, %v548_v14  ;;  %v601_v33 = vadd.f32 %v600_v59, %v487_v1  ;;  %v426_v14 = vld [vmem:[%s1231_s21 + $0xc0] sm:$0xff]  ;;  %v428_v1 = vld [vmem:[%s1231_s21 + $0xd0] sm:$0xff]  ;;  %v429_v10 = vld [vmem:[%s1231_s21 + $0xd8] sm:$0xff] }
  0x6b   : > { %v939_v46 = vpop.eup %938  ;;  %v493_v4 = vmul.f32 %v937_v49, %v415_v44  ;;  %958 = vrcp.f32 %v458_v23  ;;  %v571_v47 = vadd.f32 %v570_v34, %v569_v21  ;;  %v622_v6 = vadd.f32 %v621_v63, %v489_v41  ;;  %v427_v21 = vld [vmem:[%s1231_s21 + $0xc8] sm:$0xff]  ;;  %v430_v63 = vld [vmem:[%s1231_s21 + $0xe0] sm:$0xff] }
  0x6c   : > { %v941_v31 = vpop.eup %940  ;;  %v495_v38 = vmul.f32 %v939_v46, %v416_v17  ;;  %960 = vrcp.f32 %v459_v50  ;;  %v572_v52 = vmul.f32 0.0078125, %v550_v39  ;;  %v602_v22 = vadd.f32 %v601_v33, %v491_v30  ;;  %v431_v39 = vld [vmem:[%s1231_s21 + $0xe8] sm:$0xff] }
  0x6d   : > { %v943_v57 = vpop.eup %942  ;;  %v497_v7 = vmul.f32 %v941_v31, %v417_v3  ;;  %962 = vrcp.f32 %v460_v54  ;;  %v573_v56 = vmul.f32 0.0078125, %v571_v47  ;;  %v623_v23 = vadd.f32 %v622_v6, %v493_v4  ;;  %v432_v4 = vld [vmem:[%s1231_s21 + $0xf0] sm:$0xff] }
  0x6e   : > { %v945_v32 = vpop.eup %944  ;;  %v465_v61 = vmax.f32 %v1265_v43, 1e-10  ;;  %v499_v11 = vmul.f32 %v943_v57, %v418_v53  ;;  %964 = vrcp.f32 %v461_v36  ;;  %v603_v60 = vadd.f32 %v602_v22, %v495_v38 }
  0x6f   : > { %v947_v50 = vpop.eup %946  ;;  %v501_v5 = vmul.f32 %v945_v32, %v419_v28  ;;  %966 = vrcp.f32 %v462_v9  ;;  %v576_v13 = vcombine.low %v572_v52, %v573_v56  ;;  %v624_v54 = vadd.f32 %v623_v23, %v497_v7  ;;  %v433_v28 = vld [vmem:[%s1231_s21 + $0xf8] sm:$0xff] }
  0x70   : > { %v949_v20 = vpop.eup %948  ;;  %v503_v43 = vmul.f32 %v947_v50, %v420_v12  ;;  %968 = vrcp.f32 %v463_v37  ;;  %v604_v0 = vadd.f32 %v603_v60, %v499_v11 }
  0x71   : > { %v951_v36 = vpop.eup %950  ;;  %v505_v58 = vmul.f32 %v949_v20, %v421_v15  ;;  %970 = vrcp.f32 %v464_v19  ;;  %v583_v18 = vrot.slane %v576_v13, %v1092_v45  ;;  %v625_v9 = vadd.f32 %v624_v54, %v501_v5 }
  0x72   : > { %v953_v8 = vpop.eup %952  ;;  %v507_v37 = vmul.f32 %v951_v36, %v422_v51  ;;  %972 = vrcp.f32 %v465_v61  ;;  %v605_v35 = vadd.f32 %v604_v0, %v503_v43 }
  0x73   : > { %v955_v19 = vpop.eup %954  ;;  %v509_v48 = vmul.f32 %v953_v8, %v423_v2  ;;  %v590_v40 = vrot.slane %v583_v18, %v1092_v45  ;;  %v626_v62 = vadd.f32 %v625_v9, %v505_v58 }
  0x74   : > { %v957_v29 = vpop.eup %956  ;;  %v511_v55 = vmul.f32 %v955_v19, %v424_v42  ;;  %v606_v16 = vadd.f32 %v605_v35, %v507_v37 }
  0x75   : > { %v959_v44 = vpop.eup %958  ;;  %v513_v26 = vmul.f32 %v957_v29, %v425_v25  ;;  %596 = vst.msk [vmem:[%s205_s25] sm:$0x3] %vm1354_vm0, %v590_v40  ;;  %v627_v27 = vadd.f32 %v626_v62, %v509_v48 }
  0x76   : > { %v961_v59 = vpop.eup %960  ;;  %v515_v17 = vmul.f32 %v959_v44, %v426_v14  ;;  %v607_v41 = vadd.f32 %v606_v16, %v511_v55 }
  0x77   : > { %v963_v34 = vpop.eup %962  ;;  %v517_v49 = vmul.f32 %v961_v59, %v427_v21  ;;  %v628_v3 = vadd.f32 %v627_v27, %v513_v26 }
  0x78   : > { %v965_v30 = vpop.eup %964  ;;  %v519_v33 = vmul.f32 %v963_v34, %v428_v1  ;;  %v608_v46 = vadd.f32 %v607_v41, %v515_v17 }
  0x79   : > { %v967_v53 = vpop.eup %966  ;;  %v521_v47 = vmul.f32 %v965_v30, %v429_v10  ;;  %v629_v6 = vadd.f32 %v628_v3, %v517_v49 }
  0x7a   : > { %v969_v31 = vpop.eup %968  ;;  %v523_v38 = vmul.f32 %v967_v53, %v430_v63  ;;  %v609_v52 = vadd.f32 %v608_v46, %v519_v33 }
  0x7b   : > { %v971_v22 = vpop.eup %970  ;;  %v525_v57 = vmul.f32 %v969_v31, %v431_v39  ;;  %v630_v12 = vadd.f32 %v629_v6, %v521_v47 }
  0x7c   : > { %v973_v7 = vpop.eup %972  ;;  %v527_v56 = vmul.f32 %v971_v22, %v432_v4  ;;  %v610_v23 = vadd.f32 %v609_v52, %v523_v38 }
  0x7d   : > { %v529_v32 = vmul.f32 %v973_v7, %v433_v28  ;;  %v631_v15 = vadd.f32 %v630_v12, %v525_v57 }
  0x7e   : > { %v611_v61 = vadd.f32 %v610_v23, %v527_v56 }
  0x7f   : > { %v632_v11 = vadd.f32 %v631_v15, %v529_v32 }
  0x80   : > { %v612_v60 = vrot.slane %v611_v61, 4 }
  0x81   : > { %v633_v50 = vrot.slane %v632_v11, 4 }
  0x82   : > { %v613_v51 = vadd.f32 %v612_v60, %v611_v61 }
  0x83   : > { %v634_v5 = vadd.f32 %v633_v50, %v632_v11 }
  0x84   : > { %v614_v13 = vrot.slane %v613_v51, 2 }
  0x85   : > { %v635_v54 = vrot.slane %v634_v5, 2 }
  0x86   : > { %v615_v20 = vadd.f32 %v614_v13, %v613_v51 }
  0x87   : > { %v636_v2 = vadd.f32 %v635_v54, %v634_v5 }
  0x88   : > { %v616_v43 = vrot.slane %v615_v20, 1 }
  0x89   : > { %v637_v0 = vrot.slane %v636_v2, 1 }
  0x8a   : > { %v617_v36 = vadd.f32 %v616_v43, %v615_v20 }
  0x8b   : > { %v638_v42 = vadd.f32 %v637_v0, %v636_v2 }
  0x8c   : > { %v639_v58 = vmul.f32 0.0078125, %v617_v36 }
  0x8d   : > { %v640_v18 = vmul.f32 0.0078125, %v638_v42 }
  0x8f   : > { %v643_v9 = vcombine.low %v639_v58, %v640_v18 }
  0x91   : > { %v650_v8 = vrot.slane %v643_v9, %v1092_v45 }
  0x93   : > { %v657_v25 = vrot.slane %v650_v8, %v1092_v45 }
  0x95   : > { %659 = vst.msk [vmem:[%s209_s28] sm:$0x3] %vm1354_vm0, %v657_v25 }
  0x96 PF: > { %s14_s12 = sadd.s32 1, %s980_s12  }
  0x97   : > { %p11_p5 = scmp.ge.s32.totalorder %s14_s12, 4  }
  0x99   :  { %13 = sbr.rel (!%p11_p5) target bundleno = 1 (0x1), region = 73 }

// kernel: bayes_head_forward.35
= control target key start
LH: loop header
LB: loop body
LE: loop exit
PB: predicated region body
PF: predicated region fallthrough
CT: control target
= control target key end

     0   :  { %s479_s0 = inlined_call_operand.vmem [shape: f32[8,256], index: 0, kind: input, shape index: {}]   ;;  %s480_s1 = inlined_call_operand.vmem [shape: f32[1,256], index: 1, kind: input, shape index: {}]   ;;  %s481_s2 = inlined_call_operand.vmem [shape: f32[1,256], index: 2, kind: input, shape index: {}]   ;;  %s482_s3 = inlined_call_operand.vmem [shape: f32[256,128], index: 3, kind: input, shape index: {}]   ;;  %s483_s4 = inlined_call_operand.hbm [shape: f32[8,256], index: 4, kind: output, shape index: {0}]   ;;  %s484_s5 = inlined_call_operand.vmem [shape: f32[8,128], index: 5, kind: output, shape index: {1}]  }
   0x1   :  { %v110_v0 = vld [vmem:[%s482_s3 + $0x80] sm:$0xff]  ;;  %v111_v1 = vld [vmem:[%s482_s3 + $0x88] sm:$0xff]  ;;  %v112_v5 = vld [vmem:[%s482_s3 + $0x90] sm:$0xff] }
   0x2   :  { %v94_v2 = vld [vmem:[%s482_s3] sm:$0xff]  ;;  %v250_v3 = vpack.c.bf16 %v111_v1, %v110_v0  ;;  %v95_v4 = vld [vmem:[%s482_s3 + $0x8] sm:$0xff]  ;;  %v113_v6 = vld [vmem:[%s482_s3 + $0x98] sm:$0xff] }
   0x3   :  { %v252_v7 = vpack.c.bf16 %v95_v4, %v94_v2  ;;  %v254_v8 = vpack.c.bf16 %v113_v6, %v112_v5  ;;  %v96_v9 = vld [vmem:[%s482_s3 + $0x10] sm:$0xff]  ;;  %v97_v10 = vld [vmem:[%s482_s3 + $0x18] sm:$0xff]  ;;  %v114_v11 = vld [vmem:[%s482_s3 + $0xa0] sm:$0xff] }
   0x4   :  { %251 = vmatprep.subr.bf16.mxu0 %v250_v3  ;;  %v115_v12 = vld [vmem:[%s482_s3 + $0xa8] sm:$0xff]  ;;  %v256_v13 = vpack.c.bf16 %v97_v10, %v96_v9  ;;  %v98_v15 = vld [vmem:[%s482_s3 + $0x20] sm:$0xff]  ;;  %v116_v17 = vld [vmem:[%s482_s3 + $0xb0] sm:$0xff] }
   0x5   :  { %253 = vmatpush3.bf16.msra.mxu0 %v252_v7  ;;  %v258_v14 = vpack.c.bf16 %v115_v12, %v114_v11  ;;  %v99_v16 = vld [vmem:[%s482_s3 + $0x28] sm:$0xff]  ;;  %v117_v18 = vld [vmem:[%s482_s3 + $0xb8] sm:$0xff]  ;;  %v100_v20 = vld [vmem:[%s482_s3 + $0x30] sm:$0xff] }
   0x6   :  { %255 = vmatprep.subr.bf16.mxu0 %v254_v8  ;;  %v260_v19 = vpack.c.bf16 %v99_v16, %v98_v15  ;;  %v262_v21 = vpack.c.bf16 %v117_v18, %v116_v17  ;;  %v101_v22 = vld [vmem:[%s482_s3 + $0x38] sm:$0xff]  ;;  %v118_v23 = vld [vmem:[%s482_s3 + $0xc0] sm:$0xff]  ;;  %v119_v24 = vld [vmem:[%s482_s3 + $0xc8] sm:$0xff] }
   0x7   :  { %v399_v25 = vld [vmem:[%s479_s0 + $0x8] sm:$0xff]  ;;  %v407_v28 = vld [vmem:[%s479_s0] sm:$0xff]  ;;  %v264_v29 = vpack.c.bf16 %v101_v22, %v100_v20  ;;  %v266_v30 = vpack.c.bf16 %v119_v24, %v118_v23 }
   0x8   :  { %v28_v26 = vrot.slane %v399_v25, 4  ;;  %v35_v27 = vmul.f32 %v399_v25, %v399_v25  ;;  %v102_v31 = vld [vmem:[%s482_s3 + $0x40] sm:$0xff] }
   0x9   :  { %257 = vmatpush3.bf16.msra.mxu0 %v256_v13 }
   0xa   :  { %259 = vmatprep.subr.bf16.mxu0 %v258_v14 }
   0xd   :  { %261 = vmatpush3.bf16.msra.mxu0 %v260_v19 }
   0xe   :  { %11 = vsyncpa [#allocation3], 0  ;;  %263 = vmatprep.subr.bf16.mxu0 %v262_v21  ;;  %v103_v32 = vld [vmem:[%s482_s3 + $0x48] sm:$0xff]  ;;  %v120_v33 = vld [vmem:[%s482_s3 + $0xd0] sm:$0xff]  ;;  %v29_v35 = vadd.f32 %v28_v26, %v399_v25  ;;  %v42_v36 = vrot.slane %v35_v27, 4  ;;  %v22_v37 = vrot.slane %v407_v28, 4  ;;  %v34_v38 = vmul.f32 %v407_v28, %v407_v28 }
   0xf   :  { %v121_v34 = vld [vmem:[%s482_s3 + $0xd8] sm:$0xff]  ;;  %v268_v43 = vpack.c.bf16 %v103_v32, %v102_v31  ;;  %v104_v45 = vld [vmem:[%s482_s3 + $0x50] sm:$0xff]  ;;  %v122_v47 = vld [vmem:[%s482_s3 + $0xe0] sm:$0xff]  ;;  %v66_v18 = vlaneseq }
  0x10   :  { %v30_v39 = vrot.slane %v29_v35, 2  ;;  %v43_v40 = vadd.f32 %v42_v36, %v35_v27  ;;  %v23_v41 = vadd.f32 %v22_v37, %v407_v28  ;;  %v36_v42 = vrot.slane %v34_v38, 4  ;;  %v105_v46 = vld [vmem:[%s482_s3 + $0x58] sm:$0xff]  ;;  %v123_v48 = vld [vmem:[%s482_s3 + $0xe8] sm:$0xff]  ;;  %v106_v59 = vld [vmem:[%s482_s3 + $0x60] sm:$0xff] }
  0x11   :  { %265 = vmatpush3.bf16.msra.mxu0 %v264_v29  ;;  %v270_v44 = vpack.c.bf16 %v121_v34, %v120_v33  ;;  %v272_v57 = vpack.c.bf16 %v105_v46, %v104_v45  ;;  %v274_v58 = vpack.c.bf16 %v123_v48, %v122_v47  ;;  %v107_v60 = vld [vmem:[%s482_s3 + $0x68] sm:$0xff]  ;;  %v124_v1 = vld [vmem:[%s482_s3 + $0xf0] sm:$0xff]  ;;  %v125_v2 = vld [vmem:[%s482_s3 + $0xf8] sm:$0xff]  ;;  %v67_v22 = vshrl.u32 %v66_v18, 7 }
  0x12   :  { %267 = vmatprep.subr.bf16.mxu0 %v266_v30  ;;  %v31_v49 = vadd.f32 %v30_v39, %v29_v35  ;;  %v44_v50 = vrot.slane %v43_v40, 2  ;;  %v24_v51 = vrot.slane %v23_v41, 2  ;;  %v37_v52 = vadd.f32 %v36_v42, %v34_v38  ;;  %v108_v9 = vld [vmem:[%s482_s3 + $0x70] sm:$0xff]  ;;  %v109_v10 = vld [vmem:[%s482_s3 + $0x78] sm:$0xff]  ;;  %v64_v26 = vld [vmem:[%s480_s1] sm:$0x3] }
  0x13   :  { %v276_v7 = vpack.c.bf16 %v107_v60, %v106_v59  ;;  %v278_v8 = vpack.c.bf16 %v125_v2, %v124_v1  ;;  %v280_v17 = vpack.c.bf16 %v109_v10, %v108_v9  ;;  %v72_v24 = vsub.s32 1, %v67_v22  ;;  %v78_v30 = vld [vmem:[%s481_s2] sm:$0x3]  ;;  %s311_s1 = smov [#allocation2]  }
  0x14   :  { %v32_v53 = vrot.slane %v31_v49, 1  ;;  %v45_v54 = vadd.f32 %v44_v50, %v43_v40  ;;  %v25_v55 = vadd.f32 %v24_v51, %v23_v41  ;;  %v38_v56 = vrot.slane %v37_v52, 2  ;;  %s203_s2 = sshll.u32 %s311_s1, 4  ;;  %s204_s2 = int_to_ptr.vmem [resolvable:$true] %s203_s2 }
  0x15   :  { %269 = vmatpush3.bf16.msra.mxu0 %v268_v43  ;;  %v68_v29 = vsub.s32 0, %v67_v22  ;;  %v73_v31 = vrot.slane %v64_v26, %v72_v24  ;;  %v87_v35 = vrot.slane %v78_v30, %v72_v24  ;;  %s287_s13 = scalar_lea.vmem %s204_s2, 256  ;;  %p292_p1 = scmp.lt.s32.totalorder %s204_s2, %s204_s2 }
  0x16   :  { %271 = vmatprep.subr.bf16.mxu0 %v270_v44  ;;  %v33_v61 = vadd.f32 %v32_v53, %v31_v49  ;;  %v46_v62 = vrot.slane %v45_v54, 1  ;;  %v26_v63 = vrot.slane %v25_v55, 1  ;;  %v39_v0 = vadd.f32 %v38_v56, %v37_v52  ;;  %p288_p0 = scmp.ne.s32.totalorder %s204_s2, %s287_s13  ;;  %p293_p2 = scmp.lt.s32.totalorder %s287_s13, %s287_s13 }
  0x17   :  { %v69_v36 = vrot.slane %v64_v26, %v68_v29  ;;  %v83_v39 = vrot.slane %v78_v30, %v68_v29 }
  0x18   :  { %v47_v3 = vadd.f32 %v46_v62, %v45_v54  ;;  %v49_v4 = vmul.f32 0.5, %v33_v61  ;;  %v27_v5 = vadd.f32 %v26_v63, %v25_v55  ;;  %v40_v6 = vrot.slane %v39_v0, 1  ;;  %p294_p3 = por %p293_p2, %p292_p1 }
  0x19   :  { %273 = vmatpush3.bf16.msra.mxu0 %v272_v57 }
  0x1a   :  { %275 = vmatprep.subr.bf16.mxu0 %v274_v58  ;;  %v51_v11 = vmul.f32 0.5, %v47_v3  ;;  %v53_v12 = vmul.f32 %v49_v4, %v49_v4  ;;  %v41_v13 = vadd.f32 %v40_v6, %v39_v0  ;;  %v48_v14 = vmul.f32 0.5, %v27_v5  ;;  %p295_p4 = pnand %p294_p3, %p288_p0 }
  0x1b   :  { %v57_v27 = vsub.f32 %v399_v25, %v49_v4 }
  0x1c   :  { %v55_v15 = vsub.f32 %v51_v11, %v53_v12  ;;  %v50_v16 = vmul.f32 0.5, %v41_v13  ;;  %v52_v19 = vmul.f32 %v48_v14, %v48_v14  ;;  %v56_v33 = vsub.f32 %v407_v28, %v48_v14 }
  0x1d   :  { %277 = vmatpush3.bf16.msra.mxu0 %v276_v7 }
  0x1e   :  { %279 = vmatprep.subr.bf16.mxu0 %v278_v8  ;;  %v59_v20 = vadd.f32 1e-05, %v55_v15  ;;  %v54_v21 = vsub.f32 %v50_v16, %v52_v19 }
  0x20   :  { %283 = vrsqrt.f32 %v59_v20  ;;  %v58_v23 = vadd.f32 1e-05, %v54_v21 }
  0x21   :  { %281 = vmatpush3.bf16.msra.mxu0 %v280_v17 }
  0x22   :  { %285 = vrsqrt.f32 %v58_v23 }
  0x2a   :  { %v284_v32 = vpop.eup %283 }
  0x2b   :  { %v63_v34 = vmul.f32 %v284_v32, %v57_v27 }
  0x2c   :  { %v286_v37 = vpop.eup %285 }
  0x2d   :  { %v77_v38 = vmul.f32 %v73_v31, %v63_v34  ;;  %v62_v40 = vmul.f32 %v286_v37, %v56_v33 }
  0x2f   :  { %v91_v41 = vadd.f32 %v87_v35, %v77_v38  ;;  %v76_v42 = vmul.f32 %v69_v36, %v62_v40 }
  0x31   :  { %190 = vmatprep.mubr.f32.mxu0 %v91_v41  ;;  %93 = vst [vmem:[#allocation2 + $0x8] sm:$0xff] %v91_v41  ;;  %v90_v25 = vadd.f32 %v83_v39, %v76_v42 }
  0x33   :  { %191 = vmatmul.mubr.f32.vlgmr.msra.gmra.mrb[0].mxu0 %v90_v25  ;;  %92 = vst [vmem:[#allocation2] sm:$0xff] %v90_v25 }
  0x34   :  { %298 = shalt.err (!%p295_p4)
}
  0x35   :  { %s299_s15 = scalar_lea.hbm %s483_s4, 256 }
  0x36   :  { %p300_p5 = scmp.ne.s32.totalorder %s483_s4, %s299_s15  ;;  %p303_p6 = scmp.lt.u32.totalorder %s299_s15, %s483_s4 }
  0x38   :  { %p305_p7 = pnand %p303_p6, %p300_p5 }
  0x3a   :  { %308 = shalt.err (!%p305_p7)
}
  0x3b   :  { %206 = dma.vmem_to_hbm [thread:$0]  %s204_s2, 256, %s483_s4, [#allocation3]  }
 0x106   :  { %v247_v28 = vpop.f32.mrb[0].mxu0 }
 0x107   :  { %v248_v43 = vpop.f32.mrb[1].mxu0 }
 0x108   :  { %v249_v44 = vadd.f32 %v248_v43, %v247_v28 }
 0x10a   :  { %196 = vst [vmem:[%s484_s5] sm:$0xff] %v249_v44 }
 0x10b   :  { %309 = dma.done.wait [#allocation3], 256  }
 0x10c   :  { %310 = vsyncadd [#allocation3], 4294967040 }
 0x10d   :  { %214 = vsyncpa [#allocation3], 1 }

</bundles_post_ra>
